<compile_context>
chip_gen: v5e
topology: v5e:2x2
jax: 0.10.0
libtpu: 0.0.40
codegen_flags: <defaults>
</compile_context>

<pallas_src>
import functools
import math

import jax
import jax.numpy as jnp
from jax.experimental import pallas as pl
from jax.experimental.pallas import tpu as pltpu

F32 = jnp.float32
COMPUTE_DTYPE = jnp.bfloat16   # MXU operand dtype; accumulation stays f32
NEG_INF = -1e30                # large finite mask value (NaN-safe)

# canonical per-layer weight order (init + kernel argument order must match)
_WEIGHT_NAMES = (
    "wqkv_s", "bqkv_s", "wo_s", "bo_s", "ln1_g", "ln1_b",
    "wq_c", "bq_c", "wkv_c", "bkv_c", "wo_c", "bo_c", "ln2_g", "ln2_b",
    "w1", "b1", "w2", "b2", "ln3_g", "ln3_b",
)


# ----------------------------- in-kernel helpers -----------------------------


def _layer_norm(y, g, b, eps=1e-5):
    mean = jnp.mean(y, axis=-1, keepdims=True)
    var = jnp.mean(jnp.square(y - mean), axis=-1, keepdims=True)
    return (y - mean) * jax.lax.rsqrt(var + eps) * g + b


def _softmax_rows(s):
    s = s - jnp.max(s, axis=-1, keepdims=True)
    p = jnp.exp(s)
    return p * pl.reciprocal(jnp.sum(p, axis=-1, keepdims=True), approx=True)


# ----------------------------- fused decoder-stack kernel -----------------------------


def _decoder_stack_kernel(
    # data inputs (per batch-block, constant along the layer grid axis)
    x_in_ref, enc_ref, pad_ref,
    # self-attention params (per layer)
    wqkv_s_ref, bqkv_s_ref, wo_s_ref, bo_s_ref, ln1_g_ref, ln1_b_ref,
    # cross-attention params
    wq_c_ref, bq_c_ref, wkv_c_ref, bkv_c_ref, wo_c_ref, bo_c_ref, ln2_g_ref, ln2_b_ref,
    # feed-forward params
    w1_ref, b1_ref, w2_ref, b2_ref, ln3_g_ref, ln3_b_ref,
    # outputs
    out_ref, attn_ref,
    # scratch (persists across the layer axis)
    x_state,
    *, num_heads, neg_inf):
    Nb, L, E = x_state.shape
    S = enc_ref.shape[1]
    H = num_heads
    Dh = E // H
    M = Nb * L
    scale = 1.0 / math.sqrt(Dh)
    cdt = COMPUTE_DTYPE

    layer = pl.program_id(1)

    # First layer of this batch block: load the embedded tokens into the
    # VMEM-resident running state.
    @pl.when(layer == 0)
    def _():
        x_state[...] = x_in_ref[...]

    x = x_state[...].reshape(M, E)                       # (M, E) f32 residual stream

    # -------- additive self-attn mask: causal + key padding, built in-kernel --------
    rows = jax.lax.broadcasted_iota(jnp.int32, (L, L), 0)
    cols = jax.lax.broadcasted_iota(jnp.int32, (L, L), 1)
    causal = jnp.where(cols > rows, neg_inf, 0.0).astype(F32)       # (L, L)
    mask = causal[None, :, :] + pad_ref[...]                        # (Nb, L, L)

    def mha_core(q2d, k2d, v2d, wo, bo, q_len, kv_len, bias, want_probs):
        # q2d: (Nb*q_len, E) ; k2d, v2d: (Nb*kv_len, E) ; bias: None or (Nb, q_len, kv_len)
        # Heads exposed with a single reshape; per-head views index a non-lane axis.
        qh = q2d.reshape(Nb, q_len, H, Dh)
        kh = k2d.reshape(Nb, kv_len, H, Dh)
        vh = v2d.reshape(Nb, kv_len, H, Dh)
        ctx_rows = []
        probs = []
        for b in range(Nb):                 # static, small
            head_ctx = []
            head_p = []
            for h in range(H):              # static, small
                q = qh[b, :, h, :]          # (q_len, Dh)
                k = kh[b, :, h, :]          # (kv_len, Dh)
                v = vh[b, :, h, :]          # (kv_len, Dh)
                s = jax.lax.dot_general(
                    q.astype(cdt), k.astype(cdt), (((1,), (1,)), ((), ())),
                    preferred_element_type=F32) * scale
                if bias is not None:
                    s = s + bias[b]
                p = _softmax_rows(s)                                        # f32
                head_ctx.append(jnp.dot(p.astype(cdt), v.astype(cdt),
                                        preferred_element_type=F32))        # (q_len, Dh)
                if want_probs:
                    head_p.append(p)
            ctx_rows.append(jnp.concatenate(head_ctx, axis=-1))             # (q_len, E)
            if want_probs:
                probs.append(jnp.stack(head_p))                             # (H, q_len, kv_len)
        ctx = jnp.concatenate(ctx_rows, axis=0)                             # (Nb*q_len, E)
        # concat(heads) -> ONE out-projection matmul with K = E (MXU-friendly)
        out = jnp.dot(ctx.astype(cdt), wo, preferred_element_type=F32) + bo
        p_all = jnp.stack(probs) if want_probs else None                    # (Nb, H, q_len, kv_len)
        return out, p_all

    # ---------------- masked self-attention (fused QKV matmul, M = Nb*L) ----------------
    qkv = jnp.dot(x.astype(cdt), wqkv_s_ref[0],
                  preferred_element_type=F32) + bqkv_s_ref[0]               # (M, 3E)
    sa, _ = mha_core(qkv[:, :E], qkv[:, E:2 * E], qkv[:, 2 * E:],
                     wo_s_ref[0], bo_s_ref[0], L, L, mask, want_probs=False)
    x = _layer_norm(x + sa, ln1_g_ref[0], ln1_b_ref[0])

    # ---------------- cross-attention (emits per-head weights) ----------------
    enc = enc_ref[...].reshape(Nb * S, E)
    q_c = jnp.dot(x.astype(cdt), wq_c_ref[0],
                  preferred_element_type=F32) + bq_c_ref[0]                 # (M, E)
    kv_c = jnp.dot(enc.astype(cdt), wkv_c_ref[0],
                   preferred_element_type=F32) + bkv_c_ref[0]               # (Nb*S, 2E)
    ca, p_all = mha_core(q_c, kv_c[:, :E], kv_c[:, E:],
                         wo_c_ref[0], bo_c_ref[0], L, S, None, want_probs=True)
    attn_ref[0] = p_all                                  # single store for all heads/rows
    x = _layer_norm(x + ca, ln2_g_ref[0], ln2_b_ref[0])

    # ---------------- feed-forward ----------------
    hidden = jnp.dot(x.astype(cdt), w1_ref[0],
                     preferred_element_type=F32) + b1_ref[0]
    hidden = jnp.maximum(hidden, 0.0)
    ff = jnp.dot(hidden.astype(cdt), w2_ref[0],
                 preferred_element_type=F32) + b2_ref[0]
    x = _layer_norm(x + ff, ln3_g_ref[0], ln3_b_ref[0])

    # carry state to the next layer step; write HBM only after the last layer
    x_state[...] = x.reshape(Nb, L, E)

    @pl.when(layer == pl.num_programs(1) - 1)
    def _():
        out_ref[...] = x.reshape(Nb, L, E)


# ----------------------------- wrapper -----------------------------


def _pick_block_n(n, seq_len, target_rows=256):
    """Largest divisor of n with block_n*seq_len <= target_rows (raise matmul M)."""
    best = 1
    for cand in range(1, n + 1):
        if n % cand == 0 and cand * seq_len <= max(target_rows, seq_len):
            best = cand
    return best


def decoder_forward(tgt_cptn, src_img, params, *, num_heads, pad_id):
    # tgt_cptn: (N, L) int32 token ids ; src_img: (S, N, D) f32 (seq-first like PyTorch)
    N, L = tgt_cptn.shape
    S = src_img.shape[0]
    D = params["emb"].shape[1]
    H = num_heads
    num_layers = params["wqkv_s"].shape[0]
    max_len = params["pe"].shape[0]
    assert N <= max_len, "reference quirk: positional table indexed by batch dim"

    # embedding + scale + positional encoding (PE applied after permute in the
    # reference -> table indexed by the batch dimension; replicated exactly).
    x = params["emb"][tgt_cptn] * math.sqrt(D) + params["pe"][:N][:, None, :]   # (N, L, D)
    # TODO(synk): nn.Dropout layers are identity here (inference semantics).

    enc_bf = jnp.transpose(src_img, (1, 0, 2))                                   # (N, S, D)
    pad_bias = jnp.where(tgt_cptn == pad_id, NEG_INF, 0.0).astype(F32)[:, None, :]  # (N, 1, L)

    block_n = _pick_block_n(N, L)
    grid = (N // block_n, num_layers)

    def data_spec(shape):
        nd = len(shape)
        return pl.BlockSpec(shape, lambda nb, l, _nd=nd: (nb,) + (0,) * (_nd - 1))

    def layer_spec(arr):
        blk = (1,) + arr.shape[1:]
        nd = len(blk)
        return pl.BlockSpec(blk, lambda nb, l, _nd=nd: (l,) + (0,) * (_nd - 1))

    weights = [params[k] for k in _WEIGHT_NAMES]
    kern = functools.partial(_decoder_stack_kernel, num_heads=H, neg_inf=NEG_INF)

    out, attns = pl.pallas_call(
        kern,
        out_shape=(jax.ShapeDtypeStruct((N, L, D), F32),
                   jax.ShapeDtypeStruct((num_layers, N, H, L, S), F32)),
        grid=grid,
        in_specs=[data_spec((block_n, L, D)),
                  data_spec((block_n, S, D)),
                  data_spec((block_n, 1, L))] + [layer_spec(w) for w in weights],
        out_specs=(pl.BlockSpec((block_n, L, D), lambda nb, l: (nb, 0, 0)),
                   pl.BlockSpec((1, block_n, H, L, S), lambda nb, l: (l, nb, 0, 0, 0))),
        scratch_shapes=[pltpu.VMEM((block_n, L, D), F32)],
        compiler_params=pltpu.CompilerParams(
            dimension_semantics=("parallel", "arbitrary")),
    )(x, enc_bf, pad_bias, *weights)

    return jnp.transpose(out, (1, 0, 2)), attns            # (L, N, D), (layers, N, H, L, S)


# ----------------------------- parameter init -----------------------------


def init_params(key, vocab_size, d_model, num_heads, ff_dim, num_layers, max_len, pad_id):
    del num_heads  # head split happens inside the kernel
    E = d_model

    def rnd(k, shape, scale=0.05):
        return (scale * jax.random.normal(k, shape)).astype(F32)

    k_emb, k_layer = jax.random.split(key)

    emb = rnd(k_emb, (vocab_size, E), scale=1.0).at[pad_id].set(0.0)  # padding_idx row zero

    position = jnp.arange(max_len, dtype=F32)[:, None]
    div_term = jnp.exp(jnp.arange(0, E, 2, dtype=F32) * (-math.log(10000.0) / E))
    pe = jnp.zeros((max_len, E), F32)
    pe = pe.at[:, 0::2].set(jnp.sin(position * div_term))
    pe = pe.at[:, 1::2].set(jnp.cos(position * div_term))

    ks = jax.random.split(k_layer, 10)
    sa_w = rnd(ks[0], (3 * E, E)); sa_b = rnd(ks[1], (3 * E,))
    sa_ow = rnd(ks[2], (E, E));    sa_ob = rnd(ks[3], (E,))
    ca_w = rnd(ks[4], (3 * E, E)); ca_b = rnd(ks[5], (3 * E,))
    ca_ow = rnd(ks[6], (E, E));    ca_ob = rnd(ks[7], (E,))
    w1 = rnd(ks[8], (ff_dim, E));  b1 = jnp.zeros((ff_dim,), F32)
    w2 = rnd(ks[9], (E, ff_dim));  b2 = jnp.zeros((E,), F32)
    ln_g = jnp.ones((E,), F32);    ln_b = jnp.zeros((E,), F32)

    def stack(a, dtype=F32):
        # Reference deep-copies the layer -> every layer shares identical init weights.
        a = a.astype(dtype)
        return jnp.broadcast_to(a[None], (num_layers,) + a.shape)

    def wrow(v):
        return v.reshape(1, -1)

    cdt = COMPUTE_DTYPE
    layer_params = {
        # weights pre-transposed ONCE (x @ W form); matmul weights stored bf16
        "wqkv_s": stack(sa_w.T, cdt),        "bqkv_s": stack(wrow(sa_b)),
        "wo_s":   stack(sa_ow.T, cdt),       "bo_s":   stack(wrow(sa_ob)),
        "ln1_g":  stack(wrow(ln_g)),         "ln1_b":  stack(wrow(ln_b)),
        "wq_c":   stack(ca_w[:E].T, cdt),    "bq_c":   stack(wrow(ca_b[:E])),
        "wkv_c":  stack(ca_w[E:].T, cdt),    "bkv_c":  stack(wrow(ca_b[E:])),
        "wo_c":   stack(ca_ow.T, cdt),       "bo_c":   stack(wrow(ca_ob)),
        "ln2_g":  stack(wrow(ln_g)),         "ln2_b":  stack(wrow(ln_b)),
        "w1":     stack(w1.T, cdt),          "b1":     stack(wrow(b1)),
        "w2":     stack(w2.T, cdt),          "b2":     stack(wrow(b2)),
        "ln3_g":  stack(wrow(ln_g)),         "ln3_b":  stack(wrow(ln_b)),
    }
    return {"emb": emb, "pe": pe, **layer_params}


# ----------------------------- main -----------------------------

if __name__ == "__main__":
    vocab_size = 50
    d_model = 32
    num_heads = 4
    ff_dim = 64
    num_layers = 2
    max_len = 16
    pad_id = 0

    N, L, S = 2, 8, 8  # batch, target seq, source (image-feature) seq

    key = jax.random.PRNGKey(0)
    kp, kt, ksrc = jax.random.split(key, 3)

    params = init_params(kp, vocab_size, d_model, num_heads, ff_dim,
                         num_layers, max_len, pad_id)

    tgt_cptn = jax.random.randint(kt, (N, L), 1, vocab_size).astype(jnp.int32)
    tgt_cptn = tgt_cptn.at[0, -1].set(pad_id)   # exercise the key-padding mask
    src_img = jax.random.normal(ksrc, (S, N, d_model), dtype=F32)

    fwd = jax.jit(functools.partial(decoder_forward, num_heads=num_heads, pad_id=pad_id))
    out, attns_all = fwd(tgt_cptn, src_img, params)
    out, attns_all = jax.block_until_ready((out, attns_all))

    assert out.shape == (L, N, d_model), out.shape
    assert attns_all.shape == (num_layers, N, num_heads, L, S), attns_all.shape
    assert bool(jnp.isfinite(out).all()) and bool(jnp.isfinite(attns_all).all())

    print("KERNEL_OK")
</pallas_src>

<mosaic_0001>
module attributes {stable_mosaic.version = 11 : i64} {
  func.func @_decoder_stack_kernel(%arg0: i32, %arg1: i32, %arg2: memref<2x8x32xf32, #tpu.memory_space<vmem>>, %arg3: memref<2x8x32xf32, #tpu.memory_space<vmem>>, %arg4: memref<2x1x8xf32, #tpu.memory_space<vmem>>, %arg5: memref<1x32x96xbf16, #tpu.memory_space<vmem>>, %arg6: memref<1x1x96xf32, #tpu.memory_space<vmem>>, %arg7: memref<1x32x32xbf16, #tpu.memory_space<vmem>>, %arg8: memref<1x1x32xf32, #tpu.memory_space<vmem>>, %arg9: memref<1x1x32xf32, #tpu.memory_space<vmem>>, %arg10: memref<1x1x32xf32, #tpu.memory_space<vmem>>, %arg11: memref<1x32x32xbf16, #tpu.memory_space<vmem>>, %arg12: memref<1x1x32xf32, #tpu.memory_space<vmem>>, %arg13: memref<1x32x64xbf16, #tpu.memory_space<vmem>>, %arg14: memref<1x1x64xf32, #tpu.memory_space<vmem>>, %arg15: memref<1x32x32xbf16, #tpu.memory_space<vmem>>, %arg16: memref<1x1x32xf32, #tpu.memory_space<vmem>>, %arg17: memref<1x1x32xf32, #tpu.memory_space<vmem>>, %arg18: memref<1x1x32xf32, #tpu.memory_space<vmem>>, %arg19: memref<1x32x64xbf16, #tpu.memory_space<vmem>>, %arg20: memref<1x1x64xf32, #tpu.memory_space<vmem>>, %arg21: memref<1x64x32xbf16, #tpu.memory_space<vmem>>, %arg22: memref<1x1x32xf32, #tpu.memory_space<vmem>>, %arg23: memref<1x1x32xf32, #tpu.memory_space<vmem>>, %arg24: memref<1x1x32xf32, #tpu.memory_space<vmem>>, %arg25: memref<2x8x32xf32, #tpu.memory_space<vmem>>, %arg26: memref<1x2x4x8x8xf32, #tpu.memory_space<vmem>>, %arg27: memref<2x8x32xf32, #tpu.memory_space<vmem>>) attributes {dimension_semantics = [#tpu.dimension_semantics<parallel>, #tpu.dimension_semantics<arbitrary>], iteration_bounds = array<i64: 1, 2>, scalar_prefetch = 0 : i64, scratch_operands = 1 : i64, tpu.core_type = #tpu.core_type<tc>, window_params = [{transform_indices = @transform_0, window_bounds = array<i64: 2, 8, 32>}, {transform_indices = @transform_1, window_bounds = array<i64: 2, 8, 32>}, {transform_indices = @transform_2, window_bounds = array<i64: 2, 1, 8>}, {transform_indices = @transform_3, window_bounds = array<i64: 1, 32, 96>}, {transform_indices = @transform_4, window_bounds = array<i64: 1, 1, 96>}, {transform_indices = @transform_5, window_bounds = array<i64: 1, 32, 32>}, {transform_indices = @transform_6, window_bounds = array<i64: 1, 1, 32>}, {transform_indices = @transform_7, window_bounds = array<i64: 1, 1, 32>}, {transform_indices = @transform_8, window_bounds = array<i64: 1, 1, 32>}, {transform_indices = @transform_9, window_bounds = array<i64: 1, 32, 32>}, {transform_indices = @transform_10, window_bounds = array<i64: 1, 1, 32>}, {transform_indices = @transform_11, window_bounds = array<i64: 1, 32, 64>}, {transform_indices = @transform_12, window_bounds = array<i64: 1, 1, 64>}, {transform_indices = @transform_13, window_bounds = array<i64: 1, 32, 32>}, {transform_indices = @transform_14, window_bounds = array<i64: 1, 1, 32>}, {transform_indices = @transform_15, window_bounds = array<i64: 1, 1, 32>}, {transform_indices = @transform_16, window_bounds = array<i64: 1, 1, 32>}, {transform_indices = @transform_17, window_bounds = array<i64: 1, 32, 64>}, {transform_indices = @transform_18, window_bounds = array<i64: 1, 1, 64>}, {transform_indices = @transform_19, window_bounds = array<i64: 1, 64, 32>}, {transform_indices = @transform_20, window_bounds = array<i64: 1, 1, 32>}, {transform_indices = @transform_21, window_bounds = array<i64: 1, 1, 32>}, {transform_indices = @transform_22, window_bounds = array<i64: 1, 1, 32>}, {transform_indices = @transform_23, window_bounds = array<i64: 2, 8, 32>}, {transform_indices = @transform_24, window_bounds = array<i64: 1, 2, 4, 8, 8>}]} {
    %c0_i32 = arith.constant 0 : i32
    %0 = arith.cmpi eq, %arg1, %c0_i32 : i32
    %1 = arith.extui %0 : i1 to i32
    %c0_i32_0 = arith.constant 0 : i32
    %2 = arith.cmpi ne, %1, %c0_i32_0 : i32
    scf.if %2 {
      %c0_182 = arith.constant 0 : index
      %c0_183 = arith.constant 0 : index
      %c0_184 = arith.constant 0 : index
      %603 = vector.load %arg2[%c0_182, %c0_183, %c0_184] : memref<2x8x32xf32, #tpu.memory_space<vmem>>, vector<2x8x32xf32>
      %c0_185 = arith.constant 0 : index
      %c0_186 = arith.constant 0 : index
      %c0_187 = arith.constant 0 : index
      %604 = vector.load %arg27[%c0_185, %c0_186, %c0_187] : memref<2x8x32xf32, #tpu.memory_space<vmem>>, vector<2x8x32xf32>
      tpu.vector_store %arg27[%c0_185, %c0_186, %c0_187], %603 {strides = array<i32>} : memref<2x8x32xf32, #tpu.memory_space<vmem>>, vector<2x8x32xf32>,
    } else {
    }
    %c0 = arith.constant 0 : index
    %c0_1 = arith.constant 0 : index
    %c0_2 = arith.constant 0 : index
    %3 = vector.load %arg27[%c0, %c0_1, %c0_2] : memref<2x8x32xf32, #tpu.memory_space<vmem>>, vector<2x8x32xf32>
    %4 = vector.shape_cast %3 : vector<2x8x32xf32> to vector<16x32xf32>
    %5 = tpu.iota {dimensions = array<i32: 0>} : vector<8x8xi32>
    %6 = tpu.iota {dimensions = array<i32: 1>} : vector<8x8xi32>
    %7 = arith.cmpi sgt, %6, %5 : vector<8x8xi32>
    %cst = arith.constant -1.000000e+30 : f32
    %cst_3 = arith.constant 0.000000e+00 : f32
    %8 = vector.broadcast %cst : f32 to vector<8x8xf32>
    %9 = vector.broadcast %cst_3 : f32 to vector<8x8xf32>
    %10 = arith.select %7, %8, %9 : vector<8x8xi1>, vector<8x8xf32>
    %11 = vector.shape_cast %10 : vector<8x8xf32> to vector<1x8x8xf32>
    %c0_4 = arith.constant 0 : index
    %c0_5 = arith.constant 0 : index
    %c0_6 = arith.constant 0 : index
    %12 = vector.load %arg4[%c0_4, %c0_5, %c0_6] : memref<2x1x8xf32, #tpu.memory_space<vmem>>, vector<2x1x8xf32>
    %13 = vector.broadcast %11 : vector<1x8x8xf32> to vector<2x8x8xf32>
    %14 = vector.broadcast %12 : vector<2x1x8xf32> to vector<2x8x8xf32>
    %15 = arith.addf %13, %14 : vector<2x8x8xf32>
    %16 = arith.truncf %4 : vector<16x32xf32> to vector<16x32xbf16>
    %c0_7 = arith.constant 0 : index
    %c0_8 = arith.constant 0 : index
    %c0_9 = arith.constant 0 : index
    %17 = vector.load %arg5[%c0_7, %c0_8, %c0_9] : memref<1x32x96xbf16, #tpu.memory_space<vmem>>, vector<1x32x96xbf16>
    %18 = vector.shape_cast %17 : vector<1x32x96xbf16> to vector<32x96xbf16>
    %cst_10 = arith.constant dense<0.000000e+00> : vector<16x96xf32>
    %19 = tpu.matmul %16, %18, %cst_10 {dimension_numbers = #tpu.dot_dimension_numbers<[1], [0], [0], [1], [0, 0, 1, 1], [], []>} : vector<16x32xbf16>, vector<32x96xbf16>, vector<16x96xf32> -> vector<16x96xf32>
    %c0_11 = arith.constant 0 : index
    %c0_12 = arith.constant 0 : index
    %c0_13 = arith.constant 0 : index
    %20 = vector.load %arg6[%c0_11, %c0_12, %c0_13] : memref<1x1x96xf32, #tpu.memory_space<vmem>>, vector<1x1x96xf32>
    %21 = vector.shape_cast %20 : vector<1x1x96xf32> to vector<1x96xf32>
    %22 = vector.broadcast %21 : vector<1x96xf32> to vector<16x96xf32>
    %23 = arith.addf %19, %22 : vector<16x96xf32>
    %24 = vector.extract_strided_slice %23 {offsets = [0, 0], sizes = [16, 32], strides = [1, 1]} : vector<16x96xf32> to vector<16x32xf32>
    %25 = vector.extract_strided_slice %23 {offsets = [0, 32], sizes = [16, 32], strides = [1, 1]} : vector<16x96xf32> to vector<16x32xf32>
    %26 = vector.extract_strided_slice %23 {offsets = [0, 64], sizes = [16, 32], strides = [1, 1]} : vector<16x96xf32> to vector<16x32xf32>
    %c0_14 = arith.constant 0 : index
    %c0_15 = arith.constant 0 : index
    %c0_16 = arith.constant 0 : index
    %27 = vector.load %arg7[%c0_14, %c0_15, %c0_16] : memref<1x32x32xbf16, #tpu.memory_space<vmem>>, vector<1x32x32xbf16>
    %28 = vector.shape_cast %27 : vector<1x32x32xbf16> to vector<32x32xbf16>
    %c0_17 = arith.constant 0 : index
    %c0_18 = arith.constant 0 : index
    %c0_19 = arith.constant 0 : index
    %29 = vector.load %arg8[%c0_17, %c0_18, %c0_19] : memref<1x1x32xf32, #tpu.memory_space<vmem>>, vector<1x1x32xf32>
    %30 = vector.shape_cast %29 : vector<1x1x32xf32> to vector<1x32xf32>
    %31 = vector.shape_cast %24 : vector<16x32xf32> to vector<2x8x4x8xf32>
    %32 = vector.shape_cast %25 : vector<16x32xf32> to vector<2x8x4x8xf32>
    %33 = vector.shape_cast %26 : vector<16x32xf32> to vector<2x8x4x8xf32>
    %34 = vector.extract_strided_slice %31 {offsets = [0, 0, 0, 0], sizes = [1, 8, 1, 8], strides = [1, 1, 1, 1]} : vector<2x8x4x8xf32> to vector<1x8x1x8xf32>
    %35 = vector.shape_cast %34 : vector<1x8x1x8xf32> to vector<8x8xf32>
    %36 = vector.extract_strided_slice %32 {offsets = [0, 0, 0, 0], sizes = [1, 8, 1, 8], strides = [1, 1, 1, 1]} : vector<2x8x4x8xf32> to vector<1x8x1x8xf32>
    %37 = vector.shape_cast %36 : vector<1x8x1x8xf32> to vector<8x8xf32>
    %38 = vector.extract_strided_slice %33 {offsets = [0, 0, 0, 0], sizes = [1, 8, 1, 8], strides = [1, 1, 1, 1]} : vector<2x8x4x8xf32> to vector<1x8x1x8xf32>
    %39 = vector.shape_cast %38 : vector<1x8x1x8xf32> to vector<8x8xf32>
    %40 = arith.truncf %35 : vector<8x8xf32> to vector<8x8xbf16>
    %41 = arith.truncf %37 : vector<8x8xf32> to vector<8x8xbf16>
    %cst_20 = arith.constant dense<0.000000e+00> : vector<8x8xf32>
    %42 = tpu.matmul %40, %41, %cst_20 {dimension_numbers = #tpu.dot_dimension_numbers<[1], [1], [0], [0], [0, 0, 1, 0], [], []>} : vector<8x8xbf16>, vector<8x8xbf16>, vector<8x8xf32> -> vector<8x8xf32>
    %cst_21 = arith.constant 0.353553385 : f32
    %43 = vector.broadcast %cst_21 : f32 to vector<8x8xf32>
    %44 = arith.mulf %42, %43 : vector<8x8xf32>
    %45 = vector.extract_strided_slice %15 {offsets = [0, 0, 0], sizes = [1, 8, 8], strides = [1, 1, 1]} : vector<2x8x8xf32> to vector<1x8x8xf32>
    %46 = vector.shape_cast %45 : vector<1x8x8xf32> to vector<8x8xf32>
    %47 = arith.addf %44, %46 : vector<8x8xf32>
    %cst_22 = arith.constant dense<0xFF800000> : vector<8xf32>
    %48 = vector.multi_reduction <maximumf>, %47, %cst_22 [1] : vector<8x8xf32> to vector<8xf32>
    %49 = vector.shape_cast %48 : vector<8xf32> to vector<8x1xf32>
    %50 = vector.broadcast %49 : vector<8x1xf32> to vector<8x8xf32>
    %51 = arith.subf %47, %50 : vector<8x8xf32>
    %52 = math.exp %51 : vector<8x8xf32>
    %cst_23 = arith.constant dense<0.000000e+00> : vector<8xf32>
    %53 = vector.multi_reduction <add>, %52, %cst_23 [1] : vector<8x8xf32> to vector<8xf32>
    %54 = vector.shape_cast %53 : vector<8xf32> to vector<8x1xf32>
    %55 = tpu.reciprocal %54 {approx = true} : vector<8x1xf32> -> vector<8x1xf32>
    %56 = vector.broadcast %55 : vector<8x1xf32> to vector<8x8xf32>
    %57 = arith.mulf %52, %56 : vector<8x8xf32>
    %58 = arith.truncf %57 : vector<8x8xf32> to vector<8x8xbf16>
    %59 = arith.truncf %39 : vector<8x8xf32> to vector<8x8xbf16>
    %cst_24 = arith.constant dense<0.000000e+00> : vector<8x8xf32>
    %60 = tpu.matmul %58, %59, %cst_24 {dimension_numbers = #tpu.dot_dimension_numbers<[1], [0], [0], [1], [0, 0, 1, 1], [], []>} : vector<8x8xbf16>, vector<8x8xbf16>, vector<8x8xf32> -> vector<8x8xf32>
    %61 = vector.extract_strided_slice %31 {offsets = [0, 0, 1, 0], sizes = [1, 8, 1, 8], strides = [1, 1, 1, 1]} : vector<2x8x4x8xf32> to vector<1x8x1x8xf32>
    %62 = vector.shape_cast %61 : vector<1x8x1x8xf32> to vector<8x8xf32>
    %63 = vector.extract_strided_slice %32 {offsets = [0, 0, 1, 0], sizes = [1, 8, 1, 8], strides = [1, 1, 1, 1]} : vector<2x8x4x8xf32> to vector<1x8x1x8xf32>
    %64 = vector.shape_cast %63 : vector<1x8x1x8xf32> to vector<8x8xf32>
    %65 = vector.extract_strided_slice %33 {offsets = [0, 0, 1, 0], sizes = [1, 8, 1, 8], strides = [1, 1, 1, 1]} : vector<2x8x4x8xf32> to vector<1x8x1x8xf32>
    %66 = vector.shape_cast %65 : vector<1x8x1x8xf32> to vector<8x8xf32>
    %67 = arith.truncf %62 : vector<8x8xf32> to vector<8x8xbf16>
    %68 = arith.truncf %64 : vector<8x8xf32> to vector<8x8xbf16>
    %cst_25 = arith.constant dense<0.000000e+00> : vector<8x8xf32>
    %69 = tpu.matmul %67, %68, %cst_25 {dimension_numbers = #tpu.dot_dimension_numbers<[1], [1], [0], [0], [0, 0, 1, 0], [], []>} : vector<8x8xbf16>, vector<8x8xbf16>, vector<8x8xf32> -> vector<8x8xf32>
    %cst_26 = arith.constant 0.353553385 : f32
    %70 = vector.broadcast %cst_26 : f32 to vector<8x8xf32>
    %71 = arith.mulf %69, %70 : vector<8x8xf32>
    %72 = vector.extract_strided_slice %15 {offsets = [0, 0, 0], sizes = [1, 8, 8], strides = [1, 1, 1]} : vector<2x8x8xf32> to vector<1x8x8xf32>
    %73 = vector.shape_cast %72 : vector<1x8x8xf32> to vector<8x8xf32>
    %74 = arith.addf %71, %73 : vector<8x8xf32>
    %cst_27 = arith.constant dense<0xFF800000> : vector<8xf32>
    %75 = vector.multi_reduction <maximumf>, %74, %cst_27 [1] : vector<8x8xf32> to vector<8xf32>
    %76 = vector.shape_cast %75 : vector<8xf32> to vector<8x1xf32>
    %77 = vector.broadcast %76 : vector<8x1xf32> to vector<8x8xf32>
    %78 = arith.subf %74, %77 : vector<8x8xf32>
    %79 = math.exp %78 : vector<8x8xf32>
    %cst_28 = arith.constant dense<0.000000e+00> : vector<8xf32>
    %80 = vector.multi_reduction <add>, %79, %cst_28 [1] : vector<8x8xf32> to vector<8xf32>
    %81 = vector.shape_cast %80 : vector<8xf32> to vector<8x1xf32>
    %82 = tpu.reciprocal %81 {approx = true} : vector<8x1xf32> -> vector<8x1xf32>
    %83 = vector.broadcast %82 : vector<8x1xf32> to vector<8x8xf32>
    %84 = arith.mulf %79, %83 : vector<8x8xf32>
    %85 = arith.truncf %84 : vector<8x8xf32> to vector<8x8xbf16>
    %86 = arith.truncf %66 : vector<8x8xf32> to vector<8x8xbf16>
    %cst_29 = arith.constant dense<0.000000e+00> : vector<8x8xf32>
    %87 = tpu.matmul %85, %86, %cst_29 {dimension_numbers = #tpu.dot_dimension_numbers<[1], [0], [0], [1], [0, 0, 1, 1], [], []>} : vector<8x8xbf16>, vector<8x8xbf16>, vector<8x8xf32> -> vector<8x8xf32>
    %88 = vector.extract_strided_slice %31 {offsets = [0, 0, 2, 0], sizes = [1, 8, 1, 8], strides = [1, 1, 1, 1]} : vector<2x8x4x8xf32> to vector<1x8x1x8xf32>
    %89 = vector.shape_cast %88 : vector<1x8x1x8xf32> to vector<8x8xf32>
    %90 = vector.extract_strided_slice %32 {offsets = [0, 0, 2, 0], sizes = [1, 8, 1, 8], strides = [1, 1, 1, 1]} : vector<2x8x4x8xf32> to vector<1x8x1x8xf32>
    %91 = vector.shape_cast %90 : vector<1x8x1x8xf32> to vector<8x8xf32>
    %92 = vector.extract_strided_slice %33 {offsets = [0, 0, 2, 0], sizes = [1, 8, 1, 8], strides = [1, 1, 1, 1]} : vector<2x8x4x8xf32> to vector<1x8x1x8xf32>
    %93 = vector.shape_cast %92 : vector<1x8x1x8xf32> to vector<8x8xf32>
    %94 = arith.truncf %89 : vector<8x8xf32> to vector<8x8xbf16>
    %95 = arith.truncf %91 : vector<8x8xf32> to vector<8x8xbf16>
    %cst_30 = arith.constant dense<0.000000e+00> : vector<8x8xf32>
    %96 = tpu.matmul %94, %95, %cst_30 {dimension_numbers = #tpu.dot_dimension_numbers<[1], [1], [0], [0], [0, 0, 1, 0], [], []>} : vector<8x8xbf16>, vector<8x8xbf16>, vector<8x8xf32> -> vector<8x8xf32>
    %cst_31 = arith.constant 0.353553385 : f32
    %97 = vector.broadcast %cst_31 : f32 to vector<8x8xf32>
    %98 = arith.mulf %96, %97 : vector<8x8xf32>
    %99 = vector.extract_strided_slice %15 {offsets = [0, 0, 0], sizes = [1, 8, 8], strides = [1, 1, 1]} : vector<2x8x8xf32> to vector<1x8x8xf32>
    %100 = vector.shape_cast %99 : vector<1x8x8xf32> to vector<8x8xf32>
    %101 = arith.addf %98, %100 : vector<8x8xf32>
    %cst_32 = arith.constant dense<0xFF800000> : vector<8xf32>
    %102 = vector.multi_reduction <maximumf>, %101, %cst_32 [1] : vector<8x8xf32> to vector<8xf32>
    %103 = vector.shape_cast %102 : vector<8xf32> to vector<8x1xf32>
    %104 = vector.broadcast %103 : vector<8x1xf32> to vector<8x8xf32>
    %105 = arith.subf %101, %104 : vector<8x8xf32>
    %106 = math.exp %105 : vector<8x8xf32>
    %cst_33 = arith.constant dense<0.000000e+00> : vector<8xf32>
    %107 = vector.multi_reduction <add>, %106, %cst_33 [1] : vector<8x8xf32> to vector<8xf32>
    %108 = vector.shape_cast %107 : vector<8xf32> to vector<8x1xf32>
    %109 = tpu.reciprocal %108 {approx = true} : vector<8x1xf32> -> vector<8x1xf32>
    %110 = vector.broadcast %109 : vector<8x1xf32> to vector<8x8xf32>
    %111 = arith.mulf %106, %110 : vector<8x8xf32>
    %112 = arith.truncf %111 : vector<8x8xf32> to vector<8x8xbf16>
    %113 = arith.truncf %93 : vector<8x8xf32> to vector<8x8xbf16>
    %cst_34 = arith.constant dense<0.000000e+00> : vector<8x8xf32>
    %114 = tpu.matmul %112, %113, %cst_34 {dimension_numbers = #tpu.dot_dimension_numbers<[1], [0], [0], [1], [0, 0, 1, 1], [], []>} : vector<8x8xbf16>, vector<8x8xbf16>, vector<8x8xf32> -> vector<8x8xf32>
    %115 = vector.extract_strided_slice %31 {offsets = [0, 0, 3, 0], sizes = [1, 8, 1, 8], strides = [1, 1, 1, 1]} : vector<2x8x4x8xf32> to vector<1x8x1x8xf32>
    %116 = vector.shape_cast %115 : vector<1x8x1x8xf32> to vector<8x8xf32>
    %117 = vector.extract_strided_slice %32 {offsets = [0, 0, 3, 0], sizes = [1, 8, 1, 8], strides = [1, 1, 1, 1]} : vector<2x8x4x8xf32> to vector<1x8x1x8xf32>
    %118 = vector.shape_cast %117 : vector<1x8x1x8xf32> to vector<8x8xf32>
    %119 = vector.extract_strided_slice %33 {offsets = [0, 0, 3, 0], sizes = [1, 8, 1, 8], strides = [1, 1, 1, 1]} : vector<2x8x4x8xf32> to vector<1x8x1x8xf32>
    %120 = vector.shape_cast %119 : vector<1x8x1x8xf32> to vector<8x8xf32>
    %121 = arith.truncf %116 : vector<8x8xf32> to vector<8x8xbf16>
    %122 = arith.truncf %118 : vector<8x8xf32> to vector<8x8xbf16>
    %cst_35 = arith.constant dense<0.000000e+00> : vector<8x8xf32>
    %123 = tpu.matmul %121, %122, %cst_35 {dimension_numbers = #tpu.dot_dimension_numbers<[1], [1], [0], [0], [0, 0, 1, 0], [], []>} : vector<8x8xbf16>, vector<8x8xbf16>, vector<8x8xf32> -> vector<8x8xf32>
    %cst_36 = arith.constant 0.353553385 : f32
    %124 = vector.broadcast %cst_36 : f32 to vector<8x8xf32>
    %125 = arith.mulf %123, %124 : vector<8x8xf32>
    %126 = vector.extract_strided_slice %15 {offsets = [0, 0, 0], sizes = [1, 8, 8], strides = [1, 1, 1]} : vector<2x8x8xf32> to vector<1x8x8xf32>
    %127 = vector.shape_cast %126 : vector<1x8x8xf32> to vector<8x8xf32>
    %128 = arith.addf %125, %127 : vector<8x8xf32>
    %cst_37 = arith.constant dense<0xFF800000> : vector<8xf32>
    %129 = vector.multi_reduction <maximumf>, %128, %cst_37 [1] : vector<8x8xf32> to vector<8xf32>
    %130 = vector.shape_cast %129 : vector<8xf32> to vector<8x1xf32>
    %131 = vector.broadcast %130 : vector<8x1xf32> to vector<8x8xf32>
    %132 = arith.subf %128, %131 : vector<8x8xf32>
    %133 = math.exp %132 : vector<8x8xf32>
    %cst_38 = arith.constant dense<0.000000e+00> : vector<8xf32>
    %134 = vector.multi_reduction <add>, %133, %cst_38 [1] : vector<8x8xf32> to vector<8xf32>
    %135 = vector.shape_cast %134 : vector<8xf32> to vector<8x1xf32>
    %136 = tpu.reciprocal %135 {approx = true} : vector<8x1xf32> -> vector<8x1xf32>
    %137 = vector.broadcast %136 : vector<8x1xf32> to vector<8x8xf32>
    %138 = arith.mulf %133, %137 : vector<8x8xf32>
    %139 = arith.truncf %138 : vector<8x8xf32> to vector<8x8xbf16>
    %140 = arith.truncf %120 : vector<8x8xf32> to vector<8x8xbf16>
    %cst_39 = arith.constant dense<0.000000e+00> : vector<8x8xf32>
    %141 = tpu.matmul %139, %140, %cst_39 {dimension_numbers = #tpu.dot_dimension_numbers<[1], [0], [0], [1], [0, 0, 1, 1], [], []>} : vector<8x8xbf16>, vector<8x8xbf16>, vector<8x8xf32> -> vector<8x8xf32>
    %142 = tpu.concatenate %60, %87, %114, %141 in 1 : vector<8x8xf32>, vector<8x8xf32>, vector<8x8xf32>, vector<8x8xf32> -> vector<8x32xf32>
    %143 = vector.extract_strided_slice %31 {offsets = [1, 0, 0, 0], sizes = [1, 8, 1, 8], strides = [1, 1, 1, 1]} : vector<2x8x4x8xf32> to vector<1x8x1x8xf32>
    %144 = vector.shape_cast %143 : vector<1x8x1x8xf32> to vector<8x8xf32>
    %145 = vector.extract_strided_slice %32 {offsets = [1, 0, 0, 0], sizes = [1, 8, 1, 8], strides = [1, 1, 1, 1]} : vector<2x8x4x8xf32> to vector<1x8x1x8xf32>
    %146 = vector.shape_cast %145 : vector<1x8x1x8xf32> to vector<8x8xf32>
    %147 = vector.extract_strided_slice %33 {offsets = [1, 0, 0, 0], sizes = [1, 8, 1, 8], strides = [1, 1, 1, 1]} : vector<2x8x4x8xf32> to vector<1x8x1x8xf32>
    %148 = vector.shape_cast %147 : vector<1x8x1x8xf32> to vector<8x8xf32>
    %149 = arith.truncf %144 : vector<8x8xf32> to vector<8x8xbf16>
    %150 = arith.truncf %146 : vector<8x8xf32> to vector<8x8xbf16>
    %cst_40 = arith.constant dense<0.000000e+00> : vector<8x8xf32>
    %151 = tpu.matmul %149, %150, %cst_40 {dimension_numbers = #tpu.dot_dimension_numbers<[1], [1], [0], [0], [0, 0, 1, 0], [], []>} : vector<8x8xbf16>, vector<8x8xbf16>, vector<8x8xf32> -> vector<8x8xf32>
    %cst_41 = arith.constant 0.353553385 : f32
    %152 = vector.broadcast %cst_41 : f32 to vector<8x8xf32>
    %153 = arith.mulf %151, %152 : vector<8x8xf32>
    %154 = vector.extract_strided_slice %15 {offsets = [1, 0, 0], sizes = [1, 8, 8], strides = [1, 1, 1]} : vector<2x8x8xf32> to vector<1x8x8xf32>
    %155 = vector.shape_cast %154 : vector<1x8x8xf32> to vector<8x8xf32>
    %156 = arith.addf %153, %155 : vector<8x8xf32>
    %cst_42 = arith.constant dense<0xFF800000> : vector<8xf32>
    %157 = vector.multi_reduction <maximumf>, %156, %cst_42 [1] : vector<8x8xf32> to vector<8xf32>
    %158 = vector.shape_cast %157 : vector<8xf32> to vector<8x1xf32>
    %159 = vector.broadcast %158 : vector<8x1xf32> to vector<8x8xf32>
    %160 = arith.subf %156, %159 : vector<8x8xf32>
    %161 = math.exp %160 : vector<8x8xf32>
    %cst_43 = arith.constant dense<0.000000e+00> : vector<8xf32>
    %162 = vector.multi_reduction <add>, %161, %cst_43 [1] : vector<8x8xf32> to vector<8xf32>
    %163 = vector.shape_cast %162 : vector<8xf32> to vector<8x1xf32>
    %164 = tpu.reciprocal %163 {approx = true} : vector<8x1xf32> -> vector<8x1xf32>
    %165 = vector.broadcast %164 : vector<8x1xf32> to vector<8x8xf32>
    %166 = arith.mulf %161, %165 : vector<8x8xf32>
    %167 = arith.truncf %166 : vector<8x8xf32> to vector<8x8xbf16>
    %168 = arith.truncf %148 : vector<8x8xf32> to vector<8x8xbf16>
    %cst_44 = arith.constant dense<0.000000e+00> : vector<8x8xf32>
    %169 = tpu.matmul %167, %168, %cst_44 {dimension_numbers = #tpu.dot_dimension_numbers<[1], [0], [0], [1], [0, 0, 1, 1], [], []>} : vector<8x8xbf16>, vector<8x8xbf16>, vector<8x8xf32> -> vector<8x8xf32>
    %170 = vector.extract_strided_slice %31 {offsets = [1, 0, 1, 0], sizes = [1, 8, 1, 8], strides = [1, 1, 1, 1]} : vector<2x8x4x8xf32> to vector<1x8x1x8xf32>
    %171 = vector.shape_cast %170 : vector<1x8x1x8xf32> to vector<8x8xf32>
    %172 = vector.extract_strided_slice %32 {offsets = [1, 0, 1, 0], sizes = [1, 8, 1, 8], strides = [1, 1, 1, 1]} : vector<2x8x4x8xf32> to vector<1x8x1x8xf32>
    %173 = vector.shape_cast %172 : vector<1x8x1x8xf32> to vector<8x8xf32>
    %174 = vector.extract_strided_slice %33 {offsets = [1, 0, 1, 0], sizes = [1, 8, 1, 8], strides = [1, 1, 1, 1]} : vector<2x8x4x8xf32> to vector<1x8x1x8xf32>
    %175 = vector.shape_cast %174 : vector<1x8x1x8xf32> to vector<8x8xf32>
    %176 = arith.truncf %171 : vector<8x8xf32> to vector<8x8xbf16>
    %177 = arith.truncf %173 : vector<8x8xf32> to vector<8x8xbf16>
    %cst_45 = arith.constant dense<0.000000e+00> : vector<8x8xf32>
    %178 = tpu.matmul %176, %177, %cst_45 {dimension_numbers = #tpu.dot_dimension_numbers<[1], [1], [0], [0], [0, 0, 1, 0], [], []>} : vector<8x8xbf16>, vector<8x8xbf16>, vector<8x8xf32> -> vector<8x8xf32>
    %cst_46 = arith.constant 0.353553385 : f32
    %179 = vector.broadcast %cst_46 : f32 to vector<8x8xf32>
    %180 = arith.mulf %178, %179 : vector<8x8xf32>
    %181 = vector.extract_strided_slice %15 {offsets = [1, 0, 0], sizes = [1, 8, 8], strides = [1, 1, 1]} : vector<2x8x8xf32> to vector<1x8x8xf32>
    %182 = vector.shape_cast %181 : vector<1x8x8xf32> to vector<8x8xf32>
    %183 = arith.addf %180, %182 : vector<8x8xf32>
    %cst_47 = arith.constant dense<0xFF800000> : vector<8xf32>
    %184 = vector.multi_reduction <maximumf>, %183, %cst_47 [1] : vector<8x8xf32> to vector<8xf32>
    %185 = vector.shape_cast %184 : vector<8xf32> to vector<8x1xf32>
    %186 = vector.broadcast %185 : vector<8x1xf32> to vector<8x8xf32>
    %187 = arith.subf %183, %186 : vector<8x8xf32>
    %188 = math.exp %187 : vector<8x8xf32>
    %cst_48 = arith.constant dense<0.000000e+00> : vector<8xf32>
    %189 = vector.multi_reduction <add>, %188, %cst_48 [1] : vector<8x8xf32> to vector<8xf32>
    %190 = vector.shape_cast %189 : vector<8xf32> to vector<8x1xf32>
    %191 = tpu.reciprocal %190 {approx = true} : vector<8x1xf32> -> vector<8x1xf32>
    %192 = vector.broadcast %191 : vector<8x1xf32> to vector<8x8xf32>
    %193 = arith.mulf %188, %192 : vector<8x8xf32>
    %194 = arith.truncf %193 : vector<8x8xf32> to vector<8x8xbf16>
    %195 = arith.truncf %175 : vector<8x8xf32> to vector<8x8xbf16>
    %cst_49 = arith.constant dense<0.000000e+00> : vector<8x8xf32>
    %196 = tpu.matmul %194, %195, %cst_49 {dimension_numbers = #tpu.dot_dimension_numbers<[1], [0], [0], [1], [0, 0, 1, 1], [], []>} : vector<8x8xbf16>, vector<8x8xbf16>, vector<8x8xf32> -> vector<8x8xf32>
    %197 = vector.extract_strided_slice %31 {offsets = [1, 0, 2, 0], sizes = [1, 8, 1, 8], strides = [1, 1, 1, 1]} : vector<2x8x4x8xf32> to vector<1x8x1x8xf32>
    %198 = vector.shape_cast %197 : vector<1x8x1x8xf32> to vector<8x8xf32>
    %199 = vector.extract_strided_slice %32 {offsets = [1, 0, 2, 0], sizes = [1, 8, 1, 8], strides = [1, 1, 1, 1]} : vector<2x8x4x8xf32> to vector<1x8x1x8xf32>
    %200 = vector.shape_cast %199 : vector<1x8x1x8xf32> to vector<8x8xf32>
    %201 = vector.extract_strided_slice %33 {offsets = [1, 0, 2, 0], sizes = [1, 8, 1, 8], strides = [1, 1, 1, 1]} : vector<2x8x4x8xf32> to vector<1x8x1x8xf32>
    %202 = vector.shape_cast %201 : vector<1x8x1x8xf32> to vector<8x8xf32>
    %203 = arith.truncf %198 : vector<8x8xf32> to vector<8x8xbf16>
    %204 = arith.truncf %200 : vector<8x8xf32> to vector<8x8xbf16>
    %cst_50 = arith.constant dense<0.000000e+00> : vector<8x8xf32>
    %205 = tpu.matmul %203, %204, %cst_50 {dimension_numbers = #tpu.dot_dimension_numbers<[1], [1], [0], [0], [0, 0, 1, 0], [], []>} : vector<8x8xbf16>, vector<8x8xbf16>, vector<8x8xf32> -> vector<8x8xf32>
    %cst_51 = arith.constant 0.353553385 : f32
    %206 = vector.broadcast %cst_51 : f32 to vector<8x8xf32>
    %207 = arith.mulf %205, %206 : vector<8x8xf32>
    %208 = vector.extract_strided_slice %15 {offsets = [1, 0, 0], sizes = [1, 8, 8], strides = [1, 1, 1]} : vector<2x8x8xf32> to vector<1x8x8xf32>
    %209 = vector.shape_cast %208 : vector<1x8x8xf32> to vector<8x8xf32>
    %210 = arith.addf %207, %209 : vector<8x8xf32>
    %cst_52 = arith.constant dense<0xFF800000> : vector<8xf32>
    %211 = vector.multi_reduction <maximumf>, %210, %cst_52 [1] : vector<8x8xf32> to vector<8xf32>
    %212 = vector.shape_cast %211 : vector<8xf32> to vector<8x1xf32>
    %213 = vector.broadcast %212 : vector<8x1xf32> to vector<8x8xf32>
    %214 = arith.subf %210, %213 : vector<8x8xf32>
    %215 = math.exp %214 : vector<8x8xf32>
    %cst_53 = arith.constant dense<0.000000e+00> : vector<8xf32>
    %216 = vector.multi_reduction <add>, %215, %cst_53 [1] : vector<8x8xf32> to vector<8xf32>
    %217 = vector.shape_cast %216 : vector<8xf32> to vector<8x1xf32>
    %218 = tpu.reciprocal %217 {approx = true} : vector<8x1xf32> -> vector<8x1xf32>
    %219 = vector.broadcast %218 : vector<8x1xf32> to vector<8x8xf32>
    %220 = arith.mulf %215, %219 : vector<8x8xf32>
    %221 = arith.truncf %220 : vector<8x8xf32> to vector<8x8xbf16>
    %222 = arith.truncf %202 : vector<8x8xf32> to vector<8x8xbf16>
    %cst_54 = arith.constant dense<0.000000e+00> : vector<8x8xf32>
    %223 = tpu.matmul %221, %222, %cst_54 {dimension_numbers = #tpu.dot_dimension_numbers<[1], [0], [0], [1], [0, 0, 1, 1], [], []>} : vector<8x8xbf16>, vector<8x8xbf16>, vector<8x8xf32> -> vector<8x8xf32>
    %224 = vector.extract_strided_slice %31 {offsets = [1, 0, 3, 0], sizes = [1, 8, 1, 8], strides = [1, 1, 1, 1]} : vector<2x8x4x8xf32> to vector<1x8x1x8xf32>
    %225 = vector.shape_cast %224 : vector<1x8x1x8xf32> to vector<8x8xf32>
    %226 = vector.extract_strided_slice %32 {offsets = [1, 0, 3, 0], sizes = [1, 8, 1, 8], strides = [1, 1, 1, 1]} : vector<2x8x4x8xf32> to vector<1x8x1x8xf32>
    %227 = vector.shape_cast %226 : vector<1x8x1x8xf32> to vector<8x8xf32>
    %228 = vector.extract_strided_slice %33 {offsets = [1, 0, 3, 0], sizes = [1, 8, 1, 8], strides = [1, 1, 1, 1]} : vector<2x8x4x8xf32> to vector<1x8x1x8xf32>
    %229 = vector.shape_cast %228 : vector<1x8x1x8xf32> to vector<8x8xf32>
    %230 = arith.truncf %225 : vector<8x8xf32> to vector<8x8xbf16>
    %231 = arith.truncf %227 : vector<8x8xf32> to vector<8x8xbf16>
    %cst_55 = arith.constant dense<0.000000e+00> : vector<8x8xf32>
    %232 = tpu.matmul %230, %231, %cst_55 {dimension_numbers = #tpu.dot_dimension_numbers<[1], [1], [0], [0], [0, 0, 1, 0], [], []>} : vector<8x8xbf16>, vector<8x8xbf16>, vector<8x8xf32> -> vector<8x8xf32>
    %cst_56 = arith.constant 0.353553385 : f32
    %233 = vector.broadcast %cst_56 : f32 to vector<8x8xf32>
    %234 = arith.mulf %232, %233 : vector<8x8xf32>
    %235 = vector.extract_strided_slice %15 {offsets = [1, 0, 0], sizes = [1, 8, 8], strides = [1, 1, 1]} : vector<2x8x8xf32> to vector<1x8x8xf32>
    %236 = vector.shape_cast %235 : vector<1x8x8xf32> to vector<8x8xf32>
    %237 = arith.addf %234, %236 : vector<8x8xf32>
    %cst_57 = arith.constant dense<0xFF800000> : vector<8xf32>
    %238 = vector.multi_reduction <maximumf>, %237, %cst_57 [1] : vector<8x8xf32> to vector<8xf32>
    %239 = vector.shape_cast %238 : vector<8xf32> to vector<8x1xf32>
    %240 = vector.broadcast %239 : vector<8x1xf32> to vector<8x8xf32>
    %241 = arith.subf %237, %240 : vector<8x8xf32>
    %242 = math.exp %241 : vector<8x8xf32>
    %cst_58 = arith.constant dense<0.000000e+00> : vector<8xf32>
    %243 = vector.multi_reduction <add>, %242, %cst_58 [1] : vector<8x8xf32> to vector<8xf32>
    %244 = vector.shape_cast %243 : vector<8xf32> to vector<8x1xf32>
    %245 = tpu.reciprocal %244 {approx = true} : vector<8x1xf32> -> vector<8x1xf32>
    %246 = vector.broadcast %245 : vector<8x1xf32> to vector<8x8xf32>
    %247 = arith.mulf %242, %246 : vector<8x8xf32>
    %248 = arith.truncf %247 : vector<8x8xf32> to vector<8x8xbf16>
    %249 = arith.truncf %229 : vector<8x8xf32> to vector<8x8xbf16>
    %cst_59 = arith.constant dense<0.000000e+00> : vector<8x8xf32>
    %250 = tpu.matmul %248, %249, %cst_59 {dimension_numbers = #tpu.dot_dimension_numbers<[1], [0], [0], [1], [0, 0, 1, 1], [], []>} : vector<8x8xbf16>, vector<8x8xbf16>, vector<8x8xf32> -> vector<8x8xf32>
    %251 = tpu.concatenate %169, %196, %223, %250 in 1 : vector<8x8xf32>, vector<8x8xf32>, vector<8x8xf32>, vector<8x8xf32> -> vector<8x32xf32>
    %252 = tpu.concatenate %142, %251 in 0 : vector<8x32xf32>, vector<8x32xf32> -> vector<16x32xf32>
    %253 = arith.truncf %252 : vector<16x32xf32> to vector<16x32xbf16>
    %cst_60 = arith.constant dense<0.000000e+00> : vector<16x32xf32>
    %254 = tpu.matmul %253, %28, %cst_60 {dimension_numbers = #tpu.dot_dimension_numbers<[1], [0], [0], [1], [0, 0, 1, 1], [], []>} : vector<16x32xbf16>, vector<32x32xbf16>, vector<16x32xf32> -> vector<16x32xf32>
    %255 = vector.broadcast %30 : vector<1x32xf32> to vector<16x32xf32>
    %256 = arith.addf %254, %255 : vector<16x32xf32>
    %257 = arith.addf %4, %256 : vector<16x32xf32>
    %c0_61 = arith.constant 0 : index
    %c0_62 = arith.constant 0 : index
    %c0_63 = arith.constant 0 : index
    %258 = vector.load %arg9[%c0_61, %c0_62, %c0_63] : memref<1x1x32xf32, #tpu.memory_space<vmem>>, vector<1x1x32xf32>
    %259 = vector.shape_cast %258 : vector<1x1x32xf32> to vector<1x32xf32>
    %c0_64 = arith.constant 0 : index
    %c0_65 = arith.constant 0 : index
    %c0_66 = arith.constant 0 : index
    %260 = vector.load %arg10[%c0_64, %c0_65, %c0_66] : memref<1x1x32xf32, #tpu.memory_space<vmem>>, vector<1x1x32xf32>
    %261 = vector.shape_cast %260 : vector<1x1x32xf32> to vector<1x32xf32>
    %cst_67 = arith.constant dense<0.000000e+00> : vector<16xf32>
    %262 = vector.multi_reduction <add>, %257, %cst_67 [1] : vector<16x32xf32> to vector<16xf32>
    %263 = vector.shape_cast %262 : vector<16xf32> to vector<16x1xf32>
    %cst_68 = arith.constant 3.200000e+01 : f32
    %264 = vector.broadcast %cst_68 : f32 to vector<16x1xf32>
    %265 = arith.divf %263, %264 : vector<16x1xf32>
    %266 = vector.broadcast %265 : vector<16x1xf32> to vector<16x32xf32>
    %267 = arith.subf %257, %266 : vector<16x32xf32>
    %268 = arith.mulf %267, %267 : vector<16x32xf32>
    %cst_69 = arith.constant dense<0.000000e+00> : vector<16xf32>
    %269 = vector.multi_reduction <add>, %268, %cst_69 [1] : vector<16x32xf32> to vector<16xf32>
    %270 = vector.shape_cast %269 : vector<16xf32> to vector<16x1xf32>
    %cst_70 = arith.constant 3.200000e+01 : f32
    %271 = vector.broadcast %cst_70 : f32 to vector<16x1xf32>
    %272 = arith.divf %270, %271 : vector<16x1xf32>
    %273 = vector.broadcast %265 : vector<16x1xf32> to vector<16x32xf32>
    %274 = arith.subf %257, %273 : vector<16x32xf32>
    %cst_71 = arith.constant 9.99999974E-6 : f32
    %275 = vector.broadcast %cst_71 : f32 to vector<16x1xf32>
    %276 = arith.addf %272, %275 : vector<16x1xf32>
    %277 = math.rsqrt %276 : vector<16x1xf32>
    %278 = vector.broadcast %277 : vector<16x1xf32> to vector<16x32xf32>
    %279 = arith.mulf %274, %278 : vector<16x32xf32>
    %280 = vector.broadcast %259 : vector<1x32xf32> to vector<16x32xf32>
    %281 = arith.mulf %279, %280 : vector<16x32xf32>
    %282 = vector.broadcast %261 : vector<1x32xf32> to vector<16x32xf32>
    %283 = arith.addf %281, %282 : vector<16x32xf32>
    %c0_72 = arith.constant 0 : index
    %c0_73 = arith.constant 0 : index
    %c0_74 = arith.constant 0 : index
    %284 = vector.load %arg3[%c0_72, %c0_73, %c0_74] : memref<2x8x32xf32, #tpu.memory_space<vmem>>, vector<2x8x32xf32>
    %285 = vector.shape_cast %284 : vector<2x8x32xf32> to vector<16x32xf32>
    %286 = arith.truncf %283 : vector<16x32xf32> to vector<16x32xbf16>
    %c0_75 = arith.constant 0 : index
    %c0_76 = arith.constant 0 : index
    %c0_77 = arith.constant 0 : index
    %287 = vector.load %arg11[%c0_75, %c0_76, %c0_77] : memref<1x32x32xbf16, #tpu.memory_space<vmem>>, vector<1x32x32xbf16>
    %288 = vector.shape_cast %287 : vector<1x32x32xbf16> to vector<32x32xbf16>
    %cst_78 = arith.constant dense<0.000000e+00> : vector<16x32xf32>
    %289 = tpu.matmul %286, %288, %cst_78 {dimension_numbers = #tpu.dot_dimension_numbers<[1], [0], [0], [1], [0, 0, 1, 1], [], []>} : vector<16x32xbf16>, vector<32x32xbf16>, vector<16x32xf32> -> vector<16x32xf32>
    %c0_79 = arith.constant 0 : index
    %c0_80 = arith.constant 0 : index
    %c0_81 = arith.constant 0 : index
    %290 = vector.load %arg12[%c0_79, %c0_80, %c0_81] : memref<1x1x32xf32, #tpu.memory_space<vmem>>, vector<1x1x32xf32>
    %291 = vector.shape_cast %290 : vector<1x1x32xf32> to vector<1x32xf32>
    %292 = vector.broadcast %291 : vector<1x32xf32> to vector<16x32xf32>
    %293 = arith.addf %289, %292 : vector<16x32xf32>
    %294 = arith.truncf %285 : vector<16x32xf32> to vector<16x32xbf16>
    %c0_82 = arith.constant 0 : index
    %c0_83 = arith.constant 0 : index
    %c0_84 = arith.constant 0 : index
    %295 = vector.load %arg13[%c0_82, %c0_83, %c0_84] : memref<1x32x64xbf16, #tpu.memory_space<vmem>>, vector<1x32x64xbf16>
    %296 = vector.shape_cast %295 : vector<1x32x64xbf16> to vector<32x64xbf16>
    %cst_85 = arith.constant dense<0.000000e+00> : vector<16x64xf32>
    %297 = tpu.matmul %294, %296, %cst_85 {dimension_numbers = #tpu.dot_dimension_numbers<[1], [0], [0], [1], [0, 0, 1, 1], [], []>} : vector<16x32xbf16>, vector<32x64xbf16>, vector<16x64xf32> -> vector<16x64xf32>
    %c0_86 = arith.constant 0 : index
    %c0_87 = arith.constant 0 : index
    %c0_88 = arith.constant 0 : index
    %298 = vector.load %arg14[%c0_86, %c0_87, %c0_88] : memref<1x1x64xf32, #tpu.memory_space<vmem>>, vector<1x1x64xf32>
    %299 = vector.shape_cast %298 : vector<1x1x64xf32> to vector<1x64xf32>
    %300 = vector.broadcast %299 : vector<1x64xf32> to vector<16x64xf32>
    %301 = arith.addf %297, %300 : vector<16x64xf32>
    %302 = vector.extract_strided_slice %301 {offsets = [0, 0], sizes = [16, 32], strides = [1, 1]} : vector<16x64xf32> to vector<16x32xf32>
    %303 = vector.extract_strided_slice %301 {offsets = [0, 32], sizes = [16, 32], strides = [1, 1]} : vector<16x64xf32> to vector<16x32xf32>
    %c0_89 = arith.constant 0 : index
    %c0_90 = arith.constant 0 : index
    %c0_91 = arith.constant 0 : index
    %304 = vector.load %arg15[%c0_89, %c0_90, %c0_91] : memref<1x32x32xbf16, #tpu.memory_space<vmem>>, vector<1x32x32xbf16>
    %305 = vector.shape_cast %304 : vector<1x32x32xbf16> to vector<32x32xbf16>
    %c0_92 = arith.constant 0 : index
    %c0_93 = arith.constant 0 : index
    %c0_94 = arith.constant 0 : index
    %306 = vector.load %arg16[%c0_92, %c0_93, %c0_94] : memref<1x1x32xf32, #tpu.memory_space<vmem>>, vector<1x1x32xf32>
    %307 = vector.shape_cast %306 : vector<1x1x32xf32> to vector<1x32xf32>
    %308 = vector.shape_cast %293 : vector<16x32xf32> to vector<2x8x4x8xf32>
    %309 = vector.shape_cast %302 : vector<16x32xf32> to vector<2x8x4x8xf32>
    %310 = vector.shape_cast %303 : vector<16x32xf32> to vector<2x8x4x8xf32>
    %311 = vector.extract_strided_slice %308 {offsets = [0, 0, 0, 0], sizes = [1, 8, 1, 8], strides = [1, 1, 1, 1]} : vector<2x8x4x8xf32> to vector<1x8x1x8xf32>
    %312 = vector.shape_cast %311 : vector<1x8x1x8xf32> to vector<8x8xf32>
    %313 = vector.extract_strided_slice %309 {offsets = [0, 0, 0, 0], sizes = [1, 8, 1, 8], strides = [1, 1, 1, 1]} : vector<2x8x4x8xf32> to vector<1x8x1x8xf32>
    %314 = vector.shape_cast %313 : vector<1x8x1x8xf32> to vector<8x8xf32>
    %315 = vector.extract_strided_slice %310 {offsets = [0, 0, 0, 0], sizes = [1, 8, 1, 8], strides = [1, 1, 1, 1]} : vector<2x8x4x8xf32> to vector<1x8x1x8xf32>
    %316 = vector.shape_cast %315 : vector<1x8x1x8xf32> to vector<8x8xf32>
    %317 = arith.truncf %312 : vector<8x8xf32> to vector<8x8xbf16>
    %318 = arith.truncf %314 : vector<8x8xf32> to vector<8x8xbf16>
    %cst_95 = arith.constant dense<0.000000e+00> : vector<8x8xf32>
    %319 = tpu.matmul %317, %318, %cst_95 {dimension_numbers = #tpu.dot_dimension_numbers<[1], [1], [0], [0], [0, 0, 1, 0], [], []>} : vector<8x8xbf16>, vector<8x8xbf16>, vector<8x8xf32> -> vector<8x8xf32>
    %cst_96 = arith.constant 0.353553385 : f32
    %320 = vector.broadcast %cst_96 : f32 to vector<8x8xf32>
    %321 = arith.mulf %319, %320 : vector<8x8xf32>
    %cst_97 = arith.constant dense<0xFF800000> : vector<8xf32>
    %322 = vector.multi_reduction <maximumf>, %321, %cst_97 [1] : vector<8x8xf32> to vector<8xf32>
    %323 = vector.shape_cast %322 : vector<8xf32> to vector<8x1xf32>
    %324 = vector.broadcast %323 : vector<8x1xf32> to vector<8x8xf32>
    %325 = arith.subf %321, %324 : vector<8x8xf32>
    %326 = math.exp %325 : vector<8x8xf32>
    %cst_98 = arith.constant dense<0.000000e+00> : vector<8xf32>
    %327 = vector.multi_reduction <add>, %326, %cst_98 [1] : vector<8x8xf32> to vector<8xf32>
    %328 = vector.shape_cast %327 : vector<8xf32> to vector<8x1xf32>
    %329 = tpu.reciprocal %328 {approx = true} : vector<8x1xf32> -> vector<8x1xf32>
    %330 = vector.broadcast %329 : vector<8x1xf32> to vector<8x8xf32>
    %331 = arith.mulf %326, %330 : vector<8x8xf32>
    %332 = arith.truncf %331 : vector<8x8xf32> to vector<8x8xbf16>
    %333 = arith.truncf %316 : vector<8x8xf32> to vector<8x8xbf16>
    %cst_99 = arith.constant dense<0.000000e+00> : vector<8x8xf32>
    %334 = tpu.matmul %332, %333, %cst_99 {dimension_numbers = #tpu.dot_dimension_numbers<[1], [0], [0], [1], [0, 0, 1, 1], [], []>} : vector<8x8xbf16>, vector<8x8xbf16>, vector<8x8xf32> -> vector<8x8xf32>
    %335 = vector.extract_strided_slice %308 {offsets = [0, 0, 1, 0], sizes = [1, 8, 1, 8], strides = [1, 1, 1, 1]} : vector<2x8x4x8xf32> to vector<1x8x1x8xf32>
    %336 = vector.shape_cast %335 : vector<1x8x1x8xf32> to vector<8x8xf32>
    %337 = vector.extract_strided_slice %309 {offsets = [0, 0, 1, 0], sizes = [1, 8, 1, 8], strides = [1, 1, 1, 1]} : vector<2x8x4x8xf32> to vector<1x8x1x8xf32>
    %338 = vector.shape_cast %337 : vector<1x8x1x8xf32> to vector<8x8xf32>
    %339 = vector.extract_strided_slice %310 {offsets = [0, 0, 1, 0], sizes = [1, 8, 1, 8], strides = [1, 1, 1, 1]} : vector<2x8x4x8xf32> to vector<1x8x1x8xf32>
    %340 = vector.shape_cast %339 : vector<1x8x1x8xf32> to vector<8x8xf32>
    %341 = arith.truncf %336 : vector<8x8xf32> to vector<8x8xbf16>
    %342 = arith.truncf %338 : vector<8x8xf32> to vector<8x8xbf16>
    %cst_100 = arith.constant dense<0.000000e+00> : vector<8x8xf32>
    %343 = tpu.matmul %341, %342, %cst_100 {dimension_numbers = #tpu.dot_dimension_numbers<[1], [1], [0], [0], [0, 0, 1, 0], [], []>} : vector<8x8xbf16>, vector<8x8xbf16>, vector<8x8xf32> -> vector<8x8xf32>
    %cst_101 = arith.constant 0.353553385 : f32
    %344 = vector.broadcast %cst_101 : f32 to vector<8x8xf32>
    %345 = arith.mulf %343, %344 : vector<8x8xf32>
    %cst_102 = arith.constant dense<0xFF800000> : vector<8xf32>
    %346 = vector.multi_reduction <maximumf>, %345, %cst_102 [1] : vector<8x8xf32> to vector<8xf32>
    %347 = vector.shape_cast %346 : vector<8xf32> to vector<8x1xf32>
    %348 = vector.broadcast %347 : vector<8x1xf32> to vector<8x8xf32>
    %349 = arith.subf %345, %348 : vector<8x8xf32>
    %350 = math.exp %349 : vector<8x8xf32>
    %cst_103 = arith.constant dense<0.000000e+00> : vector<8xf32>
    %351 = vector.multi_reduction <add>, %350, %cst_103 [1] : vector<8x8xf32> to vector<8xf32>
    %352 = vector.shape_cast %351 : vector<8xf32> to vector<8x1xf32>
    %353 = tpu.reciprocal %352 {approx = true} : vector<8x1xf32> -> vector<8x1xf32>
    %354 = vector.broadcast %353 : vector<8x1xf32> to vector<8x8xf32>
    %355 = arith.mulf %350, %354 : vector<8x8xf32>
    %356 = arith.truncf %355 : vector<8x8xf32> to vector<8x8xbf16>
    %357 = arith.truncf %340 : vector<8x8xf32> to vector<8x8xbf16>
    %cst_104 = arith.constant dense<0.000000e+00> : vector<8x8xf32>
    %358 = tpu.matmul %356, %357, %cst_104 {dimension_numbers = #tpu.dot_dimension_numbers<[1], [0], [0], [1], [0, 0, 1, 1], [], []>} : vector<8x8xbf16>, vector<8x8xbf16>, vector<8x8xf32> -> vector<8x8xf32>
    %359 = vector.extract_strided_slice %308 {offsets = [0, 0, 2, 0], sizes = [1, 8, 1, 8], strides = [1, 1, 1, 1]} : vector<2x8x4x8xf32> to vector<1x8x1x8xf32>
    %360 = vector.shape_cast %359 : vector<1x8x1x8xf32> to vector<8x8xf32>
    %361 = vector.extract_strided_slice %309 {offsets = [0, 0, 2, 0], sizes = [1, 8, 1, 8], strides = [1, 1, 1, 1]} : vector<2x8x4x8xf32> to vector<1x8x1x8xf32>
    %362 = vector.shape_cast %361 : vector<1x8x1x8xf32> to vector<8x8xf32>
    %363 = vector.extract_strided_slice %310 {offsets = [0, 0, 2, 0], sizes = [1, 8, 1, 8], strides = [1, 1, 1, 1]} : vector<2x8x4x8xf32> to vector<1x8x1x8xf32>
    %364 = vector.shape_cast %363 : vector<1x8x1x8xf32> to vector<8x8xf32>
    %365 = arith.truncf %360 : vector<8x8xf32> to vector<8x8xbf16>
    %366 = arith.truncf %362 : vector<8x8xf32> to vector<8x8xbf16>
    %cst_105 = arith.constant dense<0.000000e+00> : vector<8x8xf32>
    %367 = tpu.matmul %365, %366, %cst_105 {dimension_numbers = #tpu.dot_dimension_numbers<[1], [1], [0], [0], [0, 0, 1, 0], [], []>} : vector<8x8xbf16>, vector<8x8xbf16>, vector<8x8xf32> -> vector<8x8xf32>
    %cst_106 = arith.constant 0.353553385 : f32
    %368 = vector.broadcast %cst_106 : f32 to vector<8x8xf32>
    %369 = arith.mulf %367, %368 : vector<8x8xf32>
    %cst_107 = arith.constant dense<0xFF800000> : vector<8xf32>
    %370 = vector.multi_reduction <maximumf>, %369, %cst_107 [1] : vector<8x8xf32> to vector<8xf32>
    %371 = vector.shape_cast %370 : vector<8xf32> to vector<8x1xf32>
    %372 = vector.broadcast %371 : vector<8x1xf32> to vector<8x8xf32>
    %373 = arith.subf %369, %372 : vector<8x8xf32>
    %374 = math.exp %373 : vector<8x8xf32>
    %cst_108 = arith.constant dense<0.000000e+00> : vector<8xf32>
    %375 = vector.multi_reduction <add>, %374, %cst_108 [1] : vector<8x8xf32> to vector<8xf32>
    %376 = vector.shape_cast %375 : vector<8xf32> to vector<8x1xf32>
    %377 = tpu.reciprocal %376 {approx = true} : vector<8x1xf32> -> vector<8x1xf32>
    %378 = vector.broadcast %377 : vector<8x1xf32> to vector<8x8xf32>
    %379 = arith.mulf %374, %378 : vector<8x8xf32>
    %380 = arith.truncf %379 : vector<8x8xf32> to vector<8x8xbf16>
    %381 = arith.truncf %364 : vector<8x8xf32> to vector<8x8xbf16>
    %cst_109 = arith.constant dense<0.000000e+00> : vector<8x8xf32>
    %382 = tpu.matmul %380, %381, %cst_109 {dimension_numbers = #tpu.dot_dimension_numbers<[1], [0], [0], [1], [0, 0, 1, 1], [], []>} : vector<8x8xbf16>, vector<8x8xbf16>, vector<8x8xf32> -> vector<8x8xf32>
    %383 = vector.extract_strided_slice %308 {offsets = [0, 0, 3, 0], sizes = [1, 8, 1, 8], strides = [1, 1, 1, 1]} : vector<2x8x4x8xf32> to vector<1x8x1x8xf32>
    %384 = vector.shape_cast %383 : vector<1x8x1x8xf32> to vector<8x8xf32>
    %385 = vector.extract_strided_slice %309 {offsets = [0, 0, 3, 0], sizes = [1, 8, 1, 8], strides = [1, 1, 1, 1]} : vector<2x8x4x8xf32> to vector<1x8x1x8xf32>
    %386 = vector.shape_cast %385 : vector<1x8x1x8xf32> to vector<8x8xf32>
    %387 = vector.extract_strided_slice %310 {offsets = [0, 0, 3, 0], sizes = [1, 8, 1, 8], strides = [1, 1, 1, 1]} : vector<2x8x4x8xf32> to vector<1x8x1x8xf32>
    %388 = vector.shape_cast %387 : vector<1x8x1x8xf32> to vector<8x8xf32>
    %389 = arith.truncf %384 : vector<8x8xf32> to vector<8x8xbf16>
    %390 = arith.truncf %386 : vector<8x8xf32> to vector<8x8xbf16>
    %cst_110 = arith.constant dense<0.000000e+00> : vector<8x8xf32>
    %391 = tpu.matmul %389, %390, %cst_110 {dimension_numbers = #tpu.dot_dimension_numbers<[1], [1], [0], [0], [0, 0, 1, 0], [], []>} : vector<8x8xbf16>, vector<8x8xbf16>, vector<8x8xf32> -> vector<8x8xf32>
    %cst_111 = arith.constant 0.353553385 : f32
    %392 = vector.broadcast %cst_111 : f32 to vector<8x8xf32>
    %393 = arith.mulf %391, %392 : vector<8x8xf32>
    %cst_112 = arith.constant dense<0xFF800000> : vector<8xf32>
    %394 = vector.multi_reduction <maximumf>, %393, %cst_112 [1] : vector<8x8xf32> to vector<8xf32>
    %395 = vector.shape_cast %394 : vector<8xf32> to vector<8x1xf32>
    %396 = vector.broadcast %395 : vector<8x1xf32> to vector<8x8xf32>
    %397 = arith.subf %393, %396 : vector<8x8xf32>
    %398 = math.exp %397 : vector<8x8xf32>
    %cst_113 = arith.constant dense<0.000000e+00> : vector<8xf32>
    %399 = vector.multi_reduction <add>, %398, %cst_113 [1] : vector<8x8xf32> to vector<8xf32>
    %400 = vector.shape_cast %399 : vector<8xf32> to vector<8x1xf32>
    %401 = tpu.reciprocal %400 {approx = true} : vector<8x1xf32> -> vector<8x1xf32>
    %402 = vector.broadcast %401 : vector<8x1xf32> to vector<8x8xf32>
    %403 = arith.mulf %398, %402 : vector<8x8xf32>
    %404 = arith.truncf %403 : vector<8x8xf32> to vector<8x8xbf16>
    %405 = arith.truncf %388 : vector<8x8xf32> to vector<8x8xbf16>
    %cst_114 = arith.constant dense<0.000000e+00> : vector<8x8xf32>
    %406 = tpu.matmul %404, %405, %cst_114 {dimension_numbers = #tpu.dot_dimension_numbers<[1], [0], [0], [1], [0, 0, 1, 1], [], []>} : vector<8x8xbf16>, vector<8x8xbf16>, vector<8x8xf32> -> vector<8x8xf32>
    %407 = tpu.concatenate %334, %358, %382, %406 in 1 : vector<8x8xf32>, vector<8x8xf32>, vector<8x8xf32>, vector<8x8xf32> -> vector<8x32xf32>
    %408 = vector.shape_cast %331 : vector<8x8xf32> to vector<1x8x8xf32>
    %409 = vector.shape_cast %355 : vector<8x8xf32> to vector<1x8x8xf32>
    %410 = vector.shape_cast %379 : vector<8x8xf32> to vector<1x8x8xf32>
    %411 = vector.shape_cast %403 : vector<8x8xf32> to vector<1x8x8xf32>
    %412 = tpu.concatenate %408, %409, %410, %411 in 0 : vector<1x8x8xf32>, vector<1x8x8xf32>, vector<1x8x8xf32>, vector<1x8x8xf32> -> vector<4x8x8xf32>
    %413 = vector.extract_strided_slice %308 {offsets = [1, 0, 0, 0], sizes = [1, 8, 1, 8], strides = [1, 1, 1, 1]} : vector<2x8x4x8xf32> to vector<1x8x1x8xf32>
    %414 = vector.shape_cast %413 : vector<1x8x1x8xf32> to vector<8x8xf32>
    %415 = vector.extract_strided_slice %309 {offsets = [1, 0, 0, 0], sizes = [1, 8, 1, 8], strides = [1, 1, 1, 1]} : vector<2x8x4x8xf32> to vector<1x8x1x8xf32>
    %416 = vector.shape_cast %415 : vector<1x8x1x8xf32> to vector<8x8xf32>
    %417 = vector.extract_strided_slice %310 {offsets = [1, 0, 0, 0], sizes = [1, 8, 1, 8], strides = [1, 1, 1, 1]} : vector<2x8x4x8xf32> to vector<1x8x1x8xf32>
    %418 = vector.shape_cast %417 : vector<1x8x1x8xf32> to vector<8x8xf32>
    %419 = arith.truncf %414 : vector<8x8xf32> to vector<8x8xbf16>
    %420 = arith.truncf %416 : vector<8x8xf32> to vector<8x8xbf16>
    %cst_115 = arith.constant dense<0.000000e+00> : vector<8x8xf32>
    %421 = tpu.matmul %419, %420, %cst_115 {dimension_numbers = #tpu.dot_dimension_numbers<[1], [1], [0], [0], [0, 0, 1, 0], [], []>} : vector<8x8xbf16>, vector<8x8xbf16>, vector<8x8xf32> -> vector<8x8xf32>
    %cst_116 = arith.constant 0.353553385 : f32
    %422 = vector.broadcast %cst_116 : f32 to vector<8x8xf32>
    %423 = arith.mulf %421, %422 : vector<8x8xf32>
    %cst_117 = arith.constant dense<0xFF800000> : vector<8xf32>
    %424 = vector.multi_reduction <maximumf>, %423, %cst_117 [1] : vector<8x8xf32> to vector<8xf32>
    %425 = vector.shape_cast %424 : vector<8xf32> to vector<8x1xf32>
    %426 = vector.broadcast %425 : vector<8x1xf32> to vector<8x8xf32>
    %427 = arith.subf %423, %426 : vector<8x8xf32>
    %428 = math.exp %427 : vector<8x8xf32>
    %cst_118 = arith.constant dense<0.000000e+00> : vector<8xf32>
    %429 = vector.multi_reduction <add>, %428, %cst_118 [1] : vector<8x8xf32> to vector<8xf32>
    %430 = vector.shape_cast %429 : vector<8xf32> to vector<8x1xf32>
    %431 = tpu.reciprocal %430 {approx = true} : vector<8x1xf32> -> vector<8x1xf32>
    %432 = vector.broadcast %431 : vector<8x1xf32> to vector<8x8xf32>
    %433 = arith.mulf %428, %432 : vector<8x8xf32>
    %434 = arith.truncf %433 : vector<8x8xf32> to vector<8x8xbf16>
    %435 = arith.truncf %418 : vector<8x8xf32> to vector<8x8xbf16>
    %cst_119 = arith.constant dense<0.000000e+00> : vector<8x8xf32>
    %436 = tpu.matmul %434, %435, %cst_119 {dimension_numbers = #tpu.dot_dimension_numbers<[1], [0], [0], [1], [0, 0, 1, 1], [], []>} : vector<8x8xbf16>, vector<8x8xbf16>, vector<8x8xf32> -> vector<8x8xf32>
    %437 = vector.extract_strided_slice %308 {offsets = [1, 0, 1, 0], sizes = [1, 8, 1, 8], strides = [1, 1, 1, 1]} : vector<2x8x4x8xf32> to vector<1x8x1x8xf32>
    %438 = vector.shape_cast %437 : vector<1x8x1x8xf32> to vector<8x8xf32>
    %439 = vector.extract_strided_slice %309 {offsets = [1, 0, 1, 0], sizes = [1, 8, 1, 8], strides = [1, 1, 1, 1]} : vector<2x8x4x8xf32> to vector<1x8x1x8xf32>
    %440 = vector.shape_cast %439 : vector<1x8x1x8xf32> to vector<8x8xf32>
    %441 = vector.extract_strided_slice %310 {offsets = [1, 0, 1, 0], sizes = [1, 8, 1, 8], strides = [1, 1, 1, 1]} : vector<2x8x4x8xf32> to vector<1x8x1x8xf32>
    %442 = vector.shape_cast %441 : vector<1x8x1x8xf32> to vector<8x8xf32>
    %443 = arith.truncf %438 : vector<8x8xf32> to vector<8x8xbf16>
    %444 = arith.truncf %440 : vector<8x8xf32> to vector<8x8xbf16>
    %cst_120 = arith.constant dense<0.000000e+00> : vector<8x8xf32>
    %445 = tpu.matmul %443, %444, %cst_120 {dimension_numbers = #tpu.dot_dimension_numbers<[1], [1], [0], [0], [0, 0, 1, 0], [], []>} : vector<8x8xbf16>, vector<8x8xbf16>, vector<8x8xf32> -> vector<8x8xf32>
    %cst_121 = arith.constant 0.353553385 : f32
    %446 = vector.broadcast %cst_121 : f32 to vector<8x8xf32>
    %447 = arith.mulf %445, %446 : vector<8x8xf32>
    %cst_122 = arith.constant dense<0xFF800000> : vector<8xf32>
    %448 = vector.multi_reduction <maximumf>, %447, %cst_122 [1] : vector<8x8xf32> to vector<8xf32>
    %449 = vector.shape_cast %448 : vector<8xf32> to vector<8x1xf32>
    %450 = vector.broadcast %449 : vector<8x1xf32> to vector<8x8xf32>
    %451 = arith.subf %447, %450 : vector<8x8xf32>
    %452 = math.exp %451 : vector<8x8xf32>
    %cst_123 = arith.constant dense<0.000000e+00> : vector<8xf32>
    %453 = vector.multi_reduction <add>, %452, %cst_123 [1] : vector<8x8xf32> to vector<8xf32>
    %454 = vector.shape_cast %453 : vector<8xf32> to vector<8x1xf32>
    %455 = tpu.reciprocal %454 {approx = true} : vector<8x1xf32> -> vector<8x1xf32>
    %456 = vector.broadcast %455 : vector<8x1xf32> to vector<8x8xf32>
    %457 = arith.mulf %452, %456 : vector<8x8xf32>
    %458 = arith.truncf %457 : vector<8x8xf32> to vector<8x8xbf16>
    %459 = arith.truncf %442 : vector<8x8xf32> to vector<8x8xbf16>
    %cst_124 = arith.constant dense<0.000000e+00> : vector<8x8xf32>
    %460 = tpu.matmul %458, %459, %cst_124 {dimension_numbers = #tpu.dot_dimension_numbers<[1], [0], [0], [1], [0, 0, 1, 1], [], []>} : vector<8x8xbf16>, vector<8x8xbf16>, vector<8x8xf32> -> vector<8x8xf32>
    %461 = vector.extract_strided_slice %308 {offsets = [1, 0, 2, 0], sizes = [1, 8, 1, 8], strides = [1, 1, 1, 1]} : vector<2x8x4x8xf32> to vector<1x8x1x8xf32>
    %462 = vector.shape_cast %461 : vector<1x8x1x8xf32> to vector<8x8xf32>
    %463 = vector.extract_strided_slice %309 {offsets = [1, 0, 2, 0], sizes = [1, 8, 1, 8], strides = [1, 1, 1, 1]} : vector<2x8x4x8xf32> to vector<1x8x1x8xf32>
    %464 = vector.shape_cast %463 : vector<1x8x1x8xf32> to vector<8x8xf32>
    %465 = vector.extract_strided_slice %310 {offsets = [1, 0, 2, 0], sizes = [1, 8, 1, 8], strides = [1, 1, 1, 1]} : vector<2x8x4x8xf32> to vector<1x8x1x8xf32>
    %466 = vector.shape_cast %465 : vector<1x8x1x8xf32> to vector<8x8xf32>
    %467 = arith.truncf %462 : vector<8x8xf32> to vector<8x8xbf16>
    %468 = arith.truncf %464 : vector<8x8xf32> to vector<8x8xbf16>
    %cst_125 = arith.constant dense<0.000000e+00> : vector<8x8xf32>
    %469 = tpu.matmul %467, %468, %cst_125 {dimension_numbers = #tpu.dot_dimension_numbers<[1], [1], [0], [0], [0, 0, 1, 0], [], []>} : vector<8x8xbf16>, vector<8x8xbf16>, vector<8x8xf32> -> vector<8x8xf32>
    %cst_126 = arith.constant 0.353553385 : f32
    %470 = vector.broadcast %cst_126 : f32 to vector<8x8xf32>
    %471 = arith.mulf %469, %470 : vector<8x8xf32>
    %cst_127 = arith.constant dense<0xFF800000> : vector<8xf32>
    %472 = vector.multi_reduction <maximumf>, %471, %cst_127 [1] : vector<8x8xf32> to vector<8xf32>
    %473 = vector.shape_cast %472 : vector<8xf32> to vector<8x1xf32>
    %474 = vector.broadcast %473 : vector<8x1xf32> to vector<8x8xf32>
    %475 = arith.subf %471, %474 : vector<8x8xf32>
    %476 = math.exp %475 : vector<8x8xf32>
    %cst_128 = arith.constant dense<0.000000e+00> : vector<8xf32>
    %477 = vector.multi_reduction <add>, %476, %cst_128 [1] : vector<8x8xf32> to vector<8xf32>
    %478 = vector.shape_cast %477 : vector<8xf32> to vector<8x1xf32>
    %479 = tpu.reciprocal %478 {approx = true} : vector<8x1xf32> -> vector<8x1xf32>
    %480 = vector.broadcast %479 : vector<8x1xf32> to vector<8x8xf32>
    %481 = arith.mulf %476, %480 : vector<8x8xf32>
    %482 = arith.truncf %481 : vector<8x8xf32> to vector<8x8xbf16>
    %483 = arith.truncf %466 : vector<8x8xf32> to vector<8x8xbf16>
    %cst_129 = arith.constant dense<0.000000e+00> : vector<8x8xf32>
    %484 = tpu.matmul %482, %483, %cst_129 {dimension_numbers = #tpu.dot_dimension_numbers<[1], [0], [0], [1], [0, 0, 1, 1], [], []>} : vector<8x8xbf16>, vector<8x8xbf16>, vector<8x8xf32> -> vector<8x8xf32>
    %485 = vector.extract_strided_slice %308 {offsets = [1, 0, 3, 0], sizes = [1, 8, 1, 8], strides = [1, 1, 1, 1]} : vector<2x8x4x8xf32> to vector<1x8x1x8xf32>
    %486 = vector.shape_cast %485 : vector<1x8x1x8xf32> to vector<8x8xf32>
    %487 = vector.extract_strided_slice %309 {offsets = [1, 0, 3, 0], sizes = [1, 8, 1, 8], strides = [1, 1, 1, 1]} : vector<2x8x4x8xf32> to vector<1x8x1x8xf32>
    %488 = vector.shape_cast %487 : vector<1x8x1x8xf32> to vector<8x8xf32>
    %489 = vector.extract_strided_slice %310 {offsets = [1, 0, 3, 0], sizes = [1, 8, 1, 8], strides = [1, 1, 1, 1]} : vector<2x8x4x8xf32> to vector<1x8x1x8xf32>
    %490 = vector.shape_cast %489 : vector<1x8x1x8xf32> to vector<8x8xf32>
    %491 = arith.truncf %486 : vector<8x8xf32> to vector<8x8xbf16>
    %492 = arith.truncf %488 : vector<8x8xf32> to vector<8x8xbf16>
    %cst_130 = arith.constant dense<0.000000e+00> : vector<8x8xf32>
    %493 = tpu.matmul %491, %492, %cst_130 {dimension_numbers = #tpu.dot_dimension_numbers<[1], [1], [0], [0], [0, 0, 1, 0], [], []>} : vector<8x8xbf16>, vector<8x8xbf16>, vector<8x8xf32> -> vector<8x8xf32>
    %cst_131 = arith.constant 0.353553385 : f32
    %494 = vector.broadcast %cst_131 : f32 to vector<8x8xf32>
    %495 = arith.mulf %493, %494 : vector<8x8xf32>
    %cst_132 = arith.constant dense<0xFF800000> : vector<8xf32>
    %496 = vector.multi_reduction <maximumf>, %495, %cst_132 [1] : vector<8x8xf32> to vector<8xf32>
    %497 = vector.shape_cast %496 : vector<8xf32> to vector<8x1xf32>
    %498 = vector.broadcast %497 : vector<8x1xf32> to vector<8x8xf32>
    %499 = arith.subf %495, %498 : vector<8x8xf32>
    %500 = math.exp %499 : vector<8x8xf32>
    %cst_133 = arith.constant dense<0.000000e+00> : vector<8xf32>
    %501 = vector.multi_reduction <add>, %500, %cst_133 [1] : vector<8x8xf32> to vector<8xf32>
    %502 = vector.shape_cast %501 : vector<8xf32> to vector<8x1xf32>
    %503 = tpu.reciprocal %502 {approx = true} : vector<8x1xf32> -> vector<8x1xf32>
    %504 = vector.broadcast %503 : vector<8x1xf32> to vector<8x8xf32>
    %505 = arith.mulf %500, %504 : vector<8x8xf32>
    %506 = arith.truncf %505 : vector<8x8xf32> to vector<8x8xbf16>
    %507 = arith.truncf %490 : vector<8x8xf32> to vector<8x8xbf16>
    %cst_134 = arith.constant dense<0.000000e+00> : vector<8x8xf32>
    %508 = tpu.matmul %506, %507, %cst_134 {dimension_numbers = #tpu.dot_dimension_numbers<[1], [0], [0], [1], [0, 0, 1, 1], [], []>} : vector<8x8xbf16>, vector<8x8xbf16>, vector<8x8xf32> -> vector<8x8xf32>
    %509 = tpu.concatenate %436, %460, %484, %508 in 1 : vector<8x8xf32>, vector<8x8xf32>, vector<8x8xf32>, vector<8x8xf32> -> vector<8x32xf32>
    %510 = vector.shape_cast %433 : vector<8x8xf32> to vector<1x8x8xf32>
    %511 = vector.shape_cast %457 : vector<8x8xf32> to vector<1x8x8xf32>
    %512 = vector.shape_cast %481 : vector<8x8xf32> to vector<1x8x8xf32>
    %513 = vector.shape_cast %505 : vector<8x8xf32> to vector<1x8x8xf32>
    %514 = tpu.concatenate %510, %511, %512, %513 in 0 : vector<1x8x8xf32>, vector<1x8x8xf32>, vector<1x8x8xf32>, vector<1x8x8xf32> -> vector<4x8x8xf32>
    %515 = tpu.concatenate %407, %509 in 0 : vector<8x32xf32>, vector<8x32xf32> -> vector<16x32xf32>
    %516 = arith.truncf %515 : vector<16x32xf32> to vector<16x32xbf16>
    %cst_135 = arith.constant dense<0.000000e+00> : vector<16x32xf32>
    %517 = tpu.matmul %516, %305, %cst_135 {dimension_numbers = #tpu.dot_dimension_numbers<[1], [0], [0], [1], [0, 0, 1, 1], [], []>} : vector<16x32xbf16>, vector<32x32xbf16>, vector<16x32xf32> -> vector<16x32xf32>
    %518 = vector.broadcast %307 : vector<1x32xf32> to vector<16x32xf32>
    %519 = arith.addf %517, %518 : vector<16x32xf32>
    %520 = vector.shape_cast %412 : vector<4x8x8xf32> to vector<1x4x8x8xf32>
    %521 = vector.shape_cast %514 : vector<4x8x8xf32> to vector<1x4x8x8xf32>
    %522 = tpu.concatenate %520, %521 in 0 : vector<1x4x8x8xf32>, vector<1x4x8x8xf32> -> vector<2x4x8x8xf32>
    %c0_136 = arith.constant 0 : index
    %c0_137 = arith.constant 0 : index
    %c0_138 = arith.constant 0 : index
    %c0_139 = arith.constant 0 : index
    %c0_140 = arith.constant 0 : index
    %523 = vector.load %arg26[%c0_136, %c0_137, %c0_138, %c0_139, %c0_140] : memref<1x2x4x8x8xf32, #tpu.memory_space<vmem>>, vector<1x2x4x8x8xf32>
    %524 = vector.shape_cast %523 : vector<1x2x4x8x8xf32> to vector<2x4x8x8xf32>
    %525 = vector.shape_cast %522 : vector<2x4x8x8xf32> to vector<1x2x4x8x8xf32>
    tpu.vector_store %arg26[%c0_136, %c0_137, %c0_138, %c0_139, %c0_140], %525 {strides = array<i32>} : memref<1x2x4x8x8xf32, #tpu.memory_space<vmem>>, vector<1x2x4x8x8xf32>,
    %526 = arith.addf %283, %519 : vector<16x32xf32>
    %c0_141 = arith.constant 0 : index
    %c0_142 = arith.constant 0 : index
    %c0_143 = arith.constant 0 : index
    %527 = vector.load %arg17[%c0_141, %c0_142, %c0_143] : memref<1x1x32xf32, #tpu.memory_space<vmem>>, vector<1x1x32xf32>
    %528 = vector.shape_cast %527 : vector<1x1x32xf32> to vector<1x32xf32>
    %c0_144 = arith.constant 0 : index
    %c0_145 = arith.constant 0 : index
    %c0_146 = arith.constant 0 : index
    %529 = vector.load %arg18[%c0_144, %c0_145, %c0_146] : memref<1x1x32xf32, #tpu.memory_space<vmem>>, vector<1x1x32xf32>
    %530 = vector.shape_cast %529 : vector<1x1x32xf32> to vector<1x32xf32>
    %cst_147 = arith.constant dense<0.000000e+00> : vector<16xf32>
    %531 = vector.multi_reduction <add>, %526, %cst_147 [1] : vector<16x32xf32> to vector<16xf32>
    %532 = vector.shape_cast %531 : vector<16xf32> to vector<16x1xf32>
    %cst_148 = arith.constant 3.200000e+01 : f32
    %533 = vector.broadcast %cst_148 : f32 to vector<16x1xf32>
    %534 = arith.divf %532, %533 : vector<16x1xf32>
    %535 = vector.broadcast %534 : vector<16x1xf32> to vector<16x32xf32>
    %536 = arith.subf %526, %535 : vector<16x32xf32>
    %537 = arith.mulf %536, %536 : vector<16x32xf32>
    %cst_149 = arith.constant dense<0.000000e+00> : vector<16xf32>
    %538 = vector.multi_reduction <add>, %537, %cst_149 [1] : vector<16x32xf32> to vector<16xf32>
    %539 = vector.shape_cast %538 : vector<16xf32> to vector<16x1xf32>
    %cst_150 = arith.constant 3.200000e+01 : f32
    %540 = vector.broadcast %cst_150 : f32 to vector<16x1xf32>
    %541 = arith.divf %539, %540 : vector<16x1xf32>
    %542 = vector.broadcast %534 : vector<16x1xf32> to vector<16x32xf32>
    %543 = arith.subf %526, %542 : vector<16x32xf32>
    %cst_151 = arith.constant 9.99999974E-6 : f32
    %544 = vector.broadcast %cst_151 : f32 to vector<16x1xf32>
    %545 = arith.addf %541, %544 : vector<16x1xf32>
    %546 = math.rsqrt %545 : vector<16x1xf32>
    %547 = vector.broadcast %546 : vector<16x1xf32> to vector<16x32xf32>
    %548 = arith.mulf %543, %547 : vector<16x32xf32>
    %549 = vector.broadcast %528 : vector<1x32xf32> to vector<16x32xf32>
    %550 = arith.mulf %548, %549 : vector<16x32xf32>
    %551 = vector.broadcast %530 : vector<1x32xf32> to vector<16x32xf32>
    %552 = arith.addf %550, %551 : vector<16x32xf32>
    %553 = arith.truncf %552 : vector<16x32xf32> to vector<16x32xbf16>
    %c0_152 = arith.constant 0 : index
    %c0_153 = arith.constant 0 : index
    %c0_154 = arith.constant 0 : index
    %554 = vector.load %arg19[%c0_152, %c0_153, %c0_154] : memref<1x32x64xbf16, #tpu.memory_space<vmem>>, vector<1x32x64xbf16>
    %555 = vector.shape_cast %554 : vector<1x32x64xbf16> to vector<32x64xbf16>
    %cst_155 = arith.constant dense<0.000000e+00> : vector<16x64xf32>
    %556 = tpu.matmul %553, %555, %cst_155 {dimension_numbers = #tpu.dot_dimension_numbers<[1], [0], [0], [1], [0, 0, 1, 1], [], []>} : vector<16x32xbf16>, vector<32x64xbf16>, vector<16x64xf32> -> vector<16x64xf32>
    %c0_156 = arith.constant 0 : index
    %c0_157 = arith.constant 0 : index
    %c0_158 = arith.constant 0 : index
    %557 = vector.load %arg20[%c0_156, %c0_157, %c0_158] : memref<1x1x64xf32, #tpu.memory_space<vmem>>, vector<1x1x64xf32>
    %558 = vector.shape_cast %557 : vector<1x1x64xf32> to vector<1x64xf32>
    %559 = vector.broadcast %558 : vector<1x64xf32> to vector<16x64xf32>
    %560 = arith.addf %556, %559 : vector<16x64xf32>
    %cst_159 = arith.constant 0.000000e+00 : f32
    %561 = vector.broadcast %cst_159 : f32 to vector<16x64xf32>
    %562 = arith.maximumf %560, %561 : vector<16x64xf32>
    %563 = arith.truncf %562 : vector<16x64xf32> to vector<16x64xbf16>
    %c0_160 = arith.constant 0 : index
    %c0_161 = arith.constant 0 : index
    %c0_162 = arith.constant 0 : index
    %564 = vector.load %arg21[%c0_160, %c0_161, %c0_162] : memref<1x64x32xbf16, #tpu.memory_space<vmem>>, vector<1x64x32xbf16>
    %565 = vector.shape_cast %564 : vector<1x64x32xbf16> to vector<64x32xbf16>
    %cst_163 = arith.constant dense<0.000000e+00> : vector<16x32xf32>
    %566 = tpu.matmul %563, %565, %cst_163 {dimension_numbers = #tpu.dot_dimension_numbers<[1], [0], [0], [1], [0, 0, 1, 1], [], []>} : vector<16x64xbf16>, vector<64x32xbf16>, vector<16x32xf32> -> vector<16x32xf32>
    %c0_164 = arith.constant 0 : index
    %c0_165 = arith.constant 0 : index
    %c0_166 = arith.constant 0 : index
    %567 = vector.load %arg22[%c0_164, %c0_165, %c0_166] : memref<1x1x32xf32, #tpu.memory_space<vmem>>, vector<1x1x32xf32>
    %568 = vector.shape_cast %567 : vector<1x1x32xf32> to vector<1x32xf32>
    %569 = vector.broadcast %568 : vector<1x32xf32> to vector<16x32xf32>
    %570 = arith.addf %566, %569 : vector<16x32xf32>
    %571 = arith.addf %552, %570 : vector<16x32xf32>
    %c0_167 = arith.constant 0 : index
    %c0_168 = arith.constant 0 : index
    %c0_169 = arith.constant 0 : index
    %572 = vector.load %arg23[%c0_167, %c0_168, %c0_169] : memref<1x1x32xf32, #tpu.memory_space<vmem>>, vector<1x1x32xf32>
    %573 = vector.shape_cast %572 : vector<1x1x32xf32> to vector<1x32xf32>
    %c0_170 = arith.constant 0 : index
    %c0_171 = arith.constant 0 : index
    %c0_172 = arith.constant 0 : index
    %574 = vector.load %arg24[%c0_170, %c0_171, %c0_172] : memref<1x1x32xf32, #tpu.memory_space<vmem>>, vector<1x1x32xf32>
    %575 = vector.shape_cast %574 : vector<1x1x32xf32> to vector<1x32xf32>
    %cst_173 = arith.constant dense<0.000000e+00> : vector<16xf32>
    %576 = vector.multi_reduction <add>, %571, %cst_173 [1] : vector<16x32xf32> to vector<16xf32>
    %577 = vector.shape_cast %576 : vector<16xf32> to vector<16x1xf32>
    %cst_174 = arith.constant 3.200000e+01 : f32
    %578 = vector.broadcast %cst_174 : f32 to vector<16x1xf32>
    %579 = arith.divf %577, %578 : vector<16x1xf32>
    %580 = vector.broadcast %579 : vector<16x1xf32> to vector<16x32xf32>
    %581 = arith.subf %571, %580 : vector<16x32xf32>
    %582 = arith.mulf %581, %581 : vector<16x32xf32>
    %cst_175 = arith.constant dense<0.000000e+00> : vector<16xf32>
    %583 = vector.multi_reduction <add>, %582, %cst_175 [1] : vector<16x32xf32> to vector<16xf32>
    %584 = vector.shape_cast %583 : vector<16xf32> to vector<16x1xf32>
    %cst_176 = arith.constant 3.200000e+01 : f32
    %585 = vector.broadcast %cst_176 : f32 to vector<16x1xf32>
    %586 = arith.divf %584, %585 : vector<16x1xf32>
    %587 = vector.broadcast %579 : vector<16x1xf32> to vector<16x32xf32>
    %588 = arith.subf %571, %587 : vector<16x32xf32>
    %cst_177 = arith.constant 9.99999974E-6 : f32
    %589 = vector.broadcast %cst_177 : f32 to vector<16x1xf32>
    %590 = arith.addf %586, %589 : vector<16x1xf32>
    %591 = math.rsqrt %590 : vector<16x1xf32>
    %592 = vector.broadcast %591 : vector<16x1xf32> to vector<16x32xf32>
    %593 = arith.mulf %588, %592 : vector<16x32xf32>
    %594 = vector.broadcast %573 : vector<1x32xf32> to vector<16x32xf32>
    %595 = arith.mulf %593, %594 : vector<16x32xf32>
    %596 = vector.broadcast %575 : vector<1x32xf32> to vector<16x32xf32>
    %597 = arith.addf %595, %596 : vector<16x32xf32>
    %598 = vector.shape_cast %597 : vector<16x32xf32> to vector<2x8x32xf32>
    %c0_178 = arith.constant 0 : index
    %c0_179 = arith.constant 0 : index
    %c0_180 = arith.constant 0 : index
    %599 = vector.load %arg27[%c0_178, %c0_179, %c0_180] : memref<2x8x32xf32, #tpu.memory_space<vmem>>, vector<2x8x32xf32>
    tpu.vector_store %arg27[%c0_178, %c0_179, %c0_180], %598 {strides = array<i32>} : memref<2x8x32xf32, #tpu.memory_space<vmem>>, vector<2x8x32xf32>,
    %c1_i32 = arith.constant 1 : i32
    %600 = arith.cmpi eq, %arg1, %c1_i32 : i32
    %601 = arith.extui %600 : i1 to i32
    %c0_i32_181 = arith.constant 0 : i32
    %602 = arith.cmpi ne, %601, %c0_i32_181 : i32
    scf.if %602 {
      %603 = vector.shape_cast %597 : vector<16x32xf32> to vector<2x8x32xf32>
      %c0_182 = arith.constant 0 : index
      %c0_183 = arith.constant 0 : index
      %c0_184 = arith.constant 0 : index
      %604 = vector.load %arg25[%c0_182, %c0_183, %c0_184] : memref<2x8x32xf32, #tpu.memory_space<vmem>>, vector<2x8x32xf32>
      tpu.vector_store %arg25[%c0_182, %c0_183, %c0_184], %603 {strides = array<i32>} : memref<2x8x32xf32, #tpu.memory_space<vmem>>, vector<2x8x32xf32>,
    } else {
    }
    return
  }
  func.func @transform_0(%arg0: i32, %arg1: i32) -> (i32, i32, i32) {
    %c0_i32 = arith.constant 0 : i32
    %c0_i32_0 = arith.constant 0 : i32
    %c0_i32_1 = arith.constant 0 : i32
    return %arg0, %c0_i32, %c0_i32_0 : i32, i32, i32
  }
  func.func @transform_1(%arg0: i32, %arg1: i32) -> (i32, i32, i32) {
    %c0_i32 = arith.constant 0 : i32
    %c0_i32_0 = arith.constant 0 : i32
    %c0_i32_1 = arith.constant 0 : i32
    return %arg0, %c0_i32, %c0_i32_0 : i32, i32, i32
  }
  func.func @transform_2(%arg0: i32, %arg1: i32) -> (i32, i32, i32) {
    %c0_i32 = arith.constant 0 : i32
    %c0_i32_0 = arith.constant 0 : i32
    %c0_i32_1 = arith.constant 0 : i32
    return %arg0, %c0_i32, %c0_i32_0 : i32, i32, i32
  }
  func.func @transform_3(%arg0: i32, %arg1: i32) -> (i32, i32, i32) {
    %c0_i32 = arith.constant 0 : i32
    %c0_i32_0 = arith.constant 0 : i32
    %c0_i32_1 = arith.constant 0 : i32
    return %arg1, %c0_i32, %c0_i32_0 : i32, i32, i32
  }
  func.func @transform_4(%arg0: i32, %arg1: i32) -> (i32, i32, i32) {
    %c0_i32 = arith.constant 0 : i32
    %c0_i32_0 = arith.constant 0 : i32
    %c0_i32_1 = arith.constant 0 : i32
    return %arg1, %c0_i32, %c0_i32_0 : i32, i32, i32
  }
  func.func @transform_5(%arg0: i32, %arg1: i32) -> (i32, i32, i32) {
    %c0_i32 = arith.constant 0 : i32
    %c0_i32_0 = arith.constant 0 : i32
    %c0_i32_1 = arith.constant 0 : i32
    return %arg1, %c0_i32, %c0_i32_0 : i32, i32, i32
  }
  func.func @transform_6(%arg0: i32, %arg1: i32) -> (i32, i32, i32) {
    %c0_i32 = arith.constant 0 : i32
    %c0_i32_0 = arith.constant 0 : i32
    %c0_i32_1 = arith.constant 0 : i32
    return %arg1, %c0_i32, %c0_i32_0 : i32, i32, i32
  }
  func.func @transform_7(%arg0: i32, %arg1: i32) -> (i32, i32, i32) {
    %c0_i32 = arith.constant 0 : i32
    %c0_i32_0 = arith.constant 0 : i32
    %c0_i32_1 = arith.constant 0 : i32
    return %arg1, %c0_i32, %c0_i32_0 : i32, i32, i32
  }
  func.func @transform_8(%arg0: i32, %arg1: i32) -> (i32, i32, i32) {
    %c0_i32 = arith.constant 0 : i32
    %c0_i32_0 = arith.constant 0 : i32
    %c0_i32_1 = arith.constant 0 : i32
    return %arg1, %c0_i32, %c0_i32_0 : i32, i32, i32
  }
  func.func @transform_9(%arg0: i32, %arg1: i32) -> (i32, i32, i32) {
    %c0_i32 = arith.constant 0 : i32
    %c0_i32_0 = arith.constant 0 : i32
    %c0_i32_1 = arith.constant 0 : i32
    return %arg1, %c0_i32, %c0_i32_0 : i32, i32, i32
  }
  func.func @transform_10(%arg0: i32, %arg1: i32) -> (i32, i32, i32) {
    %c0_i32 = arith.constant 0 : i32
    %c0_i32_0 = arith.constant 0 : i32
    %c0_i32_1 = arith.constant 0 : i32
    return %arg1, %c0_i32, %c0_i32_0 : i32, i32, i32
  }
  func.func @transform_11(%arg0: i32, %arg1: i32) -> (i32, i32, i32) {
    %c0_i32 = arith.constant 0 : i32
    %c0_i32_0 = arith.constant 0 : i32
    %c0_i32_1 = arith.constant 0 : i32
    return %arg1, %c0_i32, %c0_i32_0 : i32, i32, i32
  }
  func.func @transform_12(%arg0: i32, %arg1: i32) -> (i32, i32, i32) {
    %c0_i32 = arith.constant 0 : i32
    %c0_i32_0 = arith.constant 0 : i32
    %c0_i32_1 = arith.constant 0 : i32
    return %arg1, %c0_i32, %c0_i32_0 : i32, i32, i32
  }
  func.func @transform_13(%arg0: i32, %arg1: i32) -> (i32, i32, i32) {
    %c0_i32 = arith.constant 0 : i32
    %c0_i32_0 = arith.constant 0 : i32
    %c0_i32_1 = arith.constant 0 : i32
    return %arg1, %c0_i32, %c0_i32_0 : i32, i32, i32
  }
  func.func @transform_14(%arg0: i32, %arg1: i32) -> (i32, i32, i32) {
    %c0_i32 = arith.constant 0 : i32
    %c0_i32_0 = arith.constant 0 : i32
    %c0_i32_1 = arith.constant 0 : i32
    return %arg1, %c0_i32, %c0_i32_0 : i32, i32, i32
  }
  func.func @transform_15(%arg0: i32, %arg1: i32) -> (i32, i32, i32) {
    %c0_i32 = arith.constant 0 : i32
    %c0_i32_0 = arith.constant 0 : i32
    %c0_i32_1 = arith.constant 0 : i32
    return %arg1, %c0_i32, %c0_i32_0 : i32, i32, i32
  }
  func.func @transform_16(%arg0: i32, %arg1: i32) -> (i32, i32, i32) {
    %c0_i32 = arith.constant 0 : i32
    %c0_i32_0 = arith.constant 0 : i32
    %c0_i32_1 = arith.constant 0 : i32
    return %arg1, %c0_i32, %c0_i32_0 : i32, i32, i32
  }
  func.func @transform_17(%arg0: i32, %arg1: i32) -> (i32, i32, i32) {
    %c0_i32 = arith.constant 0 : i32
    %c0_i32_0 = arith.constant 0 : i32
    %c0_i32_1 = arith.constant 0 : i32
    return %arg1, %c0_i32, %c0_i32_0 : i32, i32, i32
  }
  func.func @transform_18(%arg0: i32, %arg1: i32) -> (i32, i32, i32) {
    %c0_i32 = arith.constant 0 : i32
    %c0_i32_0 = arith.constant 0 : i32
    %c0_i32_1 = arith.constant 0 : i32
    return %arg1, %c0_i32, %c0_i32_0 : i32, i32, i32
  }
  func.func @transform_19(%arg0: i32, %arg1: i32) -> (i32, i32, i32) {
    %c0_i32 = arith.constant 0 : i32
    %c0_i32_0 = arith.constant 0 : i32
    %c0_i32_1 = arith.constant 0 : i32
    return %arg1, %c0_i32, %c0_i32_0 : i32, i32, i32
  }
  func.func @transform_20(%arg0: i32, %arg1: i32) -> (i32, i32, i32) {
    %c0_i32 = arith.constant 0 : i32
    %c0_i32_0 = arith.constant 0 : i32
    %c0_i32_1 = arith.constant 0 : i32
    return %arg1, %c0_i32, %c0_i32_0 : i32, i32, i32
  }
  func.func @transform_21(%arg0: i32, %arg1: i32) -> (i32, i32, i32) {
    %c0_i32 = arith.constant 0 : i32
    %c0_i32_0 = arith.constant 0 : i32
    %c0_i32_1 = arith.constant 0 : i32
    return %arg1, %c0_i32, %c0_i32_0 : i32, i32, i32
  }
  func.func @transform_22(%arg0: i32, %arg1: i32) -> (i32, i32, i32) {
    %c0_i32 = arith.constant 0 : i32
    %c0_i32_0 = arith.constant 0 : i32
    %c0_i32_1 = arith.constant 0 : i32
    return %arg1, %c0_i32, %c0_i32_0 : i32, i32, i32
  }
  func.func @transform_23(%arg0: i32, %arg1: i32) -> (i32, i32, i32) {
    %c0_i32 = arith.constant 0 : i32
    %c0_i32_0 = arith.constant 0 : i32
    %c0_i32_1 = arith.constant 0 : i32
    return %arg0, %c0_i32, %c0_i32_0 : i32, i32, i32
  }
  func.func @transform_24(%arg0: i32, %arg1: i32) -> (i32, i32, i32, i32, i32) {
    %c0_i32 = arith.constant 0 : i32
    %c0_i32_0 = arith.constant 0 : i32
    %c0_i32_1 = arith.constant 0 : i32
    %c0_i32_2 = arith.constant 0 : i32
    return %arg1, %arg0, %c0_i32, %c0_i32_0, %c0_i32_1 : i32, i32, i32, i32, i32
  }
}

</mosaic_0001>

<bundles_post_ra>
// kernel: decoder_forward.1
= control target key start
LH: loop header
LB: loop body
LE: loop exit
PB: predicated region body
PF: predicated region fallthrough
CT: control target
= control target key end

     0   :  { %s7132_s0 = inlined_call_operand.vmem [shape: f32[2,8,32], index: 0, kind: input, shape index: {}]   ;;  %s7133_s1 = inlined_call_operand.vmem [shape: f32[2,8,32], index: 1, kind: input, shape index: {}]   ;;  %s7134_s2 = inlined_call_operand.vmem [shape: f32[2,1,8], index: 2, kind: input, shape index: {}]   ;;  %s7135_s3 = inlined_call_operand.vmem [shape: bf16[2,32,96], index: 3, kind: input, shape index: {}]   ;;  %s7136_s4 = inlined_call_operand.vmem [shape: f32[2,1,96], index: 4, kind: input, shape index: {}]   ;;  %s7137_s5 = inlined_call_operand.vmem [shape: bf16[2,32,32], index: 5, kind: input, shape index: {}]   ;;  %s7138_s6 = inlined_call_operand.vmem [shape: f32[2,1,32], index: 6, kind: input, shape index: {}]   ;;  %s7139_s7 = inlined_call_operand.vmem [shape: f32[2,1,32], index: 7, kind: input, shape index: {}]   ;;  %s7140_s8 = inlined_call_operand.vmem [shape: f32[2,1,32], index: 8, kind: input, shape index: {}]   ;;  %s7141_s9 = inlined_call_operand.vmem [shape: bf16[2,32,32], index: 9, kind: input, shape index: {}]   ;;  %s7142_s10 = inlined_call_operand.vmem [shape: f32[2,1,32], index: 10, kind: input, shape index: {}]   ;;  %s7143_s11 = inlined_call_operand.vmem [shape: bf16[2,32,64], index: 11, kind: input, shape index: {}]   ;;  %s7144_s12 = inlined_call_operand.vmem [shape: f32[2,1,64], index: 12, kind: input, shape index: {}]   ;;  %s7145_s13 = inlined_call_operand.vmem [shape: bf16[2,32,32], index: 13, kind: input, shape index: {}]   ;;  %s7146_s14 = inlined_call_operand.vmem [shape: f32[2,1,32], index: 14, kind: input, shape index: {}]   ;;  %s7147_s15 = inlined_call_operand.vmem [shape: f32[2,1,32], index: 15, kind: input, shape index: {}]   ;;  %s7148_s16 = inlined_call_operand.vmem [shape: f32[2,1,32], index: 16, kind: input, shape index: {}]   ;;  %s7149_s17 = inlined_call_operand.vmem [shape: bf16[2,32,64], index: 17, kind: input, shape index: {}]   ;;  %s7150_s18 = inlined_call_operand.vmem [shape: f32[2,1,64], index: 18, kind: input, shape index: {}]   ;;  %s7151_s19 = inlined_call_operand.vmem [shape: bf16[2,64,32], index: 19, kind: input, shape index: {}]   ;;  %s7152_s20 = inlined_call_operand.vmem [shape: f32[2,1,32], index: 20, kind: input, shape index: {}]   ;;  %s7153_s21 = inlined_call_operand.vmem [shape: f32[2,1,32], index: 21, kind: input, shape index: {}]   ;;  %s7154_s22 = inlined_call_operand.vmem [shape: f32[2,1,32], index: 22, kind: input, shape index: {}]   ;;  %s7155_s23 = inlined_call_operand.vmem [shape: f32[2,8,32], index: 23, kind: output, shape index: {0}]   ;;  %s7156_s24 = inlined_call_operand.hbm [shape: f32[2,2,4,8,8], index: 24, kind: output, shape index: {1}]  }
   0x1   :  { %7177 = sst [smem:[#allocation16_spill]] %s7132_s0 }
   0x2   :  { %7178 = sst [smem:[#allocation17_spill]] %s7133_s1 }
   0x3   :  { %7179 = sst [smem:[#allocation18_spill]] %s7134_s2 }
   0x4   :  { %7180 = sst [smem:[#allocation19_spill]] %s7135_s3 }
   0x5   :  { %7181 = sst [smem:[#allocation20_spill]] %s7136_s4 }
   0x6   :  { %7182 = sst [smem:[#allocation21_spill]] %s7137_s5 }
   0x7   :  { %7183 = sst [smem:[#allocation22_spill]] %s7138_s6 }
   0x8   :  { %7184 = sst [smem:[#allocation23_spill]] %s7139_s7 }
   0x9   :  { %7185 = sst [smem:[#allocation24_spill]] %s7140_s8 }
   0xa   :  { %7186 = sst [smem:[#allocation25_spill]] %s7141_s9 }
   0xb   :  { %7187 = sst [smem:[#allocation26_spill]] %s7143_s11 }
   0xc   :  { %7188 = sst [smem:[#allocation27_spill]] %s7145_s13 }
   0xd   :  { %7189 = sst [smem:[#allocation28_spill]] %s7146_s14 }
   0xe   :  { %7190 = sst [smem:[#allocation29_spill]] %s7147_s15 }
   0xf   :  { %7191 = sst [smem:[#allocation30_spill]] %s7148_s16 }
  0x10   :  { %7192 = sst [smem:[#allocation31_spill]] %s7149_s17 }
  0x11   :  { %7193 = sst [smem:[#allocation32_spill]] %s7150_s18 }
  0x12   :  { %7194 = sst [smem:[#allocation33_spill]] %s7151_s19 }
  0x13   :  { %7195 = sst [smem:[#allocation34_spill]] %s7152_s20 }
  0x14   :  { %7196 = sst [smem:[#allocation35_spill]] %s7153_s21 }
  0x15   :  { %7197 = sst [smem:[#allocation36_spill]] %s7154_s22 }
  0x16   :  { %7198 = sst [smem:[#allocation37_spill]] %s7155_s23 }
  0x17   :  { %7199 = sst [smem:[#allocation38_spill]] %s7156_s24 }
  0x18   :  { %30 = vsyncpa [#allocation4], 0 }
  0x19   :  { %32 = vsyncpa [#allocation4 + $0x1], 0  ;;  %s5335_s5 = smov 0   ;;  %s5337_s26 = smov 0  }
  0x1a   :  { %s5339_s27 = smov 0   ;;  %s5341_s28 = smov 0  }
  0x1b   :  { %s5343_s6 = smov 0   ;;  %s5345_s2 = smov 0  }
  0x1c LB: > { %7200 = sst [smem:[#allocation6_spill]] %s5175_s5  ;;  %s4705_s29 = sadd.s32 4294967295, %s5195_s2   ;;  %s5195_s2 = sphi %s5345_s2, %s38_s2   ;;  %s5191_s6 = sphi %s5343_s6, %s7295_s6   ;;  %s5187_s28 = sphi %s5341_s28, %s7294_s28   ;;  %s5183_s27 = sphi %s5339_s27, %s7293_s27   ;;  %s5179_s26 = sphi %s5337_s26, %s7292_s26   ;;  %s5175_s5 = sphi %s5335_s5, %s7291_s5  }
  0x1d   : > { %7201 = sst [smem:[#allocation7_spill]] %s5179_s26  ;;  %s4706_s0 = sadd.s32 4294967294, %s5195_s2  }
  0x1e   : > { %7202 = sst [smem:[#allocation8_spill]] %s5183_s27  ;;  %s47_s7 = sadd.s32 1, %s5191_s6 }
  0x1f   : > { %7203 = sst [smem:[#allocation9_spill]] %s5187_s28  ;;  %s683_s30 = sadd.s32 1, %s5183_s27 }
  0x20   : > { %7204 = sst [smem:[#allocation10_spill]] %s5191_s6  ;;  %p48_p0 = scmp.ge.s32.totalorder %s47_s7, 2 }
  0x21   : > { %7205 = sst [smem:[#allocation11_spill]] %s5195_s2  ;;  %p693_p1 = scmp.ne.s32.totalorder %s5183_s27, %s5179_s26 }
  0x22   : > { %p694_p2 = scmp.eq.s32.totalorder %s4705_s29, 1  ;;  %p699_p3 = scmp.ne.s32.totalorder %s5179_s26, %s5175_s5 }
  0x23   : > { %s7297_s7 = smov (%p48_p0, %s47_s7), 0  ;;  %p700_p5 = scmp.eq.s32.totalorder %s4706_s0, 1 }
  0x24   : > { %7206 = sst [smem:[#allocation12_spill]] %s7297_s7  ;;  %p5375_p4 = por %p694_p2, %p693_p1 }
  0x25   : > { %s678_s25 = ssub.s32 %s5191_s6, %s7297_s7  ;;  %p4712_p6 = scmp.ge.s32.totalorder %s5195_s2, 1 }
  0x26   : > { %s7207_s3 = scalar_select %p5375_p4, 1, 0 }
  0x27   : > { %p681_p7 = scmp.eq.s32.totalorder %s678_s25, 0  ;;  %p5382_p8 = por %p700_p5, %p699_p3 }
  0x28   : > { %7208 = sst [smem:[#allocation13_spill]] %s7207_s3  ;;  %p878_p9 = scmp.lt.s32.totalorder %s5195_s2, 3 }
  0x29   : > { %s7209_s8 = scalar_select %p5382_p8, 1, 0 }
  0x2a   : > { %s5388_s4 = scalar_select %p681_p7, %s5183_s27, %s683_s30  }
  0x2b   : > { %7210 = sst [smem:[#allocation14_spill]] %s7209_s8  ;;  %p879_p10 = pnand %p4712_p6, %p878_p9 }
  0x2c   : > { %7211 = sst [smem:[#allocation15_spill]] %s5388_s4  ;;  %s7163_s1 = sand.u32 (!%p879_p10), 1, %s5179_s26  }
  0x2d   : > { %882 = sbr.rel (%p879_p10) target bundleno = 3696 (0xe70), region = 112  ;;  %p1049_p11 = scmp.lt.s32.totalorder (!%p879_p10), %s5187_s28, 1 }
  0x2e   : > { %s4713_s29 = sshll.u32 (!%p879_p10), %s7163_s1, 6  ;;  %s7213_s8 = sld [smem:[#allocation19_spill]] (!%p879_p10) }
  0x2f   : > { %s7214_s3 = sld [smem:[#allocation21_spill]] (!%p879_p10)  ;;  %s5484_s25 = scalar_lea.vmem (!%p879_p10), [#allocation3], %s4713_s29 }
  0x30   : > { %s7218_s9 = sld [smem:[#allocation25_spill]] (!%p879_p10) }
  0x31   : > { %s7219_s11 = sld [smem:[#allocation26_spill]] (!%p879_p10) }
  0x32   : > { %s5395_s0 = scalar_select %p1049_p11, %s5187_s28, 1 }
  0x33   : > { %s7220_s13 = sld [smem:[#allocation27_spill]] }
  0x34   : > { %s4840_s30 = sshll.u32 %s5395_s0, 4  ;;  %s7224_s17 = sld [smem:[#allocation31_spill]] }
  0x35   : > { %s1053_s5 = scalar_lea.vmem %s7213_s8, %s4840_s30  ;;  %s5408_s26 = scalar_lea.vmem %s7214_s3, %s4840_s30 }
  0x36   : > { %s5425_s24 = scalar_lea.vmem %s7218_s9, %s4840_s30  ;;  %s7225_s4 = sld [smem:[#allocation32_spill]] }
  0x37   : > { %s5434_s19 = scalar_lea.vmem %s7219_s11, %s4840_s30  ;;  %s7226_s6 = sld [smem:[#allocation33_spill]] }
  0x38   : > { %s7227_s23 = sld [smem:[#allocation34_spill]] }
  0x39   : > { %s5443_s8 = scalar_lea.vmem %s7220_s13, %s4840_s30  ;;  %s4846_s13 = sshll.u32 %s5395_s0, 5 }
  0x3a   : > { %s5460_s7 = scalar_lea.vmem %s7224_s17, %s4840_s30  ;;  %s7228_s16 = sld [smem:[#allocation35_spill]] }
  0x3b   : > { %s7229_s17 = sld [smem:[#allocation36_spill]] }
  0x3c   : > { %s1108_s11 = scalar_lea.vmem %s7225_s4, %s5395_s0  ;;  %s7230_s4 = sld [smem:[#allocation9_spill]] }
  0x3d   : > { %s5470_s14 = scalar_lea.vmem %s7226_s6, %s4846_s13 }
  0x3e   : > { %s1116_s22 = scalar_lea.vmem %s7227_s23, %s5395_s0 }
  0x40   : > { %s1119_s9 = scalar_lea.vmem %s7228_s16, %s5395_s0 }
  0x41   : > { %s1122_s15 = scalar_lea.vmem %s7229_s17, %s5395_s0 }
  0x42   : > { %p4728_p12 = scmp.ne.s32.totalorder %s7230_s4, 0 }
  0x43   : > { %s7231_s6 = sld [smem:[#allocation16_spill]] (!%p4728_p12) }
  0x44   : > { %1134 = sbr.rel (%p4728_p12) target bundleno = 76 (0x4c), region = 116 }
  0x49   : > { %s7232_s18 = smov %s7231_s6  ;;  %v1135_v0 = vld [vmem:[%s7231_s6] sm:$0xff]  ;;  %vm1137_vm0 = vcmask 261120  }
  0x4a   : > { %v1136_v1 = vld [vmem:[%s7232_s18 + $0x8] sm:$0xff]  ;;  %1138 = vst.msk [vmem:[#allocation2] sm:$0xff] %vm1137_vm0, %v1135_v0 }
  0x4b   : > { %1139 = vst.msk [vmem:[#allocation2 + $0x8] sm:$0xff] %vm1137_vm0, %v1136_v1 }
  0x4c PF: > { %v4848_v2 = vld [vmem:[%s1053_s5 + $0x8] sm:$0xff]  ;;  %v4847_v3 = vld [vmem:[%s1053_s5] sm:$0xff]  ;;  %vm1179_vm1 = vcmask 261120   ;;  %s7233_s21 = sld [smem:[#allocation20_spill]]  ;;  %s5197_s2 = smov 112   ;;  %vm1223_vm2 = vcmask 1047556  }
  0x4d   : > { %1189 = vmatpush.bf16.msra.mxu0 %v4848_v2  ;;  %s5198_s3 = smov 104   ;;  %s5199_s5 = smov 120   ;;  %v5200_v12 = vmov 1983009808   ;;  %v5202_v21 = vmov 1934713408  }
  0x4e   : > { %v1228_v13 = vunpack.c.l.s4 %v5200_v12  ;;  %s5201_s28 = smov 96   ;;  %v1252_v22 = vunpack.c.l.s4 %v5202_v21  ;;  %vm1640_vm3 = vcmask 1041409   ;;  %vm1643_vm4 = vcmask 1042434   ;;  %s5203_s30 = smov 64  }
  0x4f   : > { %vm1646_vm5 = vcmask 1043459   ;;  %vm1649_vm6 = vcmask 1044484   ;;  %vm1652_vm7 = vcmask 1045509   ;;  %vm1655_vm8 = vcmask 1046534   ;;  %s7235_s27 = sld [smem:[#allocation18_spill]]  ;;  %s5205_s23 = smov 8  }
  0x50   : > { %v5511_v20 = vunpack.c.0.s8 %v1228_v13  ;;  %v5516_v27 = vunpack.c.0.s8 %v1252_v22  ;;  %vm1658_vm9 = vcmask 1047559   ;;  %vm1692_vm10 = vcmask 64512   ;;  %s5206_s16 = smov 24   ;;  %s5207_s17 = smov 16  }
  0x51   : > { %v1140_v4 = vld [vmem:[#allocation2] sm:$0xff]  ;;  %1190 = vmatpush.bf16.msra.mxu0 %v4847_v3  ;;  %vm7176_vm12 = vcmask 1043456   ;;  %vm7175_vm13 = vcmask 130048   ;;  %vm7174_vm14 = vcmask 195584   ;;  %s7242_s20 = sld [smem:[#allocation23_spill]] }
  0x52   : > { %v1141_v5 = vld [vmem:[#allocation2 + $0x8] sm:$0xff]  ;;  %s7234_s29 = scalar_lea.vmem %s7233_s21, %s5395_s0 }
  0x53   : > { %v1158_v6 = vpack.c.bf16 %v1141_v5, %v1140_v4  ;;  %v5022_v7 = vld [vmem:[%s7234_s29] ss:$0 sm:$0xff]  ;;  %s7237_s29 = sld [smem:[#allocation22_spill]] }
  0x55   : > { %4737 = vmatmul.msk.bf16.vlgmr.msra.gmra.mxu0 %vm1179_vm1, %v1158_v6  ;;  %s7236_s13 = smov %s7235_s27 }
  0x57   : > { %s7243_s4 = scalar_lea.vmem %s7242_s20, %s5395_s0 }
  0xd2   : > { %v1192_v8 = vpop.f32.mrf.mxu0 }
  0xd3   : > { %v1193_v9 = vadd.f32 %v5022_v7, %v1192_v8 }
  0xd5   : > { %1210 = vrot.lane.b32.xlu1 %v1193_v9, %s5197_s2  ;;  %1216 = vrot.lane.b32.xlu0 %v1193_v9, %s5198_s3  ;;  %v1225_v19 = vrot.slane %v1193_v9, 4 }
  0xda   : > { %v1194_v10 = vpop.f32.mrf.mxu0 }
  0xdb   : > { %v5502_v11 = vadd.f32 %v5022_v7, %v1194_v10 }
  0xdd   : > { %1204 = vrot.lane.b32.xlu0 %v1193_v9, %s5199_s5 }
  0xe5   : > { %1218 = vrot.lane.b32.xlu0 %v5502_v11, %s5198_s3 }
 0x147   : > { %v1211_v14 = vpop.permute.xlu1 %1210  ;;  %v1217_v15 = vpop.permute.xlu0 %1216 }
 0x148   : > { %v1222_v16 = vrot.slane %v1211_v14, 4  ;;  %v5506_v17 = vpack.i.bf16 %v1193_v9, %v1211_v14  ;;  %v1226_v23 = vsel %vm1223_vm2, %v1211_v14, %v1225_v19  ;;  %v1235_v25 = vrot.slane %v1217_v15, 4 }
 0x149   : > { %v1234_v26 = vperm.slane %v1226_v23, %v5511_v20 }
 0x14a   : > { %v1224_v18 = vsel %vm1223_vm2, %v1222_v16, %v1193_v9  ;;  %4938 = vrot.lane.b32.xlu2 %v5506_v17, %s5201_s28 }
 0x14b   : > { %v1230_v24 = vperm.slane %v1224_v18, %v5511_v20  ;;  %v1261_v35 = vrot.slane %v1234_v26, 4 }
 0x14d   : > { %v1249_v32 = vrot.slane %v1230_v24, 4 }
 0x14f   : > { %v1205_v28 = vpop.permute.xlu0 %1204 }
 0x150   : > { %v1236_v29 = vsel %vm1223_vm2, %v1235_v25, %v1205_v28  ;;  %v1237_v30 = vrot.slane %v1205_v28, 4  ;;  %v5519_v31 = vpack.i.bf16 %v1205_v28, %v1217_v15 }
 0x151   : > { %v1242_v33 = vperm.slane %v1236_v29, %v5511_v20 }
 0x152   : > { %v1238_v34 = vsel %vm1223_vm2, %v1217_v15, %v1237_v30  ;;  %1212 = vrot.lane.b32.xlu2 %v5502_v11, %s5197_s2  ;;  %4933 = vrot.lane.b32.xlu1 %v5519_v31, %s5201_s28 }
 0x153   : > { %v1246_v36 = vperm.slane %v1238_v34, %v5511_v20  ;;  %v1247_v37 = vrot.slane %v1242_v33, 4  ;;  %v1250_v38 = vsel %vm1223_vm2, %v1242_v33, %v1249_v32 }
 0x154   : > { %v1258_v39 = vperm.slane %v1250_v38, %v5516_v27 }
 0x155   : > { %v1248_v40 = vsel %vm1223_vm2, %v1247_v37, %v1230_v24  ;;  %v1259_v41 = vrot.slane %v1246_v36, 4  ;;  %v1262_v42 = vsel %vm1223_vm2, %v1246_v36, %v1261_v35 }
 0x156   : > { %v1254_v43 = vperm.slane %v1248_v40, %v5516_v27  ;;  %v1270_v44 = vperm.slane %v1262_v42, %v5516_v27  ;;  %v1273_v45 = vrot.slane %v1258_v39, 4  ;;  %v1609_v47 = vpack.c.bf16 %v1258_v39, %v1258_v39 }
 0x157   : > { %v1260_v46 = vsel %vm1223_vm2, %v1259_v41, %v1234_v26 }
 0x158   : > { %v1266_v48 = vperm.slane %v1260_v46, %v5516_v27  ;;  %v1271_v49 = vrot.slane %v1254_v43, 4  ;;  %v1274_v50 = vsel %vm1223_vm2, 0.0, %v1273_v45  ;;  %v1277_v51 = vrot.slane %v1270_v44, 4 }
 0x159   : > { %v1607_v52 = vpack.c.bf16 %v1254_v43, %v1254_v43  ;;  %v1610_v53 = vpack.c.bf16 %v1274_v50, %v1274_v50  ;;  %v1613_v57 = vpack.c.bf16 %v1270_v44, %v1270_v44  ;;  %v1633_v60 = vunpack.c.l.b16 %v1609_v47 }
 0x15a   : > { %v1272_v54 = vsel %vm1223_vm2, 0.0, %v1271_v49  ;;  %v1275_v55 = vrot.slane %v1266_v48, 4  ;;  %v1611_v56 = vpack.c.bf16 %v1266_v48, %v1266_v48  ;;  %1206 = vrot.lane.b32.xlu1 %v5502_v11, %s5199_s5  ;;  %v1278_v0 = vsel %vm1223_vm2, 0.0, %v1277_v51 }
 0x15b   : > { %v1608_v58 = vpack.c.bf16 %v1272_v54, %v1272_v54  ;;  %v1631_v59 = vunpack.c.l.b16 %v1607_v52  ;;  %v1634_v61 = vunpack.c.l.b16 %v1610_v53  ;;  %v1614_v4 = vpack.c.bf16 %v1278_v0, %v1278_v0 }
 0x15c   : > { %v5540_v62 = vunpack.c.l.b16 %v1611_v56  ;;  %v1276_v63 = vsel %vm1223_vm2, 0.0, %v1275_v55  ;;  %v1637_v5 = vunpack.c.l.b16 %v1613_v57  ;;  %v1787_v8 = vrot.slane %v1633_v60, 7 }
 0x15d   : > { %v1632_v1 = vunpack.c.l.b16 %v1608_v58  ;;  %v1612_v2 = vpack.c.bf16 %v1276_v63, %v1276_v63  ;;  %v1882_v3 = vrot.slane %v1631_v59, 2  ;;  %v1785_v6 = vrot.slane %v1631_v59, 1 }
 0x15e   : > { %v1789_v9 = vrot.slane %v1634_v61, 6  ;;  %v1638_v12 = vunpack.c.l.b16 %v1614_v4  ;;  %v1791_v14 = vrot.slane %v5540_v62, 5  ;;  %v1642_v15 = vrot.slane %v1633_v60, 6 }
 0x15f   : > { %v1636_v7 = vunpack.c.l.b16 %v1612_v2  ;;  %v1639_v10 = vrot.slane %v1632_v1, 7  ;;  %v1786_v13 = vsel %vm1640_vm3, %v1632_v1, %v1785_v6  ;;  %v1645_v21 = vrot.slane %v1634_v61, 5 }
 0x160   : > { %v1788_v16 = vsel %vm1643_vm4, %v1787_v8, %v1786_v13  ;;  %v1795_v23 = vrot.slane %v1637_v5, 3  ;;  %v1648_v25 = vrot.slane %v5540_v62, 4  ;;  %v1797_v28 = vrot.slane %v1638_v12, 2 }
 0x161   : > { %v1793_v18 = vrot.slane %v1636_v7, 4  ;;  %v1641_v19 = vsel %vm1640_vm3, %v1639_v10, %v1631_v59  ;;  %v1790_v22 = vsel %vm1646_vm5, %v1789_v9, %v1788_v16  ;;  %v1651_v30 = vrot.slane %v1636_v7, 3  ;;  %v5584_v9 = vpop.permute.xlu0 %1218 }
 0x162   : > { %v1644_v24 = vsel %vm1643_vm4, %v1642_v15, %v1641_v19  ;;  %v1792_v26 = vsel %vm1649_vm6, %v1791_v14, %v1790_v22  ;;  %v1654_v34 = vrot.slane %v1637_v5, 2  ;;  %v1883_v35 = vrot.slane %v1632_v1, 1 }
 0x163   : > { %v1647_v29 = vsel %vm1646_vm5, %v1645_v21, %v1644_v24  ;;  %v1794_v32 = vsel %vm1652_vm7, %v1793_v18, %v1792_v26  ;;  %v1657_v38 = vrot.slane %v1638_v12, 1  ;;  %v1886_v42 = vrot.slane %v1634_v61, 7 }
 0x164   : > { %v1650_v33 = vsel %vm1649_vm6, %v1648_v25, %v1647_v29  ;;  %v1796_v36 = vsel %vm1655_vm8, %v1795_v23, %v1794_v32  ;;  %v1884_v41 = vsel %vm1640_vm3, %v1883_v35, %v1882_v3  ;;  %v1888_v45 = vrot.slane %v5540_v62, 6 }
 0x165   : > { %v1653_v37 = vsel %vm1652_vm7, %v1651_v30, %v1650_v33  ;;  %v5558_v39 = vsel %vm1658_vm9, %v1797_v28, %v1796_v36  ;;  %v1885_v44 = vsel %vm1643_vm4, %v1633_v60, %v1884_v41  ;;  %v1979_v46 = vrot.slane %v1631_v59, 3 }
 0x166   : > { %v1656_v40 = vsel %vm1655_vm8, %v1654_v34, %v1653_v37  ;;  %v1887_v47 = vsel %vm1646_vm5, %v1886_v42, %v1885_v44  ;;  %v1890_v48 = vrot.slane %v1636_v7, 5  ;;  %v1980_v49 = vrot.slane %v1632_v1, 2 }
 0x167   : > { %v5563_v43 = vsel %vm1658_vm9, %v1657_v38, %v1656_v40  ;;  %v1982_v50 = vrot.slane %v1633_v60, 1  ;;  %v1889_v51 = vsel %vm1649_vm6, %v1888_v45, %v1887_v47  ;;  %v1892_v52 = vrot.slane %v1637_v5, 4 }
 0x168   : > { %v1891_v53 = vsel %vm1652_vm7, %v1890_v48, %v1889_v51  ;;  %v1894_v54 = vrot.slane %v1638_v12, 3  ;;  %v1981_v55 = vsel %vm1640_vm3, %v1980_v49, %v1979_v46  ;;  %v1985_v58 = vrot.slane %v5540_v62, 7 }
 0x169   : > { %v1893_v56 = vsel %vm1655_vm8, %v1892_v52, %v1891_v53  ;;  %v1983_v57 = vsel %vm1643_vm4, %v1982_v50, %v1981_v55  ;;  %v1987_v60 = vrot.slane %v1636_v7, 6  ;;  %v1989_v1 = vrot.slane %v1637_v5, 5 }
 0x16a   : > { %v5575_v59 = vsel %vm1658_vm9, %v1894_v54, %v1893_v56  ;;  %v1984_v63 = vsel %vm1646_vm5, %v1634_v61, %v1983_v57  ;;  %v1991_v3 = vrot.slane %v1638_v12, 4 }
 0x16b   : > { %v1986_v0 = vsel %vm1649_vm6, %v1985_v58, %v1984_v63 }
 0x16c   : > { %v1988_v2 = vsel %vm1652_vm7, %v1987_v60, %v1986_v0 }
 0x16d   : > { %v1990_v4 = vsel %vm1655_vm8, %v1989_v1, %v1988_v2 }
 0x16e   : > { %v5582_v6 = vsel %vm1658_vm9, %v1991_v3, %v1990_v4 }
 0x1a4   : > { %v4939_v8 = vpop.permute.xlu2 %4938 }
 0x1a5   : > { %v4940_v5 = vunpack.i.l.bf16 %v4939_v8  ;;  %v4941_v7 = vunpack.i.h.bf16 %v4939_v8 }
 0x1a7   : > { %v1359_v10 = vrot.slane %v4940_v5, 4  ;;  %v1361_v12 = vrot.slane %v4941_v7, 4 }
 0x1a9   : > { %v1360_v13 = vsel %vm1223_vm2, %v1359_v10, %v4941_v7  ;;  %v1362_v18 = vsel %vm1223_vm2, %v4940_v5, %v1361_v12 }
 0x1aa   : > { %v1366_v19 = vperm.slane %v1360_v13, %v5511_v20  ;;  %v1370_v23 = vperm.slane %v1362_v18, %v5511_v20 }
 0x1ac   : > { %v5586_v62 = vpop.permute.xlu2 %1212  ;;  %v1385_v29 = vrot.slane %v1366_v19, 4  ;;  %v1397_v34 = vrot.slane %v1370_v23, 4 }
 0x1ad   : > { %v5590_v61 = vpack.i.bf16 %v5584_v9, %v5586_v62 }
 0x1af   : > { %4943 = vrot.lane.b32.xlu2 %v5590_v61, %s5201_s28 }
 0x1c4   : > { %v4934_v14 = vpop.permute.xlu1 %4933 }
 0x1c5   : > { %v4936_v15 = vunpack.i.h.bf16 %v4934_v14  ;;  %v4935_v16 = vunpack.i.l.bf16 %v4934_v14 }
 0x1c7   : > { %v1373_v21 = vrot.slane %v4936_v15, 4  ;;  %v1371_v22 = vrot.slane %v4935_v16, 4 }
 0x1c9   : > { %v1372_v24 = vsel %vm1223_vm2, %v1371_v22, %v4936_v15  ;;  %v1374_v25 = vsel %vm1223_vm2, %v4935_v16, %v1373_v21 }
 0x1ca   : > { %v1378_v26 = vperm.slane %v1372_v24, %v5511_v20  ;;  %v1382_v28 = vperm.slane %v1374_v25, %v5511_v20 }
 0x1cc   : > { %v1383_v30 = vrot.slane %v1378_v26, 4  ;;  %v1395_v32 = vrot.slane %v1382_v28, 4  ;;  %v5602_v33 = vpop.permute.xlu1 %1206  ;;  %v1386_v35 = vsel %vm1223_vm2, %v1378_v26, %v1385_v29  ;;  %v1398_v41 = vsel %vm1223_vm2, %v1382_v28, %v1397_v34 }
 0x1cd   : > { %v5609_v38 = vpack.i.bf16 %v5602_v33, %v5502_v11  ;;  %v1394_v42 = vperm.slane %v1386_v35, %v5516_v27  ;;  %v1406_v45 = vperm.slane %v1398_v41, %v5516_v27 }
 0x1ce   : > { %v1384_v36 = vsel %vm1223_vm2, %v1383_v30, %v1366_v19  ;;  %v1396_v37 = vsel %vm1223_vm2, %v1395_v32, %v1370_v23 }
 0x1cf   : > { %v1390_v40 = vperm.slane %v1384_v36, %v5516_v27  ;;  %v1402_v44 = vperm.slane %v1396_v37, %v5516_v27  ;;  %4948 = vrot.lane.b32.xlu0 %v5609_v38, %s5201_s28  ;;  %v1409_v47 = vrot.slane %v1394_v42, 4  ;;  %v1413_v49 = vrot.slane %v1406_v45, 4 }
 0x1d0   : > { %v1617_v55 = vpack.c.bf16 %v1394_v42, %v1394_v42  ;;  %v1621_v0 = vpack.c.bf16 %v1406_v45, %v1406_v45 }
 0x1d1   : > { %v1407_v46 = vrot.slane %v1390_v40, 4  ;;  %v1411_v48 = vrot.slane %v1402_v44, 4  ;;  %v1615_v50 = vpack.c.bf16 %v1390_v40, %v1390_v40  ;;  %v1410_v52 = vsel %vm1223_vm2, 0.0, %v1409_v47 }
 0x1d2   : > { %v1414_v57 = vsel %vm1223_vm2, 0.0, %v1413_v49  ;;  %v1618_v58 = vpack.c.bf16 %v1410_v52, %v1410_v52  ;;  %v1619_v63 = vpack.c.bf16 %v1402_v44, %v1402_v44  ;;  %v1671_v3 = vunpack.c.l.b16 %v1617_v55 }
 0x1d3   : > { %v1408_v51 = vsel %vm1223_vm2, 0.0, %v1407_v46  ;;  %v1412_v53 = vsel %vm1223_vm2, 0.0, %v1411_v48  ;;  %v5623_v56 = vunpack.c.l.b16 %v1615_v50  ;;  %v1622_v1 = vpack.c.bf16 %v1414_v57, %v1414_v57 }
 0x1d4   : > { %v1616_v54 = vpack.c.bf16 %v1408_v51, %v1408_v51  ;;  %v1620_v60 = vpack.c.bf16 %v1412_v53, %v1412_v53  ;;  %v1672_v8 = vunpack.c.l.b16 %v1618_v58  ;;  %v5627_v5 = vunpack.c.l.b16 %v1619_v63 }
 0x1d5   : > { %v1800_v4 = vrot.slane %v5623_v56, 1  ;;  %v5633_v10 = vunpack.c.l.b16 %v1622_v1  ;;  %v1802_v13 = vrot.slane %v1671_v3, 7  ;;  %v1679_v24 = vrot.slane %v1671_v3, 6 }
 0x1d6   : > { %v1670_v2 = vunpack.c.l.b16 %v1616_v54  ;;  %v5629_v7 = vunpack.c.l.b16 %v1620_v60  ;;  %v1804_v14 = vrot.slane %v1672_v8, 6  ;;  %v1806_v15 = vrot.slane %v5627_v5, 5 }
 0x1d7   : > { %4953 = vrot.lane.b32.xlu0 %v5519_v31, %s5203_s30  ;;  %v5631_v31 = vunpack.c.l.b16 %v1621_v0  ;;  %v1812_v21 = vrot.slane %v5633_v10, 2  ;;  %v1681_v25 = vrot.slane %v1672_v8, 5  ;;  %v1683_v26 = vrot.slane %v5627_v5, 4 }
 0x1d8   : > { %v1801_v12 = vsel %vm1640_vm3, %v1670_v2, %v1800_v4  ;;  %v1808_v16 = vrot.slane %v5629_v7, 4  ;;  %v1677_v22 = vrot.slane %v1670_v2, 7  ;;  %v1685_v30 = vrot.slane %v5629_v7, 3 }
 0x1d9   : > { %v1803_v18 = vsel %vm1643_vm4, %v1802_v13, %v1801_v12  ;;  %v1810_v19 = vrot.slane %v5631_v31, 3  ;;  %v1687_v32 = vrot.slane %v5631_v31, 2  ;;  %v1897_v36 = vrot.slane %v5623_v56, 2 }
 0x1da   : > { %v1805_v23 = vsel %vm1646_vm5, %v1804_v14, %v1803_v18  ;;  %v1678_v29 = vsel %vm1640_vm3, %v1677_v22, %v5623_v56  ;;  %v1898_v37 = vrot.slane %v1670_v2, 1  ;;  %v1689_v42 = vrot.slane %v5633_v10, 1 }
 0x1db   : > { %v1807_v28 = vsel %vm1649_vm6, %v1806_v15, %v1805_v23  ;;  %v1680_v35 = vsel %vm1643_vm4, %v1679_v24, %v1678_v29  ;;  %v1901_v44 = vrot.slane %v1672_v8, 7  ;;  %v1903_v48 = vrot.slane %v5627_v5, 6 }
 0x1dc   : > { %v1809_v34 = vsel %vm1652_vm7, %v1808_v16, %v1807_v28  ;;  %v1682_v41 = vsel %vm1646_vm5, %v1681_v25, %v1680_v35  ;;  %v1899_v47 = vsel %vm1640_vm3, %v1898_v37, %v1897_v36  ;;  %v1905_v52 = vrot.slane %v5629_v7, 5 }
 0x1dd   : > { %v1811_v40 = vsel %vm1655_vm8, %v1810_v19, %v1809_v34  ;;  %v1684_v46 = vsel %vm1649_vm6, %v1683_v26, %v1682_v41  ;;  %v1900_v51 = vsel %vm1643_vm4, %v1671_v3, %v1899_v47  ;;  %v1907_v55 = vrot.slane %v5631_v31, 4 }
 0x1de   : > { %v1813_v45 = vsel %vm1658_vm9, %v1812_v21, %v1811_v40  ;;  %v1686_v50 = vsel %vm1652_vm7, %v1685_v30, %v1684_v46  ;;  %v1902_v54 = vsel %vm1646_vm5, %v1901_v44, %v1900_v51  ;;  %v1994_v57 = vrot.slane %v5623_v56, 3 }
 0x1df   : > { %v1814_v49 = vpack.c.b16 %v1813_v45, %v1813_v45  ;;  %v1688_v53 = vsel %vm1655_vm8, %v1687_v32, %v1686_v50  ;;  %v1904_v60 = vsel %vm1649_vm6, %v1903_v48, %v1902_v54  ;;  %v1995_v0 = vrot.slane %v1670_v2, 2 }
 0x1e0   : > { %v1690_v63 = vsel %vm1658_vm9, %v1689_v42, %v1688_v53  ;;  %v1906_v4 = vsel %vm1652_vm7, %v1905_v52, %v1904_v60  ;;  %v1909_v12 = vrot.slane %v5633_v10, 3  ;;  %v1997_v13 = vrot.slane %v1671_v3, 1 }
 0x1e1   : > { %v1819_v58 = vsel %vm1692_vm10, %v1814_v49, 0  ;;  %v1691_v1 = vpack.c.b16 %v1690_v63, %v1690_v63  ;;  %v1908_v14 = vsel %vm1655_vm8, %v1907_v55, %v1906_v4  ;;  %v1996_v15 = vsel %vm1640_vm3, %v1995_v0, %v1994_v57 }
 0x1e2   : > { %1828 = vmatpush.bf16.xpose.msra.mxu3 %v1819_v58  ;;  %v1910_v16 = vsel %vm1658_vm9, %v1909_v12, %v1908_v14  ;;  %v1998_v18 = vsel %vm1643_vm4, %v1997_v13, %v1996_v15  ;;  %v2000_v19 = vrot.slane %v5627_v5, 7  ;;  %v2002_v22 = vrot.slane %v5629_v7, 6 }
 0x1e3   : > { %v1697_v56 = vsel %vm1692_vm10, %v1691_v1, 0  ;;  %v1911_v2 = vpack.c.b16 %v1910_v16, %v1910_v16  ;;  %v1999_v21 = vsel %vm1646_vm5, %v1672_v8, %v1998_v18  ;;  %v2004_v23 = vrot.slane %v5631_v31, 5 }
 0x1e4   : > { %1706 = vmatpush.bf16.xpose.msra.mxu1 %v1697_v56  ;;  %v2001_v3 = vsel %vm1649_vm6, %v2000_v19, %v1999_v21  ;;  %v2006_v26 = vrot.slane %v5633_v10, 4  ;;  %v1799_v28 = vpack.c.b16 %v5558_v39, %v5558_v39  ;;  %v1660_v31 = vpack.c.b16 %v5563_v43, %v5563_v43 }
 0x1e5   : > { %v1916_v24 = vsel %vm1692_vm10, %v1911_v2, 0  ;;  %v2003_v25 = vsel %vm1652_vm7, %v2002_v22, %v2001_v3  ;;  %v1896_v10 = vpack.c.b16 %v5575_v59, %v5575_v59  ;;  %v1993_v39 = vpack.c.b16 %v5582_v6, %v5582_v6 }
 0x1e6   : > { %1925 = vmatpush.bf16.xpose.msrb.mxu0 %v1916_v24  ;;  %v2005_v5 = vsel %vm1655_vm8, %v2004_v23, %v2003_v25  ;;  %v1291_v30 = vrot.slane %v5584_v9, 4  ;;  %v1279_v32 = vrot.slane %v5586_v62, 4  ;;  %v1293_v35 = vrot.slane %v5602_v33, 4 }
 0x1e7   : > { %v2007_v8 = vsel %vm1658_vm9, %v2006_v26, %v2005_v5  ;;  %v1281_v36 = vrot.slane %v5502_v11, 4 }
 0x1e8   : > { %v2008_v7 = vpack.c.b16 %v2007_v8, %v2007_v8  ;;  %v1292_v43 = vsel %vm1223_vm2, %v1291_v30, %v5602_v33  ;;  %v1280_v59 = vsel %vm1223_vm2, %v1279_v32, %v5502_v11  ;;  %v1294_v6 = vsel %vm1223_vm2, %v5584_v9, %v1293_v35 }
 0x1e9   : > { %4740 = vmatmul.msk.bf16.vlgmr.msra.gmra.mxu3 %vm1692_vm10, %v1799_v28  ;;  %v1298_v34 = vperm.slane %v1292_v43, %v5511_v20  ;;  %v1282_v40 = vsel %vm1223_vm2, %v5586_v62, %v1281_v36  ;;  %v1286_v41 = vperm.slane %v1280_v59, %v5511_v20  ;;  %v1302_v42 = vperm.slane %v1294_v6, %v5511_v20 }
 0x1ea   : > { %v2013_v29 = vsel %vm1692_vm10, %v2008_v7, 0  ;;  %v1290_v33 = vperm.slane %v1282_v40, %v5511_v20 }
 0x1eb   : > { %4738 = vmatmul.msk.bf16.vlgmr.msra.gmra.mxu1 %vm1692_vm10, %v1660_v31  ;;  %2022 = vmatpush.bf16.xpose.msrb.mxu3 %v2013_v29  ;;  %v1303_v37 = vrot.slane %v1298_v34, 4  ;;  %v1305_v45 = vrot.slane %v1286_v41, 4  ;;  %v1315_v47 = vrot.slane %v1302_v42, 4 }
 0x1ec   : > { %v1317_v48 = vrot.slane %v1290_v33, 4 }
 0x1ed   : > { %4742 = vmatmul.msk.bf16.vlgmr.msrb.gmra.mxu0 %vm1692_vm10, %v1896_v10  ;;  %v1304_v44 = vsel %vm1223_vm2, %v1303_v37, %v1286_v41  ;;  %v1306_v11 = vsel %vm1223_vm2, %v1298_v34, %v1305_v45  ;;  %v1316_v50 = vsel %vm1223_vm2, %v1315_v47, %v1290_v33 }
 0x1ee   : > { %v1310_v46 = vperm.slane %v1304_v44, %v5516_v27  ;;  %v1314_v9 = vperm.slane %v1306_v11, %v5516_v27  ;;  %v1318_v49 = vsel %vm1223_vm2, %v1302_v42, %v1317_v48  ;;  %v1322_v53 = vperm.slane %v1316_v50, %v5516_v27 }
 0x1ef   : > { %v1326_v51 = vperm.slane %v1318_v49, %v5516_v27 }
 0x1f0   : > { %v1327_v62 = vrot.slane %v1310_v46, 4  ;;  %v2093_v52 = vpack.c.bf16 %v1310_v46, %v1310_v46  ;;  %v1329_v55 = vrot.slane %v1314_v9, 4  ;;  %v1331_v0 = vrot.slane %v1322_v53, 4 }
 0x1f1   : > { %v1333_v57 = vrot.slane %v1326_v51, 4  ;;  %v2095_v1 = vpack.c.bf16 %v1314_v9, %v1314_v9  ;;  %v2097_v16 = vpack.c.bf16 %v1322_v53, %v1322_v53  ;;  %v2099_v19 = vpack.c.bf16 %v1326_v51, %v1326_v51 }
 0x1f2   : > { %v1328_v54 = vsel %vm1223_vm2, 0.0, %v1327_v62  ;;  %v5723_v63 = vunpack.c.l.b16 %v2093_v52  ;;  %v1330_v60 = vsel %vm1223_vm2, 0.0, %v1329_v55  ;;  %v1332_v15 = vsel %vm1223_vm2, 0.0, %v1331_v0 }
 0x1f3   : > { %v2094_v58 = vpack.c.bf16 %v1328_v54, %v1328_v54  ;;  %v1334_v4 = vsel %vm1223_vm2, 0.0, %v1333_v57  ;;  %v2096_v12 = vpack.c.bf16 %v1330_v60, %v1330_v60  ;;  %v5731_v56 = vunpack.c.l.b16 %v2095_v1 }
 0x1f4   : > { %v2262_v14 = vrot.slane %v5723_v63, 1  ;;  %v2100_v2 = vpack.c.bf16 %v1334_v4, %v1334_v4  ;;  %v2098_v21 = vpack.c.bf16 %v1332_v15, %v1332_v15  ;;  %v5738_v26 = vunpack.c.l.b16 %v2097_v16 }
 0x1f5   : > { %v5727_v13 = vunpack.c.l.b16 %v2094_v58  ;;  %v5733_v22 = vunpack.c.l.b16 %v2096_v12  ;;  %v2264_v23 = vrot.slane %v5731_v56, 7  ;;  %v5740_v28 = vunpack.c.l.b16 %v2099_v19 }
 0x1f6   : > { %v5742_v5 = vunpack.c.l.b16 %v2100_v2  ;;  %v2127_v8 = vrot.slane %v5731_v56, 6  ;;  %v5746_v31 = vunpack.c.l.b16 %v2098_v21  ;;  %v2359_v59 = vrot.slane %v5723_v63, 2 }
 0x1f7   : > { %v2263_v3 = vsel %vm1640_vm3, %v5727_v13, %v2262_v14  ;;  %v2125_v29 = vrot.slane %v5727_v13, 7  ;;  %v2129_v10 = vrot.slane %v5733_v22, 5  ;;  %v2360_v36 = vrot.slane %v5727_v13, 1 }
 0x1f8   : > { %v2265_v7 = vsel %vm1643_vm4, %v2264_v23, %v2263_v3  ;;  %v2268_v6 = vrot.slane %v5738_v26, 5  ;;  %v2456_v45 = vrot.slane %v5723_v63, 3  ;;  %v2270_v49 = vrot.slane %v5746_v31, 4 }
 0x1f9   : > { %4744 = vmatmul.msk.bf16.vlgmr.msrb.gmra.mxu3 %vm1692_vm10, %v1993_v39  ;;  %v2266_v39 = vrot.slane %v5733_v22, 6  ;;  %v2126_v33 = vsel %vm1640_vm3, %v2125_v29, %v5723_v63  ;;  %v5769_v53 = vsel %vm1640_vm3, %v2360_v36, %v2359_v59  ;;  %v2457_v54 = vrot.slane %v5727_v13, 2 }
 0x1fa   : > { %v2459_v55 = vrot.slane %v5731_v56, 1  ;;  %v2272_v57 = vrot.slane %v5740_v28, 3  ;;  %v2128_v15 = vsel %vm1643_vm4, %v2127_v8, %v2126_v33  ;;  %v2131_v19 = vrot.slane %v5738_v26, 4 }
 0x1fb   : > { %v2267_v37 = vsel %vm1646_vm5, %v2266_v39, %v2265_v7  ;;  %v2130_v8 = vsel %vm1646_vm5, %v2129_v10, %v2128_v15 }
 0x1fc   : > { %v2269_v9 = vsel %vm1649_vm6, %v2268_v6, %v2267_v37 }
 0x1fd   : > { %v2271_v14 = vsel %vm1652_vm7, %v2270_v49, %v2269_v9 }
 0x1fe   : > { %v2273_v7 = vsel %vm1655_vm8, %v2272_v57, %v2271_v14  ;;  %v2137_v57 = vrot.slane %v5742_v5, 1 }
 0x209   : > { %v4944_v18 = vpop.permute.xlu2 %4943 }
 0x20a   : > { %v4946_v24 = vunpack.i.h.bf16 %v4944_v18  ;;  %v4945_v25 = vunpack.i.l.bf16 %v4944_v18  ;;  %v2274_v18 = vrot.slane %v5742_v5, 2 }
 0x20c   : > { %v1427_v43 = vrot.slane %v4946_v24, 4  ;;  %v1415_v32 = vrot.slane %v4945_v25, 4 }
 0x241   : > { %v4949_v30 = vpop.permute.xlu0 %4948 }
 0x242   : > { %v4951_v34 = vunpack.i.h.bf16 %v4949_v30  ;;  %v4950_v35 = vunpack.i.l.bf16 %v4949_v30 }
 0x244   : > { %v1428_v40 = vsel %vm1223_vm2, %v1427_v43, %v4951_v34  ;;  %v1429_v41 = vrot.slane %v4951_v34, 4  ;;  %v1416_v42 = vsel %vm1223_vm2, %v1415_v32, %v4950_v35  ;;  %v1417_v44 = vrot.slane %v4950_v35, 4 }
 0x245   : > { %v1434_v46 = vperm.slane %v1428_v40, %v5511_v20  ;;  %v1422_v11 = vperm.slane %v1416_v42, %v5511_v20 }
 0x246   : > { %v1430_v47 = vsel %vm1223_vm2, %v4946_v24, %v1429_v41  ;;  %v1418_v48 = vsel %vm1223_vm2, %v4945_v25, %v1417_v44  ;;  %v2132_v44 = vsel %vm1649_vm6, %v2131_v19, %v2130_v8 }
 0x247   : > { %v1438_v62 = vperm.slane %v1430_v47, %v5511_v20  ;;  %v1439_v50 = vrot.slane %v1434_v46, 4  ;;  %v1426_v51 = vperm.slane %v1418_v48, %v5511_v20  ;;  %v1441_v52 = vrot.slane %v1422_v11, 4 }
 0x248   : > { %v2135_v47 = vrot.slane %v5740_v28, 2 }
 0x249   : > { %v1451_v58 = vrot.slane %v1438_v62, 4  ;;  %v1440_v60 = vsel %vm1223_vm2, %v1439_v50, %v1422_v11  ;;  %v1442_v0 = vsel %vm1223_vm2, %v1434_v46, %v1441_v52  ;;  %v1453_v1 = vrot.slane %v1426_v51, 4 }
 0x24a   : > { %v1446_v4 = vperm.slane %v1440_v60, %v5516_v27  ;;  %v1450_v12 = vperm.slane %v1442_v0, %v5516_v27  ;;  %v2133_v11 = vrot.slane %v5746_v31, 3 }
 0x24b   : > { %v1452_v13 = vsel %vm1223_vm2, %v1451_v58, %v1426_v51  ;;  %v1454_v16 = vsel %vm1223_vm2, %v1438_v62, %v1453_v1  ;;  %v5809_v62 = vsel %vm1658_vm9, %v2274_v18, %v2273_v7  ;;  %v2458_v1 = vsel %vm1640_vm3, %v2457_v54, %v2456_v45 }
 0x24c   : > { %v1458_v2 = vperm.slane %v1452_v13, %v5516_v27  ;;  %v1462_v21 = vperm.slane %v1454_v16, %v5516_v27  ;;  %v1463_v3 = vrot.slane %v1446_v4, 4  ;;  %v1465_v23 = vrot.slane %v1450_v12, 4 }
 0x24d   : > { %v2101_v24 = vpack.c.bf16 %v1446_v4, %v1446_v4  ;;  %v2103_v25 = vpack.c.bf16 %v1450_v12, %v1450_v12  ;;  %v2134_v52 = vsel %vm1652_vm7, %v2133_v11, %v2132_v44 }
 0x24e   : > { %v1464_v29 = vsel %vm1223_vm2, 0.0, %v1463_v3  ;;  %v1466_v39 = vsel %vm1223_vm2, 0.0, %v1465_v23  ;;  %v1467_v30 = vrot.slane %v1458_v2, 4  ;;  %v1469_v43 = vrot.slane %v1462_v21, 4 }
 0x24f   : > { %v2102_v32 = vpack.c.bf16 %v1464_v29, %v1464_v29  ;;  %v2104_v34 = vpack.c.bf16 %v1466_v39, %v1466_v39  ;;  %v2105_v35 = vpack.c.bf16 %v1458_v2, %v1458_v2  ;;  %v2107_v59 = vpack.c.bf16 %v1462_v21, %v1462_v21 }
 0x250   : > { %v1468_v36 = vsel %vm1223_vm2, 0.0, %v1467_v30  ;;  %v1470_v37 = vsel %vm1223_vm2, 0.0, %v1469_v43  ;;  %v5792_v6 = vunpack.c.l.b16 %v2101_v24  ;;  %v5794_v40 = vunpack.c.l.b16 %v2103_v25 }
 0x251   : > { %v2106_v41 = vpack.c.bf16 %v1468_v36, %v1468_v36  ;;  %v2149_v10 = vunpack.c.l.b16 %v2102_v32  ;;  %v5796_v42 = vunpack.c.l.b16 %v2104_v34  ;;  %v5799_v33 = vunpack.c.l.b16 %v2105_v35 }
 0x252   : > { %v2277_v46 = vrot.slane %v5792_v6, 1  ;;  %v5806_v9 = vunpack.c.l.b16 %v2107_v59  ;;  %v2108_v49 = vpack.c.bf16 %v1470_v37, %v1470_v37  ;;  %v2279_v51 = vrot.slane %v5794_v40, 7 }
 0x253   : > { %v5804_v48 = vunpack.c.l.b16 %v2106_v41  ;;  %v2281_v60 = vrot.slane %v5796_v42, 6  ;;  %v2374_v4 = vrot.slane %v5792_v6, 2  ;;  %v2471_v12 = vrot.slane %v5792_v6, 3 }
 0x254   : > { %v2278_v50 = vsel %vm1640_vm3, %v2149_v10, %v2277_v46  ;;  %v5815_v58 = vunpack.c.l.b16 %v2108_v49  ;;  %v2283_v15 = vrot.slane %v5799_v33, 5  ;;  %v2287_v16 = vrot.slane %v5806_v9, 3 }
 0x255   : > { %v2285_v0 = vrot.slane %v5804_v48, 4  ;;  %v2280_v14 = vsel %vm1643_vm4, %v2279_v51, %v2278_v50  ;;  %v2156_v19 = vrot.slane %v2149_v10, 7  ;;  %v2158_v63 = vrot.slane %v5794_v40, 6 }
 0x256   : > { %v2282_v13 = vsel %vm1646_vm5, %v2281_v60, %v2280_v14  ;;  %v2289_v18 = vrot.slane %v5815_v58, 2  ;;  %v2160_v45 = vrot.slane %v5796_v42, 5  ;;  %v2162_v54 = vrot.slane %v5799_v33, 4 }
 0x257   : > { %v2284_v2 = vsel %vm1649_vm6, %v2283_v15, %v2282_v13  ;;  %v2157_v3 = vsel %vm1640_vm3, %v2156_v19, %v5792_v6  ;;  %v2164_v23 = vrot.slane %v5804_v48, 3  ;;  %v2166_v24 = vrot.slane %v5806_v9, 2 }
 0x258   : > { %v2286_v21 = vsel %vm1652_vm7, %v2285_v0, %v2284_v2  ;;  %v2159_v7 = vsel %vm1643_vm4, %v2158_v63, %v2157_v3  ;;  %v2168_v8 = vrot.slane %v5815_v58, 1  ;;  %v2472_v29 = vrot.slane %v2149_v10, 2 }
 0x259   : > { %v2288_v25 = vsel %vm1655_vm8, %v2287_v16, %v2286_v21  ;;  %v2161_v30 = vsel %vm1646_vm5, %v2160_v45, %v2159_v7  ;;  %v2474_v43 = vrot.slane %v5794_v40, 1  ;;  %v2477_v32 = vrot.slane %v5799_v33, 7 }
 0x25a   : > { %v2290_v39 = vsel %vm1658_vm9, %v2289_v18, %v2288_v25  ;;  %v2163_v35 = vsel %vm1649_vm6, %v2162_v54, %v2161_v30  ;;  %v2473_v59 = vsel %vm1640_vm3, %v2472_v29, %v2471_v12  ;;  %v2479_v36 = vrot.slane %v5804_v48, 6 }
 0x25b   : > { %v2291_v34 = vpack.c.b16 %v2290_v39, %v2290_v39  ;;  %v2165_v37 = vsel %vm1652_vm7, %v2164_v23, %v2163_v35  ;;  %v2475_v6 = vsel %vm1643_vm4, %v2474_v43, %v2473_v59  ;;  %v2481_v41 = vrot.slane %v5806_v9, 5 }
 0x25c   : > { %v2375_v44 = vrot.slane %v2149_v10, 1  ;;  %v2167_v11 = vsel %vm1655_vm8, %v2166_v24, %v2165_v37  ;;  %v2476_v49 = vsel %vm1646_vm5, %v5796_v42, %v2475_v6  ;;  %v2483_v50 = vrot.slane %v5815_v58, 4 }
 0x25d   : > { %v2296_v46 = vsel %vm1692_vm10, %v2291_v34, 0  ;;  %v2169_v51 = vsel %vm1658_vm9, %v2168_v8, %v2167_v11  ;;  %v2478_v60 = vsel %vm1649_vm6, %v2477_v32, %v2476_v49  ;;  %v2378_v12 = vrot.slane %v5796_v42, 7  ;;  %v5023_v34 = vld [vmem:[%s7235_s27] ss:$0 sm:$0xff]  ;;  %s7239_s27 = sld [smem:[#allocation17_spill]] }
 0x25e   : > { %2305 = vmatpush.bf16.xpose.msra.mxu3 %v2296_v46  ;;  %v2376_v0 = vsel %vm1640_vm3, %v2375_v44, %v2374_v4  ;;  %v2170_v14 = vpack.c.b16 %v2169_v51, %v2169_v51  ;;  %v2480_v10 = vsel %vm1652_vm7, %v2479_v36, %v2478_v60  ;;  %v2380_v13 = vrot.slane %v5799_v33, 6 }
 0x25f   : > { %v2377_v15 = vsel %vm1643_vm4, %v5794_v40, %v2376_v0  ;;  %v2482_v16 = vsel %vm1655_vm8, %v2481_v41, %v2480_v10  ;;  %v2382_v19 = vrot.slane %v5804_v48, 5  ;;  %v2136_v2 = vsel %vm1655_vm8, %v2135_v47, %v2134_v52 }
 0x260   : > { %v2379_v18 = vsel %vm1646_vm5, %v2378_v12, %v2377_v15  ;;  %v2175_v4 = vsel %vm1692_vm10, %v2170_v14, 0  ;;  %v2484_v42 = vsel %vm1658_vm9, %v2483_v50, %v2482_v16  ;;  %v2384_v45 = vrot.slane %v5806_v9, 4 }
 0x261   : > { %v2381_v63 = vsel %vm1649_vm6, %v2380_v13, %v2379_v18  ;;  %2184 = vmatpush.bf16.xpose.msra.mxu0 %v2175_v4  ;;  %v2485_v40 = vpack.c.b16 %v2484_v42, %v2484_v42  ;;  %v2386_v54 = vrot.slane %v5815_v58, 3  ;;  %v2460_v48 = vsel %vm1643_vm4, %v2459_v55, %v2458_v1 }
 0x262   : > { %v2383_v33 = vsel %vm1652_vm7, %v2382_v19, %v2381_v63  ;;  %v1142_v52 = vlaneseq  ;;  %v2276_v9 = vpack.c.b16 %v5809_v62, %v5809_v62  ;;  %v2138_v23 = vsel %vm1658_vm9, %v2137_v57, %v2136_v2 }
 0x263   : > { %v2385_v47 = vsel %vm1655_vm8, %v2384_v45, %v2383_v33  ;;  %v2490_v21 = vsel %vm1692_vm10, %v2485_v40, 0  ;;  %v2362_v58 = vsel %vm1643_vm4, %v5731_v56, %v5769_v53  ;;  %v2461_v1 = vsel %vm1646_vm5, %v5733_v22, %v2460_v48  ;;  %s7240_s1 = smov %s7239_s27 }
 0x264   : > { %v2387_v3 = vsel %vm1658_vm9, %v2386_v54, %v2385_v47  ;;  %v2363_v24 = vrot.slane %v5733_v22, 7  ;;  %v2462_v25 = vrot.slane %v5738_v26, 7  ;;  %v2139_v7 = vpack.c.b16 %v2138_v23, %v2138_v23  ;;  %v5024_v54 = vld [vmem:[%s7236_s13 + $0x1] ss:$0 sm:$0xff] }
 0x265   : > { %v2388_v55 = vpack.c.b16 %v2387_v3, %v2387_v3  ;;  %4748 = vmatmul.msk.bf16.vlgmr.msra.gmra.mxu3 %vm1692_vm10, %v2276_v9  ;;  %v1143_v8 = vshrl.u32 %v1142_v52, 7  ;;  %v1145_v57 = vand.u32 127, %v1142_v52  ;;  %v2464_v53 = vrot.slane %v5746_v31, 6 }
 0x266   : > { %2499 = vmatpush.bf16.xpose.msrb.mxu3 %v2490_v21  ;;  %v2463_v29 = vsel %vm1649_vm6, %v2462_v25, %v2461_v1  ;;  %v2364_v56 = vsel %vm1646_vm5, %v2363_v24, %v2362_v58  ;;  %v2365_v22 = vrot.slane %v5738_v26, 6  ;;  %v2466_v43 = vrot.slane %v5740_v28, 5  ;;  %v4954_v21 = vpop.permute.xlu0 %4953 }
 0x267   : > { %v2393_v62 = vsel %vm1692_vm10, %v2388_v55, 0  ;;  %vm1146_vm11 = vcmp.gt.s32.totalorder %v1145_v57, %v1143_v8  ;;  %v2465_v39 = vsel %vm1652_vm7, %v2464_v53, %v2463_v29  ;;  %v2367_v32 = vrot.slane %v5746_v31, 5 }
 0x268   : > { %4746 = vmatmul.msk.bf16.vlgmr.msra.gmra.mxu0 %vm1692_vm10, %v2139_v7  ;;  %v2366_v30 = vsel %vm1649_vm6, %v2365_v22, %v2364_v56  ;;  %v5204_v35 = vmov 0.0   ;;  %v2467_v36 = vsel %vm1655_vm8, %v2466_v43, %v2465_v39  ;;  %v2468_v26 = vrot.slane %v5742_v5, 4  ;;  %v1708_v31 = vpop.f32.mrf.mxu1 }
 0x269   : > { %2402 = vmatpush.bf16.xpose.msrb.mxu0 %v2393_v62  ;;  %v1147_v59 = vsel %vm1146_vm11, -1e+30, %v5204_v35  ;;  %v2368_v37 = vsel %vm1652_vm7, %v2367_v32, %v2366_v30  ;;  %v2369_v6 = vrot.slane %v5740_v28, 4  ;;  %v2371_v11 = vrot.slane %v5742_v5, 3 }
 0x26a   : > { %v1156_v41 = vadd.f32 %v5023_v34, %v1147_v59  ;;  %v2469_v44 = vsel %vm1658_vm9, %v2468_v26, %v2467_v36  ;;  %v1712_v49 = vmul.f32 0.35355338, %v1708_v31  ;;  %v1927_v60 = vpop.f32.mrf.mxu0  ;;  %v1157_v48 = vadd.f32 %v5024_v54, %v1147_v59 }
 0x26b   : > { %v2370_v46 = vsel %vm1655_vm8, %v2369_v6, %v2368_v37  ;;  %v2470_v50 = vpack.c.b16 %v2469_v44, %v2469_v44  ;;  %v1931_v10 = vmul.f32 0.35355338, %v1927_v60  ;;  %v4955_v23 = vunpack.i.l.bf16 %v4954_v21 }
 0x26c   : > { %v2372_v51 = vsel %vm1658_vm9, %v2371_v11, %v2370_v46  ;;  %v1830_v0 = vpop.f32.mrf.mxu3  ;;  %v1713_v12 = vadd.f32 %v1712_v49, %v1156_v41 }
 0x26d   : > { %v1834_v14 = vmul.f32 0.35355338, %v1830_v0  ;;  %v2373_v15 = vpack.c.b16 %v2372_v51, %v2372_v51  ;;  %v5918_v18 = vadd.f32 %v1931_v10, %v1156_v41  ;;  %v1507_v8 = vrot.slane %v4955_v23, 4 }
 0x26e   : > { %v1714_v28 = vsel %vm1692_vm10, %v1713_v12, -inf }
 0x26f   : > { %1715 = vmax.xlane.f32.xlu1 %v1714_v28  ;;  %v1835_v13 = vadd.f32 %v1834_v14, %v1156_v41  ;;  %v1933_v4 = vsel %vm1692_vm10, %v5918_v18, -inf }
 0x270   : > { %v1710_v16 = vpop.f32.mrf.mxu1 }
 0x271   : > { %v1836_v5 = vsel %vm1692_vm10, %v1835_v13, -inf }
 0x272   : > { %1837 = vmax.xlane.f32.xlu2 %v1836_v5  ;;  %v1929_v19 = vpop.f32.mrf.mxu0 }
 0x274   : > { %v1832_v2 = vpop.f32.mrf.mxu3 }
 0x275   : > { %4752 = vmatmul.msk.bf16.vlgmr.msrb.gmra.mxu3 %vm1692_vm10, %v2470_v50 }
 0x277   : > { %1934 = vmax.xlane.f32.xlu1 %v1933_v4 }
 0x278   : > { %4750 = vmatmul.msk.bf16.vlgmr.msrb.gmra.mxu0 %vm1692_vm10, %v2373_v15 }
 0x27c   : > { %v2024_v42 = vpop.f32.mrf.mxu3 }
 0x27d   : > { %v2028_v63 = vmul.f32 0.35355338, %v2024_v42 }
 0x27f   : > { %v5922_v45 = vadd.f32 %v2028_v63, %v1156_v41 }
 0x281   : > { %v2030_v40 = vsel %vm1692_vm10, %v5922_v45, -inf }
 0x282   : > { %2031 = vmax.xlane.f32.xlu0 %v2030_v40 }
 0x284   : > { %v2026_v33 = vpop.f32.mrf.mxu3 }
 0x28a   : > { %4958 = vrot.lane.b32.xlu2 %v5506_v17, %s5203_s30  ;;  %v4956_v17 = vunpack.i.h.bf16 %v4954_v21 }
 0x28c   : > { %v1509_v56 = vrot.slane %v4956_v17, 4  ;;  %v1508_v39 = vsel %vm1223_vm2, %v1507_v8, %v4956_v17 }
 0x28d   : > { %v1514_v34 = vperm.slane %v1508_v39, %v5511_v20 }
 0x28e   : > { %v1510_v43 = vsel %vm1223_vm2, %v4955_v23, %v1509_v56 }
 0x28f   : > { %v1518_v41 = vperm.slane %v1510_v43, %v5511_v20  ;;  %v1519_v50 = vrot.slane %v1514_v34, 4 }
 0x291   : > { %v1531_v14 = vrot.slane %v1518_v41, 4 }
 0x2e2   : > { %v1716_v58 = vpop.xlane.xlu1 %1715 }
 0x2e3   : > { %v1717_v24 = vsub.f32 %v1713_v12, %v1716_v58 }
 0x2e5   : > { %v2186_v47 = vpop.f32.mrf.mxu0  ;;  %v1718_v25 = vmul.f32 1.442695, %v1717_v24  ;;  %v1838_v62 = vpop.xlane.xlu2 %1837 }
 0x2e6   : > { %v2190_v52 = vmul.f32 0.35355338, %v2186_v47  ;;  %v1839_v57 = vsub.f32 %v1835_v13, %v1838_v62 }
 0x2e7   : > { %5037 = vpow2.f32 %v1718_v25 }
 0x2e8   : > { %v2307_v3 = vpop.f32.mrf.mxu3  ;;  %v5931_v9 = vadd.f32 %v2190_v52, %v1157_v48  ;;  %v1840_v22 = vmul.f32 1.442695, %v1839_v57 }
 0x2e9   : > { %v2311_v55 = vmul.f32 0.35355338, %v2307_v3 }
 0x2ea   : > { %v2192_v1 = vsel %vm1692_vm10, %v5931_v9, -inf  ;;  %5039 = vpow2.f32 %v1840_v22 }
 0x2eb   : > { %2193 = vmax.xlane.f32.xlu1 %v2192_v1  ;;  %v5935_v29 = vadd.f32 %v2311_v55, %v1157_v48 }
 0x2ed   : > { %v2188_v7 = vpop.f32.mrf.mxu0  ;;  %v2313_v30 = vsel %vm1692_vm10, %v5935_v29, -inf  ;;  %v5941_v32 = vpop.eup %5037 }
 0x2ee   : > { %v4959_v35 = vpop.permute.xlu2 %4958  ;;  %v1720_v26 = vsel %vm1692_vm10, %v5941_v32, 0.0 }
 0x2ef   : > { %v4961_v36 = vunpack.i.h.bf16 %v4959_v35  ;;  %v4960_v37 = vunpack.i.l.bf16 %v4959_v35  ;;  %1721 = vadd.xlane.f32.xlu0 %v1720_v26 }
 0x2f0   : > { %v2309_v53 = vpop.f32.mrf.mxu3  ;;  %v5953_v12 = vpop.eup %5039 }
 0x2f1   : > { %v1497_v44 = vrot.slane %v4961_v36, 4  ;;  %v1495_v46 = vrot.slane %v4960_v37, 4  ;;  %v1842_v63 = vsel %vm1692_vm10, %v5953_v12, 0.0 }
 0x2f3   : > { %2314 = vmax.xlane.f32.xlu1 %v2313_v30  ;;  %v1496_v51 = vsel %vm1223_vm2, %v1495_v46, %v4961_v36  ;;  %v1498_v60 = vsel %vm1223_vm2, %v4960_v37, %v1497_v44 }
 0x2f4   : > { %v1502_v10 = vperm.slane %v1496_v51, %v5511_v20  ;;  %v1506_v28 = vperm.slane %v1498_v60, %v5511_v20 }
 0x2f5   : > { %v2404_v59 = vpop.f32.mrf.mxu0 }
 0x2f6   : > { %v2408_v6 = vmul.f32 0.35355338, %v2404_v59  ;;  %v1520_v13 = vsel %vm1223_vm2, %v1519_v50, %v1502_v10  ;;  %v1521_v16 = vrot.slane %v1502_v10, 4  ;;  %v1532_v5 = vsel %vm1223_vm2, %v1531_v14, %v1506_v28 }
 0x2f7   : > { %v1533_v19 = vrot.slane %v1506_v28, 4  ;;  %v1526_v4 = vperm.slane %v1520_v13, %v5516_v27  ;;  %v1538_v42 = vperm.slane %v1532_v5, %v5516_v27  ;;  %1843 = vadd.xlane.f32.xlu0 %v1842_v63 }
 0x2f8   : > { %v2501_v31 = vpop.f32.mrf.mxu3  ;;  %v5947_v11 = vadd.f32 %v2408_v6, %v1157_v48  ;;  %v1522_v33 = vsel %vm1223_vm2, %v1514_v34, %v1521_v16 }
 0x2f9   : > { %v2505_v49 = vmul.f32 0.35355338, %v2501_v31  ;;  %v1534_v54 = vsel %vm1223_vm2, %v1518_v41, %v1533_v19  ;;  %v1543_v52 = vrot.slane %v1526_v4, 4  ;;  %v1547_v21 = vrot.slane %v1538_v42, 4 }
 0x2fa   : > { %v2410_v0 = vsel %vm1692_vm10, %v5947_v11, -inf  ;;  %v1542_v47 = vperm.slane %v1534_v54, %v5516_v27  ;;  %v1726_v23 = vpack.c.bf16 %v1526_v4, %v1526_v4  ;;  %v1730_v58 = vpack.c.bf16 %v1538_v42, %v1538_v42 }
 0x2fb   : > { %2411 = vmax.xlane.f32.xlu1 %v2410_v0  ;;  %v5957_v15 = vadd.f32 %v2505_v49, %v1157_v48  ;;  %v1530_v48 = vperm.slane %v1522_v33, %v5516_v27  ;;  %v1544_v55 = vsel %vm1223_vm2, 0.0, %v1543_v52  ;;  %v1548_v24 = vsel %vm1223_vm2, 0.0, %v1547_v21 }
 0x2fc   : > { %v1549_v17 = vrot.slane %v1542_v47, 4  ;;  %v1727_v25 = vpack.c.bf16 %v1544_v55, %v1544_v55  ;;  %v1731_v7 = vpack.c.bf16 %v1548_v24, %v1548_v24  ;;  %v1732_v8 = vpack.c.bf16 %v1542_v47, %v1542_v47 }
 0x2fd   : > { %v2406_v2 = vpop.f32.mrf.mxu0  ;;  %v2507_v40 = vsel %vm1692_vm10, %v5957_v15, -inf  ;;  %v1545_v1 = vrot.slane %v1530_v48, 4  ;;  %v1728_v62 = vpack.c.bf16 %v1530_v48, %v1530_v48  ;;  %v5974_v56 = vunpack.c.l.b16 %v1726_v23 }
 0x2fe   : > { %2508 = vmax.xlane.f32.xlu2 %v2507_v40  ;;  %v5976_v53 = vunpack.c.l.b16 %v1730_v58  ;;  %v5978_v39 = vunpack.c.l.b16 %v1727_v25  ;;  %v5982_v43 = vunpack.c.l.b16 %v1731_v7  ;;  %v1550_v34 = vsel %vm1223_vm2, 0.0, %v1549_v17 }
 0x2ff   : > { %v1546_v57 = vsel %vm1223_vm2, 0.0, %v1545_v1  ;;  %v5980_v30 = vunpack.c.l.b16 %v1728_v62  ;;  %v5985_v35 = vunpack.c.l.b16 %v1732_v8  ;;  %v1733_v36 = vpack.c.bf16 %v1550_v34, %v1550_v34 }
 0x300   : > { %v2503_v3 = vpop.f32.mrf.mxu3  ;;  %v1729_v22 = vpack.c.bf16 %v1546_v57, %v1546_v57  ;;  %v1750_v37 = vrot.slane %v5978_v39, 7  ;;  %v1756_v26 = vrot.slane %v5976_v53, 4  ;;  %v1758_v41 = vrot.slane %v5982_v43, 3 }
 0x301   : > { %v1752_v6 = vrot.slane %v5980_v30, 6  ;;  %v1945_v44 = vrot.slane %v5974_v56, 2  ;;  %v1946_v46 = vrot.slane %v5978_v39, 1  ;;  %v5993_v31 = vunpack.c.l.b16 %v1733_v36 }
 0x302   : > { %v1745_v59 = vunpack.c.l.b16 %v1729_v22  ;;  %v1751_v49 = vsel %vm1640_vm3, %v1750_v37, %v5974_v56  ;;  %v1760_v0 = vrot.slane %v5985_v35, 2  ;;  %v1951_v10 = vrot.slane %v5976_v53, 6 }
 0x303   : > { %v1753_v60 = vsel %vm1643_vm4, %v1752_v6, %v1751_v49  ;;  %v1947_v14 = vsel %vm1640_vm3, %v1946_v46, %v1945_v44  ;;  %v1762_v13 = vrot.slane %v5993_v31, 1  ;;  %v1953_v5 = vrot.slane %v5982_v43, 5 }
 0x304   : > { %v1754_v50 = vrot.slane %v1745_v59, 5  ;;  %v1949_v51 = vrot.slane %v1745_v59, 7  ;;  %v1948_v16 = vsel %vm1643_vm4, %v5980_v30, %v1947_v14  ;;  %v1955_v4 = vrot.slane %v5985_v35, 4 }
 0x305   : > { %v1848_v42 = vrot.slane %v5974_v56, 1  ;;  %v1850_v33 = vrot.slane %v5980_v30, 7  ;;  %v1852_v54 = vrot.slane %v1745_v59, 6  ;;  %v1957_v52 = vrot.slane %v5993_v31, 3 }
 0x306   : > { %v1755_v28 = vsel %vm1646_vm5, %v1754_v50, %v1753_v60  ;;  %v1950_v2 = vsel %vm1646_vm5, %v1949_v51, %v1948_v16  ;;  %v1854_v55 = vrot.slane %v5976_v53, 5  ;;  %v1856_v25 = vrot.slane %v5982_v43, 4 }
 0x307   : > { %v1757_v19 = vsel %vm1649_vm6, %v1756_v26, %v1755_v28  ;;  %v1952_v40 = vsel %vm1649_vm6, %v1951_v10, %v1950_v2  ;;  %v1849_v21 = vsel %vm1640_vm3, %v5978_v39, %v1848_v42  ;;  %v2042_v62 = vrot.slane %v5974_v56, 3  ;;  %v1935_v28 = vpop.xlane.xlu1 %1934 }
 0x308   : > { %v1759_v63 = vsel %vm1652_vm7, %v1758_v41, %v1757_v19  ;;  %v1954_v47 = vsel %vm1652_vm7, %v1953_v5, %v1952_v40  ;;  %v1851_v58 = vsel %vm1643_vm4, %v1850_v33, %v1849_v21  ;;  %v1858_v57 = vrot.slane %v5985_v35, 3 }
 0x309   : > { %v1761_v48 = vsel %vm1655_vm8, %v1760_v0, %v1759_v63  ;;  %v1956_v23 = vsel %vm1655_vm8, %v1955_v4, %v1954_v47  ;;  %v1853_v17 = vsel %vm1646_vm5, %v1852_v54, %v1851_v58  ;;  %v1860_v36 = vrot.slane %v5993_v31, 2 }
 0x30a   : > { %v1763_v3 = vsel %vm1658_vm9, %v1762_v13, %v1761_v48  ;;  %v1958_v24 = vsel %vm1658_vm9, %v1957_v52, %v1956_v23  ;;  %v1855_v8 = vsel %vm1649_vm6, %v1854_v55, %v1853_v17  ;;  %v2043_v37 = vrot.slane %v5978_v39, 2 }
 0x30b   : > { %v1764_v1 = vpack.c.b16 %v1763_v3, %v1763_v3  ;;  %v1959_v7 = vpack.c.b16 %v1958_v24, %v1958_v24  ;;  %v1857_v34 = vsel %vm1652_vm7, %v1856_v25, %v1855_v8  ;;  %4963 = vrot.lane.b32.xlu0 %v5590_v61, %s5203_s30  ;;  %v2045_v6 = vrot.slane %v5980_v30, 1 }
 0x30c   : > { %v1859_v56 = vsel %vm1655_vm8, %v1858_v57, %v1857_v34  ;;  %v2044_v44 = vsel %vm1640_vm3, %v2043_v37, %v2042_v62  ;;  %v2048_v61 = vrot.slane %v5976_v53, 7  ;;  %v2050_v50 = vrot.slane %v5982_v43, 6  ;;  %v2032_v53 = vpop.xlane.xlu0 %2031 }
 0x30d   : > { %v1770_v22 = vsel %vm7176_vm12, %v1764_v1, 0  ;;  %v1964_v26 = vsel %vm7176_vm12, %v1959_v7, 0  ;;  %v1861_v41 = vsel %vm1658_vm9, %v1860_v36, %v1859_v56  ;;  %v2046_v39 = vsel %vm1643_vm4, %v2045_v6, %v2044_v44 }
 0x30e   : > { %1779 = vmatpush.bf16.msra.mxu2 %v1770_v22  ;;  %1973 = vmatpush.bf16.msrb.mxu1 %v1964_v26  ;;  %v1862_v46 = vpack.c.b16 %v1861_v41, %v1861_v41  ;;  %v2047_v49 = vsel %vm1646_vm5, %v1745_v59, %v2046_v39  ;;  %v2052_v60 = vrot.slane %v5985_v35, 5  ;;  %v2054_v0 = vrot.slane %v5993_v31, 4 }
 0x30f   : > { %v2049_v30 = vsel %vm1649_vm6, %v2048_v61, %v2047_v49  ;;  %v2033_v59 = vsub.f32 %v5922_v45, %v2032_v53  ;;  %v1936_v43 = vsub.f32 %v5918_v18, %v1935_v28 }
 0x310   : > { %v1867_v51 = vsel %vm7176_vm12, %v1862_v46, 0 }
 0x311   : > { %v2034_v13 = vmul.f32 1.442695, %v2033_v59  ;;  %v1937_v16 = vmul.f32 1.442695, %v1936_v43 }
 0x312   : > { %1876 = vmatpush.bf16.msrb.mxu2 %v1867_v51 }
 0x313   : > { %5041 = vpow2.f32 %v2034_v13 }
 0x314   : > { %4968 = vrot.lane.b32.xlu1 %v5609_v38, %s5203_s30  ;;  %v2051_v38 = vsel %vm1652_vm7, %v2050_v50, %v2049_v30  ;;  %5043 = vpow2.f32 %v1937_v16  ;;  %s7238_s30 = scalar_lea.vmem %s7237_s29, %s5395_s0  ;;  %s7241_s29 = scalar_lea.vmem %s7144_s12, %s5395_s0 }
 0x315   : > { %v2053_v14 = vsel %vm1655_vm8, %v2052_v60, %v2051_v38 }
 0x316   : > { %v2055_v10 = vsel %vm1658_vm9, %v2054_v0, %v2053_v14 }
 0x317   : > { %v2056_v47 = vpack.c.b16 %v2055_v10, %v2055_v10 }
 0x319   : > { %v6054_v35 = vpop.eup %5041  ;;  %v2061_v58 = vsel %vm7176_vm12, %v2056_v47, 0 }
 0x31a   : > { %v6056_v5 = vpop.eup %5043  ;;  %v2036_v31 = vsel %vm1692_vm10, %v6054_v35, 0.0 }
 0x31b   : > { %v1939_v19 = vsel %vm1692_vm10, %v6056_v5, 0.0 }
 0x335   : > { %2037 = vadd.xlane.f32.xlu0 %v2036_v31 }
 0x33e   : > { %1940 = vadd.xlane.f32.xlu1 %v1939_v19 }
 0x35e   : > { %v2194_v2 = vpop.xlane.xlu1 %2193 }
 0x35f   : > { %v2195_v42 = vsub.f32 %v5931_v9, %v2194_v2 }
 0x361   : > { %v2196_v40 = vmul.f32 1.442695, %v2195_v42 }
 0x362   : > { %v1722_v63 = vpop.xlane.xlu0 %1721 }
 0x363   : > { %5045 = vrcp.f32 %v1722_v63 }
 0x366   : > { %v2315_v45 = vpop.xlane.xlu1 %2314 }
 0x367   : > { %v2316_v18 = vsub.f32 %v5935_v29, %v2315_v45 }
 0x369   : > { %v2317_v4 = vmul.f32 1.442695, %v2316_v18  ;;  %v5046_v33 = vpop.eup %5045 }
 0x36a   : > { %v1724_v48 = vmul.f32 %v5046_v33, %v5941_v32  ;;  %v1844_v3 = vpop.xlane.xlu0 %1843 }
 0x36b   : > { %5047 = vpow2.f32 %v2317_v4 }
 0x36c   : > { %5049 = vpow2.f32 %v2196_v40  ;;  %v1725_v23 = vpack.c.bf16 %v1724_v48, %v1724_v48 }
 0x36d   : > { %5051 = vrcp.f32 %v1844_v3 }
 0x36e   : > { %v2412_v9 = vpop.xlane.xlu1 %2411  ;;  %4739 = vmatmul.msk.bf16.vlgmr.msra.gmra.mxu2 %vm1692_vm10, %v1725_v23 }
 0x36f   : > { %2070 = vmatpush.bf16.msra.mxu2 %v2061_v58  ;;  %v2413_v32 = vsub.f32 %v5947_v11, %v2412_v9 }
 0x371   : > { %v6064_v54 = vpop.eup %5047  ;;  %v2509_v52 = vpop.xlane.xlu2 %2508  ;;  %v2414_v17 = vmul.f32 1.442695, %v2413_v32 }
 0x372   : > { %v2510_v21 = vsub.f32 %v5957_v15, %v2509_v52  ;;  %v2319_v29 = vsel %vm1692_vm10, %v6064_v54, 0.0  ;;  %v6072_v1 = vpop.eup %5049 }
 0x373   : > { %2320 = vadd.xlane.f32.xlu2 %v2319_v29  ;;  %v2198_v15 = vsel %vm1692_vm10, %v6072_v1, 0.0  ;;  %v5052_v24 = vpop.eup %5051 }
 0x374   : > { %v2511_v55 = vmul.f32 1.442695, %v2510_v21  ;;  %v1846_v62 = vmul.f32 %v5052_v24, %v5953_v12 }
 0x376   : > { %5053 = vpow2.f32 %v2511_v55  ;;  %v1847_v8 = vpack.c.bf16 %v1846_v62, %v1846_v62 }
 0x377   : > { %5055 = vpow2.f32 %v2414_v17 }
 0x37b   : > { %2199 = vadd.xlane.f32.xlu2 %v2198_v15 }
 0x37c   : > { %v6077_v25 = vpop.eup %5053 }
 0x37d   : > { %v2513_v7 = vsel %vm1692_vm10, %v6077_v25, 0.0  ;;  %v4964_v57 = vpop.permute.xlu0 %4963  ;;  %v6083_v36 = vpop.eup %5055 }
 0x37e   : > { %v4966_v22 = vunpack.i.h.bf16 %v4964_v57  ;;  %v4965_v11 = vunpack.i.l.bf16 %v4964_v57  ;;  %4741 = vmatmul.msk.bf16.vlgmr.msrb.gmra.mxu2 %vm1692_vm10, %v1847_v8  ;;  %v2416_v39 = vsel %vm1692_vm10, %v6083_v36, 0.0 }
 0x380   : > { %v1563_v56 = vrot.slane %v4966_v22, 4  ;;  %v1551_v6 = vrot.slane %v4965_v11, 4 }
 0x383   : > { %2514 = vadd.xlane.f32.xlu2 %v2513_v7 }
 0x386   : > { %v4969_v34 = vpop.permute.xlu1 %4968 }
 0x387   : > { %v4971_v37 = vunpack.i.h.bf16 %v4969_v34  ;;  %v4970_v26 = vunpack.i.l.bf16 %v4969_v34 }
 0x389   : > { %v1565_v41 = vrot.slane %v4971_v37, 4  ;;  %v1553_v12 = vrot.slane %v4970_v26, 4  ;;  %v1564_v44 = vsel %vm1223_vm2, %v1563_v56, %v4971_v37  ;;  %v1552_v46 = vsel %vm1223_vm2, %v1551_v6, %v4970_v26 }
 0x38a   : > { %v1570_v49 = vperm.slane %v1564_v44, %v5511_v20  ;;  %v1558_v51 = vperm.slane %v1552_v46, %v5511_v20 }
 0x38b   : > { %v1566_v61 = vsel %vm1223_vm2, %v4966_v22, %v1565_v41  ;;  %v1554_v50 = vsel %vm1223_vm2, %v4965_v11, %v1553_v12  ;;  %2417 = vadd.xlane.f32.xlu2 %v2416_v39 }
 0x38c   : > { %v1574_v30 = vperm.slane %v1566_v61, %v5511_v20  ;;  %v1562_v60 = vperm.slane %v1554_v50, %v5511_v20  ;;  %v1575_v38 = vrot.slane %v1570_v49, 4  ;;  %v1577_v0 = vrot.slane %v1558_v51, 4 }
 0x38e   : > { %v1587_v14 = vrot.slane %v1574_v30, 4  ;;  %v1589_v10 = vrot.slane %v1562_v60, 4  ;;  %v1576_v53 = vsel %vm1223_vm2, %v1575_v38, %v1558_v51  ;;  %v1578_v28 = vsel %vm1223_vm2, %v1570_v49, %v1577_v0 }
 0x38f   : > { %v1582_v59 = vperm.slane %v1576_v53, %v5516_v27  ;;  %v1586_v43 = vperm.slane %v1578_v28, %v5516_v27 }
 0x390   : > { %v1588_v13 = vsel %vm1223_vm2, %v1587_v14, %v1562_v60  ;;  %v1590_v16 = vsel %vm1223_vm2, %v1574_v30, %v1589_v10 }
 0x391   : > { %v1594_v31 = vperm.slane %v1588_v13, %v5516_v27  ;;  %v1598_v19 = vperm.slane %v1590_v16, %v5516_v27  ;;  %v1599_v2 = vrot.slane %v1582_v59, 4  ;;  %v1601_v45 = vrot.slane %v1586_v43, 4 }
 0x392   : > { %v2204_v18 = vpack.c.bf16 %v1582_v59, %v1582_v59  ;;  %v2206_v4 = vpack.c.bf16 %v1586_v43, %v1586_v43 }
 0x393   : > { %v1603_v42 = vrot.slane %v1594_v31, 4  ;;  %v1605_v63 = vrot.slane %v1598_v19, 4  ;;  %v2208_v40 = vpack.c.bf16 %v1594_v31, %v1594_v31  ;;  %v2210_v33 = vpack.c.bf16 %v1598_v19, %v1598_v19 }
 0x394   : > { %v1600_v48 = vsel %vm1223_vm2, 0.0, %v1599_v2  ;;  %v1602_v47 = vsel %vm1223_vm2, 0.0, %v1601_v45  ;;  %v2220_v52 = vunpack.c.l.b16 %v2204_v18  ;;  %v2222_v21 = vunpack.c.l.b16 %v2206_v4 }
 0x395   : > { %v1604_v29 = vsel %vm1223_vm2, 0.0, %v1603_v42  ;;  %v1606_v3 = vsel %vm1223_vm2, 0.0, %v1605_v63  ;;  %v2205_v23 = vpack.c.bf16 %v1600_v48, %v1600_v48  ;;  %v2207_v9 = vpack.c.bf16 %v1602_v47, %v1602_v47 }
 0x396   : > { %v2209_v58 = vpack.c.bf16 %v1604_v29, %v1604_v29  ;;  %v2224_v55 = vunpack.c.l.b16 %v2208_v40  ;;  %v2325_v32 = vrot.slane %v2220_v52, 1  ;;  %v6107_v62 = vunpack.c.l.b16 %v2210_v33 }
 0x397   : > { %v2221_v15 = vunpack.c.l.b16 %v2205_v23  ;;  %v2223_v24 = vunpack.c.l.b16 %v2207_v9  ;;  %v2211_v7 = vpack.c.bf16 %v1606_v3, %v1606_v3  ;;  %v2327_v8 = vrot.slane %v2222_v21, 7 }
 0x398   : > { %v2225_v17 = vunpack.c.l.b16 %v2209_v58  ;;  %v2331_v11 = vrot.slane %v2224_v55, 5  ;;  %v2230_v6 = vrot.slane %v2222_v21, 6  ;;  %v2335_v39 = vrot.slane %v6107_v62, 3 }
 0x399   : > { %v2326_v57 = vsel %vm1640_vm3, %v2221_v15, %v2325_v32  ;;  %v2329_v22 = vrot.slane %v2223_v24, 6  ;;  %v2228_v34 = vrot.slane %v2221_v15, 7  ;;  %v2227_v37 = vunpack.c.l.b16 %v2211_v7 }
 0x39a   : > { %v2328_v26 = vsel %vm1643_vm4, %v2327_v8, %v2326_v57  ;;  %v2333_v56 = vrot.slane %v2225_v17, 4  ;;  %v2232_v44 = vrot.slane %v2223_v24, 5  ;;  %v2234_v49 = vrot.slane %v2224_v55, 4 }
 0x39b   : > { %v2330_v41 = vsel %vm1646_vm5, %v2329_v22, %v2328_v26  ;;  %v2229_v12 = vsel %vm1640_vm3, %v2228_v34, %v2220_v52  ;;  %v2337_v51 = vrot.slane %v2227_v37, 2  ;;  %v2236_v60 = vrot.slane %v2225_v17, 3 }
 0x39c   : > { %v2332_v46 = vsel %vm1649_vm6, %v2331_v11, %v2330_v41  ;;  %v2231_v61 = vsel %vm1643_vm4, %v2230_v6, %v2229_v12  ;;  %v2238_v14 = vrot.slane %v6107_v62, 2  ;;  %v2240_v28 = vrot.slane %v2227_v37, 1 }
 0x39d   : > { %v2334_v50 = vsel %vm1652_vm7, %v2333_v56, %v2332_v46  ;;  %v2233_v30 = vsel %vm1646_vm5, %v2232_v44, %v2231_v61  ;;  %v2520_v59 = vrot.slane %v2221_v15, 2  ;;  %v2519_v16 = vrot.slane %v2220_v52, 3 }
 0x39e   : > { %v2336_v38 = vsel %vm1655_vm8, %v2335_v39, %v2334_v50  ;;  %v2235_v0 = vsel %vm1649_vm6, %v2234_v49, %v2233_v30  ;;  %v2423_v19 = vrot.slane %v2221_v15, 1  ;;  %v2422_v2 = vrot.slane %v2220_v52, 2 }
 0x39f   : > { %v2338_v10 = vsel %vm1658_vm9, %v2337_v51, %v2336_v38  ;;  %v2237_v53 = vsel %vm1652_vm7, %v2236_v60, %v2235_v0  ;;  %v2521_v4 = vsel %vm1640_vm3, %v2520_v59, %v2519_v16  ;;  %v2522_v63 = vrot.slane %v2222_v21, 1 }
 0x3a0   : > { %v2339_v43 = vpack.c.b16 %v2338_v10, %v2338_v10  ;;  %v2239_v13 = vsel %vm1655_vm8, %v2238_v14, %v2237_v53  ;;  %v2424_v40 = vsel %vm1640_vm3, %v2423_v19, %v2422_v2  ;;  %v2426_v47 = vrot.slane %v2223_v24, 7 }
 0x3a1   : > { %v2241_v31 = vsel %vm1658_vm9, %v2240_v28, %v2239_v13  ;;  %v2523_v33 = vsel %vm1643_vm4, %v2522_v63, %v2521_v4  ;;  %v2425_v48 = vsel %vm1643_vm4, %v2222_v21, %v2424_v40  ;;  %v2525_v52 = vrot.slane %v2224_v55, 7 }
 0x3a2   : > { %v2344_v45 = vsel %vm7176_vm12, %v2339_v43, 0  ;;  %v2242_v18 = vpack.c.b16 %v2241_v31, %v2241_v31  ;;  %v2524_v29 = vsel %vm1646_vm5, %v2223_v24, %v2523_v33  ;;  %v2427_v3 = vsel %vm1646_vm5, %v2426_v47, %v2425_v48 }
 0x3a3   : > { %2353 = vmatpush.bf16.msrb.mxu2 %v2344_v45  ;;  %v2428_v23 = vrot.slane %v2224_v55, 6  ;;  %v2526_v9 = vsel %vm1649_vm6, %v2525_v52, %v2524_v29  ;;  %v2527_v58 = vrot.slane %v2225_v17, 6  ;;  %v2430_v15 = vrot.slane %v2225_v17, 5 }
 0x3a4   : > { %v2247_v42 = vsel %vm7176_vm12, %v2242_v18, 0  ;;  %v2529_v57 = vrot.slane %v6107_v62, 5  ;;  %v2432_v24 = vrot.slane %v6107_v62, 4  ;;  %v2531_v11 = vrot.slane %v2227_v37, 4 }
 0x3a5   : > { %2256 = vmatpush.bf16.msra.mxu1 %v2247_v42  ;;  %v2429_v32 = vsel %vm1649_vm6, %v2428_v23, %v2427_v3  ;;  %v2528_v7 = vsel %vm1652_vm7, %v2527_v58, %v2526_v9  ;;  %v2434_v26 = vrot.slane %v2227_v37, 3  ;;  %v4850_v23 = vld [vmem:[%s5408_s26 + $0x8] sm:$0xff]  ;;  %v4849_v9 = vld [vmem:[%s5408_s26] sm:$0xff]  ;;  %s7244_s26 = sld [smem:[#allocation24_spill]] }
 0x3a6   : > { %v2431_v21 = vsel %vm1652_vm7, %v2430_v15, %v2429_v32  ;;  %v2530_v55 = vsel %vm1655_vm8, %v2529_v57, %v2528_v7  ;;  %2593 = vmatpush.bf16.msra.mxu0 %v4850_v23 }
 0x3a7   : > { %v2433_v34 = vsel %vm1655_vm8, %v2432_v24, %v2431_v21  ;;  %v2532_v17 = vsel %vm1658_vm9, %v2531_v11, %v2530_v55 }
 0x3a8   : > { %v2038_v8 = vpop.xlane.xlu0 %2037  ;;  %v2435_v56 = vsel %vm1658_vm9, %v2434_v26, %v2433_v34  ;;  %v2533_v44 = vpack.c.b16 %v2532_v17, %v2532_v17 }
 0x3a9   : > { %5057 = vrcp.f32 %v2038_v8  ;;  %v2436_v39 = vpack.c.b16 %v2435_v56, %v2435_v56 }
 0x3aa   : > { %v2538_v49 = vsel %vm7176_vm12, %v2533_v44, 0  ;;  %2594 = vmatpush.bf16.msra.mxu0 %v4849_v9 }
 0x3ab   : > { %v2441_v37 = vsel %vm7176_vm12, %v2436_v39, 0 }
 0x3af   : > { %v5058_v6 = vpop.eup %5057 }
 0x3b0   : > { %v2040_v12 = vmul.f32 %v5058_v6, %v6054_v35 }
 0x3b1   : > { %v1941_v22 = vpop.xlane.xlu1 %1940 }
 0x3b2   : > { %5059 = vrcp.f32 %v1941_v22  ;;  %v2041_v62 = vpack.c.bf16 %v2040_v12, %v2040_v12 }
 0x3b4   : > { %4745 = vmatmul.msk.bf16.vlgmr.msra.gmra.mxu2 %vm1692_vm10, %v2041_v62 }
 0x3b5   : > { %2547 = vmatpush.bf16.msra.mxu2 %v2538_v49 }
 0x3b8   : > { %v5060_v41 = vpop.eup %5059 }
 0x3b9   : > { %v1943_v46 = vmul.f32 %v5060_v41, %v6056_v5  ;;  %v5025_v41 = vld [vmem:[%s7238_s30] ss:$0 sm:$0xff] }
 0x3bb   : > { %v1944_v61 = vpack.c.bf16 %v1943_v46, %v1943_v46  ;;  %v5115_v46 = vld [vmem:[#allocation2] sm:$0xff] }
 0x3bd   : > { %4743 = vmatmul.msk.bf16.vlgmr.msrb.gmra.mxu1 %vm1692_vm10, %v1944_v61 }
 0x3be   : > { %2450 = vmatpush.bf16.msrb.mxu1 %v2441_v37  ;;  %v5116_v37 = vld [vmem:[#allocation2 + $0x8] sm:$0xff] }
 0x3e6   : > { %v2321_v50 = vpop.xlane.xlu2 %2320 }
 0x3e7   : > { %5061 = vrcp.f32 %v2321_v50 }
 0x3ed   : > { %v5062_v51 = vpop.eup %5061 }
 0x3ee   : > { %v2323_v35 = vmul.f32 %v5062_v51, %v6064_v54  ;;  %v2200_v30 = vpop.xlane.xlu2 %2199 }
 0x3ef   : > { %5063 = vrcp.f32 %v2200_v30 }
 0x3f0   : > { %v2324_v5 = vpack.c.bf16 %v2323_v35, %v2323_v35  ;;  %v5208_v35 = vmov 32.0  }
 0x3f1   : > { %v1781_v10 = vpop.f32.mrf.mxu2 }
 0x3f2   : > { %4749 = vmatmul.msk.bf16.vlgmr.msrb.gmra.mxu2 %vm1692_vm10, %v2324_v5 }
 0x3f5   : > { %v5064_v60 = vpop.eup %5063 }
 0x3f6   : > { %v2202_v38 = vmul.f32 %v5064_v60, %v6072_v1  ;;  %v2515_v0 = vpop.xlane.xlu2 %2514  ;;  %v4854_v60 = vld [vmem:[%s5434_s19 + $0x8] sm:$0xff] }
 0x3f7   : > { %5065 = vrcp.f32 %v2515_v0  ;;  %2736 = vmatpush.bf16.msra.mxu3 %v4854_v60  ;;  %v4853_v0 = vld [vmem:[%s5434_s19] sm:$0xff]  ;;  %s7245_s19 = scalar_lea.vmem %s7244_s26, %s5395_s0 }
 0x3f8   : > { %v2203_v14 = vpack.c.bf16 %v2202_v38, %v2202_v38 }
 0x3f9   : > { %v1783_v43 = vpop.f32.mrf.mxu2 }
 0x3fa   : > { %4747 = vmatmul.msk.bf16.vlgmr.msra.gmra.mxu1 %vm1692_vm10, %v2203_v14  ;;  %v2666_v14 = vld [vmem:[%s7239_s27] sm:$0xff] }
 0x3fb   : > { %2737 = vmatpush.bf16.msra.mxu3 %v4853_v0 }
 0x3fd   : > { %v5066_v53 = vpop.eup %5065 }
 0x3fe   : > { %v2517_v28 = vmul.f32 %v5066_v53, %v6077_v25  ;;  %v2418_v59 = vpop.xlane.xlu2 %2417 }
 0x3ff   : > { %5067 = vrcp.f32 %v2418_v59 }
 0x400   : > { %v2518_v54 = vpack.c.bf16 %v2517_v28, %v2517_v28  ;;  %5069 = vrcp.f32 %v5208_v35 }
 0x401   : > { %v1878_v1 = vpop.f32.mrf.mxu2 }
 0x402   : > { %4753 = vmatmul.msk.bf16.vlgmr.msra.gmra.mxu2 %vm1692_vm10, %v2518_v54 }
 0x405   : > { %v5068_v13 = vpop.eup %5067 }
 0x406   : > { %v2420_v16 = vmul.f32 %v5068_v13, %v6083_v36  ;;  %v5070_v30 = vpop.eup %5069 }
 0x407   : > { %v2612_v5 = vmul.f32 32.0, %v5070_v30  ;;  %vm2616_vm15 = vweird.f32 %v5070_v30 }
 0x408   : > { %v2421_v31 = vpack.c.bf16 %v2420_v16, %v2420_v16 }
 0x409   : > { %v1880_v19 = vpop.f32.mrf.mxu2  ;;  %v2613_v38 = vsub.f32 1.0, %v2612_v5 }
 0x40a   : > { %4751 = vmatmul.msk.bf16.vlgmr.msrb.gmra.mxu1 %vm1692_vm10, %v2421_v31 }
 0x40b   : > { %v2614_v28 = vmul.f32 %v5070_v30, %v2613_v38 }
 0x40d   : > { %v2615_v59 = vadd.f32 %v5070_v30, %v2614_v28 }
 0x40f   : > { %v6185_v54 = vsel %vm2616_vm15, %v5070_v30, %v2615_v59 }
 0x437   : > { %v2072_v45 = vpop.f32.mrf.mxu2 }
 0x43a   : > { %v1975_v2 = vpop.f32.mrf.mxu1 }
 0x43f   : > { %v2074_v4 = vpop.f32.mrf.mxu2 }
 0x442   : > { %v1977_v18 = vpop.f32.mrf.mxu1 }
 0x475   : > { %v2355_v42 = vpop.f32.mrf.mxu2 }
 0x476   : > { %v4972_v25 = vpack.i.bf16 %v2355_v42, %v1878_v1 }
 0x477   : > { %v2258_v63 = vpop.f32.mrf.mxu1 }
 0x478   : > { %4973 = vrot.lane.b32.xlu0 %v4972_v25, %s5205_s23 }
 0x47d   : > { %v2357_v40 = vpop.f32.mrf.mxu2 }
 0x47e   : > { %v4852_v40 = vld [vmem:[%s5425_s24 + $0x8] sm:$0xff] }
 0x47f   : > { %v2260_v33 = vpop.f32.mrf.mxu1  ;;  %2698 = vmatpush.bf16.msra.mxu1 %v4852_v40 }
 0x480   : > { %v6198_v33 = vld [vmem:[%s7241_s29] ss:$0 sm:$0xff] }
 0x485   : > { %v2549_v36 = vpop.f32.mrf.mxu2 }
 0x486   : > { %v4982_v48 = vpack.i.bf16 %v2549_v36, %v2072_v45 }
 0x487   : > { %v2452_v47 = vpop.f32.mrf.mxu1 }
 0x488   : > { %v4977_v29 = vpack.i.bf16 %v2452_v47, %v1975_v2  ;;  %4983 = vrot.lane.b32.xlu1 %v4982_v48, %s5206_s16  ;;  %v4851_v47 = vld [vmem:[%s5425_s24] sm:$0xff]  ;;  %s7246_s24 = scalar_lea.vmem %s7142_s10, %s5395_s0 }
 0x489   : > { %2699 = vmatpush.bf16.msra.mxu1 %v4851_v47 }
 0x48a   : > { %4978 = vrot.lane.b32.xlu2 %v4977_v29, %s5207_s17 }
 0x48d   : > { %v2551_v52 = vpop.f32.mrf.mxu2 }
 0x48f   : > { %v2454_v3 = vpop.f32.mrf.mxu1 }
 0x4e4   : > { %v4979_v7 = vpop.permute.xlu2 %4978 }
 0x4e5   : > { %v4981_v21 = vunpack.i.h.bf16 %v4979_v7  ;;  %v4980_v22 = vunpack.i.l.bf16 %v4979_v7 }
 0x4ea   : > { %v4974_v58 = vpop.permute.xlu0 %4973 }
 0x4eb   : > { %v4976_v32 = vunpack.i.h.bf16 %v4974_v58  ;;  %v4975_v15 = vunpack.i.l.bf16 %v4974_v58 }
 0x4ed   : > { %v2088_v8 = vsel %vm1692_vm10, %v1781_v10, %v4975_v15  ;;  %v2565_v57 = vsel %vm1692_vm10, %v2258_v63, %v4976_v32  ;;  %v2667_v10 = vld [vmem:[%s7240_s1 + $0x8] sm:$0xff] }
 0x4ee   : > { %v2090_v34 = vsel %vm7175_vm13, %v2088_v8, %v4980_v22  ;;  %v2566_v26 = vsel %vm7175_vm13, %v2565_v57, %v4981_v21  ;;  %v2706_v53 = vpack.c.bf16 %v2667_v10, %v2666_v14 }
 0x4f0   : > { %4780 = vmatmul.msk.bf16.vlgmr.msra.gmra.mxu3 %vm1179_vm1, %v2706_v53 }
 0x4fa   : > { %v4984_v24 = vpop.permute.xlu1 %4983 }
 0x4fb   : > { %v4986_v55 = vunpack.i.h.bf16 %v4984_v24  ;;  %v4985_v11 = vunpack.i.l.bf16 %v4984_v24 }
 0x4fd   : > { %v2092_v17 = vsel %vm7174_vm14, %v2090_v34, %v4985_v11  ;;  %v2567_v56 = vsel %vm7174_vm14, %v2566_v26, %v4986_v55  ;;  %v5026_v11 = vld [vmem:[%s7243_s4] ss:$0 sm:$0xff]  ;;  %s7273_s4 = sld [smem:[#allocation30_spill]] }
 0x4fe   : > { %v2568_v6 = vpack.c.bf16 %v2567_v56, %v2092_v17  ;;  %v5027_v56 = vld [vmem:[%s7245_s19] ss:$0 sm:$0xff] }
 0x500   : > { %4762 = vmatmul.msk.bf16.vlgmr.msra.gmra.mxu0 %vm1179_vm1, %v2568_v6 }
 0x503   : > { %s7274_s27 = scalar_lea.vmem %s7273_s4, %s5395_s0 }
 0x573   : > { %v2739_v36 = vpop.f32.mrf.mxu3 }
 0x574   : > { %v6201_v48 = vadd.f32 %v6198_v33, %v2739_v36 }
 0x57d   : > { %v2596_v12 = vpop.f32.mrf.mxu0 }
 0x57e   : > { %v2597_v44 = vadd.f32 %v5025_v41, %v2596_v12 }
 0x580   : > { %v2601_v39 = vadd.f32 %v5115_v46, %v2597_v44 }
 0x582   : > { %v2605_v62 = vsel %vm1179_vm1, %v2601_v39, 0.0 }
 0x583   : > { %2606 = vadd.xlane.f32.xlu0 %v2605_v62 }
 0x585   : > { %v2598_v61 = vpop.f32.mrf.mxu0 }
 0x586   : > { %v2599_v49 = vadd.f32 %v5025_v41, %v2598_v61 }
 0x588   : > { %v2602_v50 = vadd.f32 %v5116_v37, %v2599_v49  ;;  %v2903_v49 = vrot.slane %v6201_v48, 4 }
 0x58a   : > { %v2608_v51 = vsel %vm1179_vm1, %v2602_v50, 0.0 }
 0x58b   : > { %2609 = vadd.xlane.f32.xlu2 %v2608_v51 }
 0x5a3   : > { %2895 = vrot.lane.b32.xlu2 %v6201_v48, %s5198_s3 }
 0x5f6   : > { %v2607_v43 = vpop.xlane.xlu0 %2606 }
 0x5f7   : > { %v2618_v13 = vmul.f32 %v6185_v54, %v2607_v43 }
 0x5f9   : > { %v2620_v16 = vsub.f32 %v2601_v39, %v2618_v13 }
 0x5fb   : > { %v2622_v31 = vmul.f32 %v2620_v16, %v2620_v16 }
 0x5fd   : > { %v2624_v1 = vsel %vm1179_vm1, %v2622_v31, 0.0 }
 0x5fe   : > { %v2610_v19 = vpop.xlane.xlu2 %2609  ;;  %2625 = vadd.xlane.f32.xlu1 %v2624_v1 }
 0x5ff   : > { %v2619_v2 = vmul.f32 %v6185_v54, %v2610_v19 }
 0x601   : > { %v2621_v45 = vsub.f32 %v2602_v50, %v2619_v2 }
 0x603   : > { %v2623_v18 = vmul.f32 %v2621_v45, %v2621_v45 }
 0x605   : > { %v2627_v4 = vsel %vm1179_vm1, %v2623_v18, 0.0 }
 0x606   : > { %2628 = vadd.xlane.f32.xlu0 %v2627_v4  ;;  %v6228_v62 = vpop.permute.xlu2 %2895 }
 0x607   : > { %v2913_v61 = vrot.slane %v6228_v62, 4 }
 0x617   : > { %2889 = vrot.lane.b32.xlu1 %v6201_v48, %s5197_s2 }
 0x61a   : > { %2883 = vrot.lane.b32.xlu0 %v6201_v48, %s5199_s5 }
 0x671   : > { %v2626_v42 = vpop.xlane.xlu1 %2625 }
 0x672   : > { %v2630_v25 = vmul.f32 %v2626_v42, %v6185_v54 }
 0x674   : > { %v2632_v63 = vadd.f32 1e-05, %v2630_v25 }
 0x676   : > { %5071 = vrsqrt.f32 %v2632_v63  ;;  %vm2640_vm11 = vweird.f32 %v2632_v63 }
 0x679   : > { %v2629_v29 = vpop.xlane.xlu0 %2628 }
 0x67a   : > { %v2631_v52 = vmul.f32 %v2629_v29, %v6185_v54 }
 0x67c   : > { %v5072_v3 = vpop.eup %5071  ;;  %v2633_v23 = vadd.f32 1e-05, %v2631_v52 }
 0x67d   : > { %v2635_v9 = vmul.f32 %v5072_v3, %v2632_v63  ;;  %vm2641_vm0 = vweird.f32 %v5072_v3 }
 0x67e   : > { %5073 = vrsqrt.f32 %v2633_v23  ;;  %vm2642_vm15 = vmor %vm2640_vm11, %vm2641_vm0  ;;  %vm2650_vm13 = vweird.f32 %v2633_v23 }
 0x67f   : > { %v2636_v58 = vmul.f32 %v5072_v3, %v2635_v9 }
 0x681   : > { %v2637_v32 = vmul.f32 0.5, %v2636_v58 }
 0x683   : > { %v2638_v15 = vsub.f32 1.5, %v2637_v32 }
 0x684   : > { %v5074_v7 = vpop.eup %5073 }
 0x685   : > { %v2639_v8 = vmul.f32 %v5072_v3, %v2638_v15  ;;  %v2645_v57 = vmul.f32 %v5074_v7, %v2633_v23  ;;  %vm2651_vm14 = vweird.f32 %v5074_v7 }
 0x686   : > { %vm2652_vm12 = vmor %vm2650_vm13, %vm2651_vm14 }
 0x687   : > { %v2646_v21 = vmul.f32 %v5074_v7, %v2645_v57  ;;  %v2643_v22 = vsel %vm2642_vm15, %v5072_v3, %v2639_v8 }
 0x688   : > { %v2654_v34 = vmul.f32 %v2643_v22, %v2620_v16 }
 0x689   : > { %v2647_v24 = vmul.f32 0.5, %v2646_v21  ;;  %v6232_v37 = vpop.permute.xlu1 %2889 }
 0x68a   : > { %v2659_v6 = vmul.f32 %v5026_v11, %v2654_v34  ;;  %v2901_v51 = vrot.slane %v6232_v37, 4  ;;  %v2904_v35 = vsel %vm1223_vm2, %v6232_v37, %v2903_v49 }
 0x68b   : > { %v2648_v55 = vsub.f32 1.5, %v2647_v24  ;;  %v2912_v5 = vperm.slane %v2904_v35, %v5511_v20 }
 0x68c   : > { %v6221_v44 = vadd.f32 %v5027_v56, %v2659_v6  ;;  %v6234_v50 = vpop.permute.xlu0 %2883  ;;  %v2902_v0 = vsel %vm1223_vm2, %v2901_v51, %v6201_v48 }
 0x68d   : > { %v2649_v26 = vmul.f32 %v5074_v7, %v2648_v55  ;;  %v2914_v30 = vsel %vm1223_vm2, %v2913_v61, %v6234_v50  ;;  %v2915_v60 = vrot.slane %v6234_v50, 4  ;;  %v2908_v14 = vperm.slane %v2902_v0, %v5511_v20 }
 0x68e   : > { %v2920_v38 = vperm.slane %v2914_v30, %v5511_v20  ;;  %v2939_v28 = vrot.slane %v2912_v5, 4 }
 0x68f   : > { %v2653_v17 = vsel %vm2652_vm12, %v5074_v7, %v2649_v26  ;;  %v2916_v10 = vsel %vm1223_vm2, %v6228_v62, %v2915_v60  ;;  %v2927_v43 = vrot.slane %v2908_v14, 4  ;;  %vm7257_vm12 = vcmask 1043456  }
 0x690   : > { %v2655_v41 = vmul.f32 %v2653_v17, %v2621_v45  ;;  %v2925_v53 = vrot.slane %v2920_v38, 4  ;;  %v2924_v59 = vperm.slane %v2916_v10, %v5511_v20  ;;  %vm7258_vm13 = vmmov %vm7257_vm12 }
 0x691   : > { %v2928_v1 = vsel %vm1223_vm2, %v2920_v38, %v2927_v43  ;;  %vm7259_vm14 = vmmov %vm7257_vm12 }
 0x692   : > { %v2660_v12 = vmul.f32 %v5026_v11, %v2655_v41  ;;  %v2926_v13 = vsel %vm1223_vm2, %v2925_v53, %v2908_v14  ;;  %v2937_v31 = vrot.slane %v2924_v59, 4  ;;  %v2936_v19 = vperm.slane %v2928_v1, %v5516_v27  ;;  %vm7260_vm0 = vmmov %vm7257_vm12 }
 0x693   : > { %v2932_v16 = vperm.slane %v2926_v13, %v5516_v27  ;;  %v2940_v45 = vsel %vm1223_vm2, %v2924_v59, %v2939_v28  ;;  %vm7262_vm11 = vmmov %vm7260_vm0 }
 0x694   : > { %v6223_v46 = vadd.f32 %v5027_v56, %v2660_v12  ;;  %v2938_v2 = vsel %vm1223_vm2, %v2937_v31, %v2912_v5  ;;  %v2951_v42 = vrot.slane %v2936_v19, 4  ;;  %v2948_v25 = vperm.slane %v2940_v45, %v5516_v27  ;;  %vm7263_vm15 = vmmov %vm7260_vm0 }
 0x695   : > { %v2949_v18 = vrot.slane %v2932_v16, 4  ;;  %v2944_v4 = vperm.slane %v2938_v2, %v5516_v27  ;;  %v3157_v36 = vpack.c.bf16 %v2932_v16, %v2932_v16  ;;  %v3159_v29 = vpack.c.bf16 %v2936_v19, %v2936_v19 }
 0x696   : > { %v2668_v39 = vpack.c.bf16 %v6223_v46, %v6221_v44  ;;  %v2952_v47 = vsel %vm1223_vm2, 0.0, %v2951_v42  ;;  %v2955_v58 = vrot.slane %v2948_v25, 4  ;;  %v3163_v15 = vpack.c.bf16 %v2948_v25, %v2948_v25 }
 0x697   : > { %v2950_v63 = vsel %vm1223_vm2, 0.0, %v2949_v18  ;;  %v2953_v40 = vrot.slane %v2944_v4, 4  ;;  %v3160_v23 = vpack.c.bf16 %v2952_v47, %v2952_v47  ;;  %v3161_v9 = vpack.c.bf16 %v2944_v4, %v2944_v4 }
 0x698   : > { %4771 = vmatmul.msk.bf16.vlgmr.msra.gmra.mxu1 %vm1179_vm1, %v2668_v39  ;;  %v3158_v3 = vpack.c.bf16 %v2950_v63, %v2950_v63  ;;  %v3204_v7 = vunpack.c.l.b16 %v3157_v36  ;;  %v6261_v8 = vunpack.c.l.b16 %v3159_v29  ;;  %v2956_v24 = vsel %vm1223_vm2, 0.0, %v2955_v58 }
 0x699   : > { %v2954_v52 = vsel %vm1223_vm2, 0.0, %v2953_v40  ;;  %v6263_v21 = vunpack.c.l.b16 %v3160_v23  ;;  %v6265_v22 = vunpack.c.l.b16 %v3161_v9  ;;  %v6270_v11 = vunpack.c.l.b16 %v3163_v15 }
 0x69a   : > { %v3162_v32 = vpack.c.bf16 %v2954_v52, %v2954_v52  ;;  %v3205_v57 = vunpack.c.l.b16 %v3158_v3  ;;  %v3332_v34 = vrot.slane %v3204_v7, 1  ;;  %v3334_v26 = vrot.slane %v6261_v8, 7 }
 0x69b   : > { %v3214_v17 = vrot.slane %v6261_v8, 6  ;;  %v3428_v56 = vrot.slane %v3204_v7, 2  ;;  %v3524_v6 = vrot.slane %v3204_v7, 3  ;;  %v3164_v41 = vpack.c.bf16 %v2956_v24, %v2956_v24 }
 0x69c   : > { %v6268_v55 = vunpack.c.l.b16 %v3162_v32  ;;  %v3212_v12 = vrot.slane %v3205_v57, 7  ;;  %v3216_v39 = vrot.slane %v6263_v21, 5  ;;  %v3218_v61 = vrot.slane %v6265_v22, 4 }
 0x69d   : > { %v3222_v51 = vrot.slane %v6270_v11, 2  ;;  %v3333_v35 = vsel %vm1640_vm3, %v3205_v57, %v3332_v34  ;;  %v3336_v30 = vrot.slane %v6263_v21, 6  ;;  %v3211_v5 = vunpack.c.l.b16 %v3164_v41 }
 0x69e   : > { %v3220_v49 = vrot.slane %v6268_v55, 3  ;;  %v3213_v60 = vsel %vm1640_vm3, %v3212_v12, %v3204_v7  ;;  %v3335_v38 = vsel %vm1643_vm4, %v3334_v26, %v3333_v35  ;;  %v3338_v0 = vrot.slane %v6265_v22, 5 }
 0x69f   : > { %v3215_v14 = vsel %vm1643_vm4, %v3214_v17, %v3213_v60  ;;  %v3337_v10 = vsel %vm1646_vm5, %v3336_v30, %v3335_v38  ;;  %v3340_v53 = vrot.slane %v6268_v55, 4  ;;  %v3342_v28 = vrot.slane %v6270_v11, 3  ;;  %v2741_v38 = vpop.f32.mrf.mxu3 }
 0x6a0   : > { %v3217_v59 = vsel %vm1646_vm5, %v3216_v39, %v3215_v14  ;;  %v3224_v43 = vrot.slane %v3211_v5, 1  ;;  %v3339_v13 = vsel %vm1649_vm6, %v3338_v0, %v3337_v10  ;;  %v3344_v16 = vrot.slane %v3211_v5, 2 }
 0x6a1   : > { %v3219_v31 = vsel %vm1649_vm6, %v3218_v61, %v3217_v59  ;;  %v3341_v1 = vsel %vm1652_vm7, %v3340_v53, %v3339_v13  ;;  %v3429_v19 = vrot.slane %v3205_v57, 1  ;;  %v3432_v2 = vrot.slane %v6263_v21, 7 }
 0x6a2   : > { %v3527_v45 = vrot.slane %v6261_v8, 1  ;;  %v3221_v18 = vsel %vm1652_vm7, %v3220_v49, %v3219_v31  ;;  %v3343_v4 = vsel %vm1655_vm8, %v3342_v28, %v3341_v1  ;;  %v3434_v42 = vrot.slane %v6265_v22, 6 }
 0x6a3   : > { %v3223_v25 = vsel %vm1655_vm8, %v3222_v51, %v3221_v18  ;;  %v3345_v63 = vsel %vm1658_vm9, %v3344_v16, %v3343_v4  ;;  %v3430_v40 = vsel %vm1640_vm3, %v3429_v19, %v3428_v56  ;;  %v3436_v36 = vrot.slane %v6268_v55, 5 }
 0x6a4   : > { %v3225_v47 = vsel %vm1658_vm9, %v3224_v43, %v3223_v25  ;;  %v3346_v29 = vpack.c.b16 %v3345_v63, %v3345_v63  ;;  %v3431_v52 = vsel %vm1643_vm4, %v6261_v8, %v3430_v40  ;;  %v3438_v3 = vrot.slane %v6270_v11, 4 }
 0x6a5   : > { %v3226_v23 = vpack.c.b16 %v3225_v47, %v3225_v47  ;;  %v3433_v9 = vsel %vm1646_vm5, %v3432_v2, %v3431_v52  ;;  %v3440_v58 = vrot.slane %v3211_v5, 3  ;;  %v3525_v32 = vrot.slane %v3205_v57, 2 }
 0x6a6   : > { %v3351_v15 = vsel %vm1692_vm10, %v3346_v29, 0  ;;  %v3435_v7 = vsel %vm1649_vm6, %v3434_v42, %v3433_v9  ;;  %v3530_v24 = vrot.slane %v6265_v22, 7  ;;  %v3532_v17 = vrot.slane %v6268_v55, 6 }
 0x6a7   : > { %v3231_v34 = vsel %vm1692_vm10, %v3226_v23, 0  ;;  %3360 = vmatpush.bf16.xpose.msrb.mxu1 %v3351_v15  ;;  %v3437_v26 = vsel %vm1652_vm7, %v3436_v36, %v3435_v7  ;;  %v3526_v8 = vsel %vm1640_vm3, %v3525_v32, %v3524_v6  ;;  %v3534_v41 = vrot.slane %v6270_v11, 5  ;;  %v5029_v11 = vld [vmem:[%s7246_s24] ss:$0 sm:$0xff] }
 0x6a8   : > { %3240 = vmatpush.bf16.xpose.msrb.mxu2 %v3231_v34  ;;  %v3439_v56 = vsel %vm1655_vm8, %v3438_v3, %v3437_v26  ;;  %v3528_v57 = vsel %vm1643_vm4, %v3527_v45, %v3526_v8  ;;  %v3536_v39 = vrot.slane %v3211_v5, 4  ;;  %v6333_v0 = vadd.f32 %v6198_v33, %v2741_v38 }
 0x6a9   : > { %v3441_v12 = vsel %vm1658_vm9, %v3440_v58, %v3439_v56  ;;  %v3529_v22 = vsel %vm1646_vm5, %v6263_v21, %v3528_v57 }
 0x6aa   : > { %v3442_v61 = vpack.c.b16 %v3441_v12, %v3441_v12  ;;  %v3531_v49 = vsel %vm1649_vm6, %v3530_v24, %v3529_v22 }
 0x6ab   : > { %v3533_v6 = vsel %vm1652_vm7, %v3532_v17, %v3531_v49 }
 0x6ac   : > { %v3447_v55 = vsel %vm1692_vm10, %v3442_v61, 0  ;;  %v3535_v51 = vsel %vm1655_vm8, %v3534_v41, %v3533_v6 }
 0x6ad   : > { %v3537_v35 = vsel %vm1658_vm9, %v3536_v39, %v3535_v51 }
 0x6ae   : > { %v3538_v30 = vpack.c.b16 %v3537_v35, %v3537_v35 }
 0x6b0   : > { %3456 = vmatpush.bf16.xpose.msra.mxu2 %v3447_v55  ;;  %v3543_v5 = vsel %vm1692_vm10, %v3538_v30, 0 }
 0x6b1   : > { %3552 = vmatpush.bf16.xpose.msra.mxu1 %v3543_v5 }
 0x715   : > { %v2701_v21 = vpop.f32.mrf.mxu1 }
 0x716   : > { %v2702_v60 = vadd.f32 %v5029_v11, %v2701_v21 }
 0x718   : > { %2757 = vrot.lane.b32.xlu1 %v2702_v60, %s5197_s2  ;;  %2751 = vrot.lane.b32.xlu2 %v2702_v60, %s5199_s5  ;;  %v2771_v53 = vrot.slane %v2702_v60, 4 }
 0x719   : > { %2763 = vrot.lane.b32.xlu0 %v2702_v60, %s5198_s3 }
 0x71d   : > { %v2703_v14 = vpop.f32.mrf.mxu1 }
 0x71e   : > { %v6341_v10 = vadd.f32 %v5029_v11, %v2703_v14 }
 0x720   : > { %2891 = vrot.lane.b32.xlu1 %v6333_v0, %s5197_s2  ;;  %2885 = vrot.lane.b32.xlu2 %v6333_v0, %s5199_s5 }
 0x721   : > { %2897 = vrot.lane.b32.xlu0 %v6333_v0, %s5198_s3 }
 0x728   : > { %2759 = vrot.lane.b32.xlu1 %v6341_v10, %s5197_s2  ;;  %2753 = vrot.lane.b32.xlu2 %v6341_v10, %s5199_s5 }
 0x729   : > { %2765 = vrot.lane.b32.xlu0 %v6341_v10, %s5198_s3  ;;  %s7269_s3 = sld [smem:[#allocation28_spill]] }
 0x72f   : > { %s7270_s5 = scalar_lea.vmem %s7269_s3, %s5395_s0 }
 0x772   : > { %v2752_v33 = vpop.permute.xlu2 %2751 }
 0x773   : > { %v2783_v28 = vrot.slane %v2752_v33, 4 }
 0x77a   : > { %v6357_v40 = vpop.permute.xlu2 %2885 }
 0x77b   : > { %v2971_v14 = vrot.slane %v6357_v40, 4 }
 0x782   : > { %v6377_v11 = vpop.permute.xlu2 %2753 }
 0x78a   : > { %v2758_v59 = vpop.permute.xlu1 %2757 }
 0x78b   : > { %v2769_v43 = vrot.slane %v2758_v59, 4  ;;  %v2772_v13 = vsel %vm1223_vm2, %v2758_v59, %v2771_v53  ;;  %v2764_v16 = vpop.permute.xlu0 %2763  ;;  %v2827_v53 = vrot.slane %v6341_v10, 4 }
 0x78c   : > { %v2780_v31 = vperm.slane %v2772_v13, %v5511_v20  ;;  %v2781_v1 = vrot.slane %v2764_v16, 4  ;;  %v2784_v19 = vsel %vm1223_vm2, %v2764_v16, %v2783_v28  ;;  %v2839_v28 = vrot.slane %v6377_v11, 4 }
 0x78d   : > { %v2770_v2 = vsel %vm1223_vm2, %v2769_v43, %v2702_v60  ;;  %v2792_v45 = vperm.slane %v2784_v19, %v5511_v20 }
 0x78e   : > { %v2776_v18 = vperm.slane %v2770_v2, %v5511_v20  ;;  %v2807_v4 = vrot.slane %v2780_v31, 4  ;;  %v2782_v42 = vsel %vm1223_vm2, %v2781_v1, %v2752_v33  ;;  %v2959_v33 = vrot.slane %v6333_v0, 4 }
 0x78f   : > { %v2788_v25 = vperm.slane %v2782_v42, %v5511_v20  ;;  %v2805_v63 = vrot.slane %v2792_v45, 4 }
 0x790   : > { %v2795_v36 = vrot.slane %v2776_v18, 4  ;;  %v2808_v47 = vsel %vm1223_vm2, %v2792_v45, %v2807_v4 }
 0x791   : > { %v2793_v29 = vrot.slane %v2788_v25, 4  ;;  %v2806_v52 = vsel %vm1223_vm2, %v2805_v63, %v2780_v31  ;;  %v2816_v3 = vperm.slane %v2808_v47, %v5516_v27 }
 0x792   : > { %v2796_v23 = vsel %vm1223_vm2, %v2788_v25, %v2795_v36  ;;  %v2812_v9 = vperm.slane %v2806_v52, %v5516_v27  ;;  %v6367_v34 = vpop.permute.xlu1 %2891 }
 0x793   : > { %v2794_v58 = vsel %vm1223_vm2, %v2793_v29, %v2776_v18  ;;  %v2804_v32 = vperm.slane %v2796_v23, %v5516_v27  ;;  %v2823_v15 = vrot.slane %v2816_v3, 4  ;;  %v3155_v56 = vpack.c.bf16 %v2816_v3, %v2816_v3  ;;  %v6371_v39 = vpop.permute.xlu0 %2897 }
 0x794   : > { %v2800_v7 = vperm.slane %v2794_v58, %v5516_v27  ;;  %v2821_v24 = vrot.slane %v2812_v9, 4  ;;  %v3153_v17 = vpack.c.bf16 %v2812_v9, %v2812_v9  ;;  %v2957_v38 = vrot.slane %v6367_v34, 4 }
 0x795   : > { %v2819_v26 = vrot.slane %v2804_v32, 4  ;;  %v3151_v8 = vpack.c.bf16 %v2804_v32, %v2804_v32  ;;  %v2824_v12 = vsel %vm1223_vm2, 0.0, %v2823_v15  ;;  %v6383_v5 = vunpack.c.l.b16 %v3155_v56 }
 0x796   : > { %v2817_v57 = vrot.slane %v2800_v7, 4  ;;  %v2822_v41 = vsel %vm1223_vm2, 0.0, %v2821_v24  ;;  %v3149_v22 = vpack.c.bf16 %v2800_v7, %v2800_v7  ;;  %v3156_v55 = vpack.c.bf16 %v2824_v12, %v2824_v12 }
 0x797   : > { %v2820_v61 = vsel %vm1223_vm2, 0.0, %v2819_v26  ;;  %v3154_v6 = vpack.c.bf16 %v2822_v41, %v2822_v41  ;;  %v6375_v51 = vunpack.c.l.b16 %v3151_v8  ;;  %v6381_v21 = vunpack.c.l.b16 %v3153_v17 }
 0x798   : > { %v2818_v49 = vsel %vm1223_vm2, 0.0, %v2817_v57  ;;  %v3152_v35 = vpack.c.bf16 %v2820_v61, %v2820_v61  ;;  %v6379_v30 = vunpack.c.l.b16 %v3149_v22  ;;  %v6392_v43 = vunpack.c.l.b16 %v3156_v55 }
 0x799   : > { %v3150_v60 = vpack.c.bf16 %v2818_v49, %v2818_v49  ;;  %v6390_v59 = vunpack.c.l.b16 %v3154_v6  ;;  %v3183_v13 = vrot.slane %v6375_v51, 6  ;;  %v3187_v31 = vrot.slane %v6381_v21, 4 }
 0x79a   : > { %v6395_v16 = vunpack.c.l.b16 %v3152_v35  ;;  %v3191_v1 = vrot.slane %v6383_v5, 2  ;;  %v3317_v19 = vrot.slane %v6379_v30, 1  ;;  %v2760_v2 = vpop.permute.xlu1 %2759  ;;  %v3319_v18 = vrot.slane %v6375_v51, 7 }
 0x79b   : > { %v6400_v45 = vunpack.c.l.b16 %v3150_v60  ;;  %v2958_v4 = vsel %vm1223_vm2, %v2957_v38, %v6333_v0  ;;  %v2960_v42 = vsel %vm1223_vm2, %v6367_v34, %v2959_v33  ;;  %v3323_v25 = vrot.slane %v6381_v21, 5  ;;  %v2766_v29 = vpop.permute.xlu0 %2765 }
 0x79c   : > { %v2964_v63 = vperm.slane %v2958_v4, %v5511_v20  ;;  %v2968_v36 = vperm.slane %v2960_v42, %v5511_v20  ;;  %v2969_v47 = vrot.slane %v6371_v39, 4  ;;  %v3327_v52 = vrot.slane %v6383_v5, 3 }
 0x79d   : > { %v2972_v3 = vsel %vm1223_vm2, %v6371_v39, %v2971_v14  ;;  %v2825_v9 = vrot.slane %v2760_v2, 4  ;;  %v3413_v24 = vrot.slane %v6379_v30, 2  ;;  %v2837_v17 = vrot.slane %v2766_v29, 4 }
 0x79e   : > { %v2983_v58 = vrot.slane %v2964_v63, 4  ;;  %v2995_v32 = vrot.slane %v2968_v36, 4  ;;  %v2970_v15 = vsel %vm1223_vm2, %v2969_v47, %v6357_v40  ;;  %v2980_v7 = vperm.slane %v2972_v3, %v5511_v20 }
 0x79f   : > { %v2976_v26 = vperm.slane %v2970_v15, %v5511_v20  ;;  %v2826_v8 = vsel %vm1223_vm2, %v2825_v9, %v6341_v10  ;;  %v3185_v56 = vrot.slane %v6395_v16, 5  ;;  %v3321_v57 = vrot.slane %v6395_v16, 6 }
 0x7a0   : > { %v2993_v41 = vrot.slane %v2980_v7, 4  ;;  %v2996_v12 = vsel %vm1223_vm2, %v2980_v7, %v2995_v32  ;;  %v3414_v22 = vrot.slane %v6400_v45, 1  ;;  %v2828_v6 = vsel %vm1223_vm2, %v2760_v2, %v2827_v53 }
 0x7a1   : > { %v2981_v61 = vrot.slane %v2976_v26, 4  ;;  %v2984_v49 = vsel %vm1223_vm2, %v2976_v26, %v2983_v58  ;;  %v3004_v35 = vperm.slane %v2996_v12, %v5516_v27  ;;  %v2832_v10 = vperm.slane %v2826_v8, %v5511_v20 }
 0x7a2   : > { %v2994_v55 = vsel %vm1223_vm2, %v2993_v41, %v2968_v36  ;;  %v2838_v60 = vsel %vm1223_vm2, %v2837_v17, %v6377_v11  ;;  %v3181_v38 = vrot.slane %v6400_v45, 7  ;;  %v3509_v53 = vrot.slane %v6379_v30, 3 }
 0x7a3   : > { %v2982_v4 = vsel %vm1223_vm2, %v2981_v61, %v2964_v63  ;;  %v2992_v2 = vperm.slane %v2984_v49, %v5516_v27  ;;  %v2836_v36 = vperm.slane %v2828_v6, %v5511_v20  ;;  %v3415_v47 = vsel %vm1640_vm3, %v3414_v22, %v3413_v24 }
 0x7a4   : > { %v3510_v11 = vrot.slane %v6400_v45, 2  ;;  %v3000_v3 = vperm.slane %v2994_v55, %v5516_v27  ;;  %v2844_v9 = vperm.slane %v2838_v60, %v5511_v20  ;;  %v2988_v58 = vperm.slane %v2982_v4, %v5516_v27 }
 0x7a5   : > { %v3011_v32 = vrot.slane %v3004_v35, 4  ;;  %v2851_v63 = vrot.slane %v2832_v10, 4  ;;  %v2840_v15 = vsel %vm1223_vm2, %v2766_v29, %v2839_v28  ;;  %v3634_v17 = vpack.c.bf16 %v3004_v35, %v3004_v35 }
 0x7a6   : > { %v6453_v24 = vsel %vm1640_vm3, %v3181_v38, %v6379_v30  ;;  %v6457_v41 = vsel %vm1643_vm4, %v6375_v51, %v3415_v47  ;;  %v3007_v12 = vrot.slane %v2992_v2, 4  ;;  %v2863_v22 = vrot.slane %v2836_v36, 4 }
 0x7a7   : > { %v3009_v61 = vrot.slane %v3000_v3, 4  ;;  %v3630_v49 = vpack.c.bf16 %v2992_v2, %v2992_v2  ;;  %v2848_v28 = vperm.slane %v2840_v15, %v5511_v20  ;;  %v2849_v29 = vrot.slane %v2844_v9, 4 }
 0x7a8   : > { %v3005_v6 = vrot.slane %v2988_v58, 4  ;;  %v3012_v55 = vsel %vm1223_vm2, 0.0, %v3011_v32  ;;  %v3632_v60 = vpack.c.bf16 %v3000_v3, %v3000_v3  ;;  %v2852_v35 = vsel %vm1223_vm2, %v2844_v9, %v2851_v63 }
 0x7a9   : > { %v6462_v4 = vunpack.c.l.b16 %v3634_v17  ;;  %v2850_v38 = vsel %vm1223_vm2, %v2849_v29, %v2832_v10  ;;  %v2860_v47 = vperm.slane %v2852_v35, %v5516_v27  ;;  %v2861_v23 = vrot.slane %v2848_v28, 4 }
 0x7aa   : > { %v3008_v42 = vsel %vm1223_vm2, 0.0, %v3007_v12  ;;  %v3628_v33 = vpack.c.bf16 %v2988_v58, %v2988_v58  ;;  %v2856_v2 = vperm.slane %v2850_v38, %v5516_v27  ;;  %v2864_v15 = vsel %vm1223_vm2, %v2848_v28, %v2863_v22 }
 0x7ab   : > { %v3010_v14 = vsel %vm1223_vm2, 0.0, %v3009_v61  ;;  %v2862_v3 = vsel %vm1223_vm2, %v2861_v23, %v2836_v36  ;;  %v2872_v9 = vperm.slane %v2864_v15, %v5516_v27  ;;  %v2875_v32 = vrot.slane %v2860_v47, 4 }
 0x7ac   : > { %v3006_v63 = vsel %vm1223_vm2, 0.0, %v3005_v6  ;;  %v2868_v10 = vperm.slane %v2862_v3, %v5516_v27  ;;  %v2873_v17 = vrot.slane %v2856_v2, 4  ;;  %v3318_v58 = vsel %vm1640_vm3, %v6400_v45, %v3317_v19 }
 0x7ad   : > { %v2876_v12 = vsel %vm1223_vm2, 0.0, %v2875_v32  ;;  %v2879_v22 = vrot.slane %v2872_v9, 4  ;;  %v3620_v28 = vpack.c.bf16 %v2856_v2, %v2856_v2  ;;  %v3622_v61 = vpack.c.bf16 %v2860_v47, %v2860_v47 }
 0x7ae   : > { %v2874_v23 = vsel %vm1223_vm2, 0.0, %v2873_v17  ;;  %v2877_v36 = vrot.slane %v2868_v10, 4  ;;  %v3623_v29 = vpack.c.bf16 %v2876_v12, %v2876_v12  ;;  %v3624_v35 = vpack.c.bf16 %v2868_v10, %v2868_v10 }
 0x7af   : > { %v3631_v38 = vpack.c.bf16 %v3008_v42, %v3008_v42  ;;  %v3635_v6 = vpack.c.bf16 %v3012_v55, %v3012_v55  ;;  %v6480_v15 = vunpack.c.l.b16 %v3630_v49  ;;  %v3621_v3 = vpack.c.bf16 %v2874_v23, %v2874_v23 }
 0x7b0   : > { %v3629_v8 = vpack.c.bf16 %v3006_v63, %v3006_v63  ;;  %v3633_v26 = vpack.c.bf16 %v3010_v14, %v3010_v14  ;;  %v6482_v7 = vunpack.c.l.b16 %v3632_v60  ;;  %v2878_v19 = vsel %vm1223_vm2, 0.0, %v2877_v36 }
 0x7b1   : > { %v6486_v32 = vsel %vm1223_vm2, 0.0, %v2879_v22  ;;  %v3626_v47 = vpack.c.bf16 %v2872_v9, %v2872_v9  ;;  %v6488_v2 = vunpack.c.l.b16 %v3622_v61  ;;  %v3320_v42 = vsel %vm1643_vm4, %v3319_v18, %v3318_v58 }
 0x7b2   : > { %v3625_v55 = vpack.c.bf16 %v2878_v19, %v2878_v19  ;;  %v6493_v49 = vunpack.c.l.b16 %v3620_v28  ;;  %v6495_v10 = vunpack.c.l.b16 %v3623_v29  ;;  %v6497_v14 = vunpack.c.l.b16 %v3624_v35 }
 0x7b3   : > { %v6499_v60 = vunpack.c.l.b16 %v3628_v33  ;;  %v6501_v63 = vunpack.c.l.b16 %v3631_v38  ;;  %v6503_v17 = vunpack.c.l.b16 %v3635_v6  ;;  %v6505_v9 = vunpack.c.l.b16 %v3621_v3 }
 0x7b4   : > { %v6507_v12 = vunpack.c.l.b16 %v3629_v8  ;;  %v6509_v22 = vunpack.c.l.b16 %v3633_v26  ;;  %v3322_v18 = vsel %vm1646_vm5, %v3321_v57, %v3320_v42  ;;  %v3325_v58 = vrot.slane %v6390_v59, 4 }
 0x7b5   : > { %v6517_v28 = vunpack.c.l.b16 %v3626_v47  ;;  %v3654_v61 = vrot.slane %v6488_v2, 6  ;;  %v3329_v23 = vrot.slane %v6392_v43, 2  ;;  %v6521_v36 = vunpack.c.l.b16 %v3625_v55 }
 0x7b6   : > { %v3788_v29 = vrot.slane %v6493_v49, 1  ;;  %v3652_v57 = vrot.slane %v6505_v9, 7  ;;  %v3790_v35 = vrot.slane %v6488_v2, 7  ;;  %v3792_v38 = vrot.slane %v6495_v10, 6 }
 0x7b7   : > { %v3324_v6 = vsel %vm1649_vm6, %v3323_v25, %v3322_v18  ;;  %v3794_v3 = vrot.slane %v6497_v14, 5  ;;  %v3184_v47 = vsel %vm1643_vm4, %v3183_v13, %v6453_v24  ;;  %v3189_v42 = vrot.slane %v6390_v59, 3 }
 0x7b8   : > { %v3326_v19 = vsel %vm1652_vm7, %v3325_v58, %v3324_v6  ;;  %v3186_v8 = vsel %vm1646_vm5, %v3185_v56, %v3184_v47  ;;  %v3193_v25 = vrot.slane %v6392_v43, 1  ;;  %v3803_v18 = vrot.slane %v6499_v60, 1 }
 0x7b9   : > { %v3328_v55 = vsel %vm1655_vm8, %v3327_v52, %v3326_v19  ;;  %v3188_v13 = vsel %vm1649_vm6, %v3187_v31, %v3186_v8  ;;  %v3805_v24 = vrot.slane %v6480_v15, 7  ;;  %v3807_v6 = vrot.slane %v6501_v63, 6 }
 0x7ba   : > { %v3330_v58 = vsel %vm1658_vm9, %v3329_v23, %v3328_v55  ;;  %v3190_v52 = vsel %vm1652_vm7, %v3189_v42, %v3188_v13  ;;  %v3804_v56 = vsel %vm1640_vm3, %v6507_v12, %v3803_v18  ;;  %v3809_v19 = vrot.slane %v6482_v7, 5 }
 0x7bb   : > { %v3331_v33 = vpack.c.b16 %v3330_v58, %v3330_v58  ;;  %v3192_v23 = vsel %vm1655_vm8, %v3191_v1, %v3190_v52  ;;  %v3806_v47 = vsel %vm1643_vm4, %v3805_v24, %v3804_v56  ;;  %v3811_v31 = vrot.slane %v6509_v22, 4 }
 0x7bc   : > { %v3813_v8 = vrot.slane %v6462_v4, 3  ;;  %v3194_v55 = vsel %vm1658_vm9, %v3193_v25, %v3192_v23  ;;  %v3808_v42 = vsel %vm1646_vm5, %v3807_v6, %v3806_v47  ;;  %v3815_v18 = vrot.slane %v6503_v17, 2 }
 0x7bd   : > { %4783 = vmatmul.msk.bf16.vlgmr.msrb.gmra.mxu1 %vm1692_vm10, %v3331_v33  ;;  %v3683_v58 = vrot.slane %v6507_v12, 7  ;;  %v3195_v13 = vpack.c.b16 %v3194_v55, %v3194_v55  ;;  %v3810_v26 = vsel %vm1649_vm6, %v3809_v19, %v3808_v42  ;;  %v3685_v1 = vrot.slane %v6480_v15, 6 }
 0x7be   : > { %v3687_v24 = vrot.slane %v6501_v63, 5  ;;  %v3812_v52 = vsel %vm1652_vm7, %v3811_v31, %v3810_v26  ;;  %v3689_v25 = vrot.slane %v6482_v7, 4  ;;  %v3691_v6 = vrot.slane %v6509_v22, 3 }
 0x7bf   : > { %v3684_v33 = vsel %vm1640_vm3, %v3683_v58, %v6499_v60  ;;  %4781 = vmatmul.msk.bf16.vlgmr.msrb.gmra.mxu2 %vm1692_vm10, %v3195_v13  ;;  %v3814_v56 = vsel %vm1655_vm8, %v3813_v8, %v3812_v52  ;;  %v3693_v19 = vrot.slane %v6462_v4, 2  ;;  %v3511_v26 = vsel %vm1640_vm3, %v3510_v11, %v3509_v53 }
 0x7c0   : > { %v3686_v23 = vsel %vm1643_vm4, %v3685_v1, %v3684_v33  ;;  %v3816_v47 = vsel %vm1658_vm9, %v3815_v18, %v3814_v56  ;;  %v3695_v55 = vrot.slane %v6503_v17, 1  ;;  %v7247_v42 = vrot.slane %v6375_v51, 1 }
 0x7c1   : > { %v3688_v31 = vsel %vm1646_vm5, %v3687_v24, %v3686_v23  ;;  %v3817_v58 = vpack.c.b16 %v3816_v47, %v3816_v47  ;;  %v3517_v45 = vrot.slane %v6390_v59, 6  ;;  %v7248_v11 = vrot.slane %v6381_v21, 7 }
 0x7c2   : > { %v3513_v8 = vsel %vm1643_vm4, %v7247_v42, %v3511_v26  ;;  %v3690_v13 = vsel %vm1649_vm6, %v3689_v25, %v3688_v31  ;;  %v3995_v1 = vrot.slane %v6499_v60, 3  ;;  %v3996_v51 = vrot.slane %v6507_v12, 2 }
 0x7c3   : > { %v3514_v30 = vsel %vm1646_vm5, %v6395_v16, %v3513_v8  ;;  %v3692_v53 = vsel %vm1652_vm7, %v3691_v6, %v3690_v13  ;;  %v3822_v24 = vsel %vm1692_vm10, %v3817_v58, 0  ;;  %v3998_v25 = vrot.slane %v6480_v15, 1 }
 0x7c4   : > { %v3516_v18 = vsel %vm1649_vm6, %v7248_v11, %v3514_v30  ;;  %v3694_v52 = vsel %vm1655_vm8, %v3693_v19, %v3692_v53  ;;  %3831 = vmatpush.bf16.xpose.msrb.mxu1 %v3822_v24  ;;  %v7249_v6 = vrot.slane %v6383_v5, 5  ;;  %v3521_v26 = vrot.slane %v6392_v43, 4 }
 0x7c5   : > { %v3518_v33 = vsel %vm1652_vm7, %v3517_v45, %v3516_v18  ;;  %v3696_v56 = vsel %vm1658_vm9, %v3695_v55, %v3694_v52  ;;  %v3997_v47 = vsel %vm1640_vm3, %v3996_v51, %v3995_v1  ;;  %v3653_v19 = vsel %vm1640_vm3, %v3652_v57, %v6493_v49 }
 0x7c6   : > { %v3520_v23 = vsel %vm1655_vm8, %v7249_v6, %v3518_v33  ;;  %v3697_v31 = vpack.c.b16 %v3696_v56, %v3696_v56  ;;  %v3999_v42 = vsel %vm1643_vm4, %v3998_v25, %v3997_v47  ;;  %v4001_v8 = vrot.slane %v6482_v7, 7 }
 0x7c7   : > { %v3522_v55 = vsel %vm1658_vm9, %v3521_v26, %v3520_v23  ;;  %v4000_v58 = vsel %vm1646_vm5, %v6501_v63, %v3999_v42  ;;  %v4003_v13 = vrot.slane %v6509_v22, 6  ;;  %v4005_v30 = vrot.slane %v6462_v4, 5 }
 0x7c8   : > { %v3702_v45 = vsel %vm1692_vm10, %v3697_v31, 0  ;;  %v4002_v53 = vsel %vm1649_vm6, %v4001_v8, %v4000_v58  ;;  %v7250_v57 = vrot.slane %v6395_v16, 7  ;;  %v3421_v18 = vrot.slane %v6390_v59, 5 }
 0x7c9   : > { %3711 = vmatpush.bf16.xpose.msrb.mxu2 %v3702_v45  ;;  %v4004_v1 = vsel %vm1652_vm7, %v4003_v13, %v4002_v53  ;;  %v4007_v51 = vrot.slane %v6503_v17, 4  ;;  %v7251_v24 = vrot.slane %v6381_v21, 6  ;;  %v3425_v33 = vrot.slane %v6392_v43, 3 }
 0x7ca   : > { %v3418_v11 = vsel %vm1646_vm5, %v7250_v57, %v6457_v41  ;;  %v4006_v25 = vsel %vm1655_vm8, %v4005_v30, %v4004_v1  ;;  %v3899_v16 = vrot.slane %v6499_v60, 2  ;;  %v3900_v41 = vrot.slane %v6507_v12, 1 }
 0x7cb   : > { %v3420_v52 = vsel %vm1649_vm6, %v7251_v24, %v3418_v11  ;;  %v3523_v59 = vpack.c.b16 %v3522_v55, %v3522_v55  ;;  %v4008_v6 = vsel %vm1658_vm9, %v4007_v51, %v4006_v25  ;;  %v7252_v23 = vrot.slane %v6383_v5, 4 }
 0x7cc   : > { %v3422_v56 = vsel %vm1652_vm7, %v3421_v18, %v3420_v52  ;;  %v3903_v21 = vrot.slane %v6501_v63, 7  ;;  %v4009_v47 = vpack.c.b16 %v4008_v6, %v4008_v6  ;;  %v3901_v31 = vsel %vm1640_vm3, %v3900_v41, %v3899_v16 }
 0x7cd   : > { %v3424_v26 = vsel %vm1655_vm8, %v7252_v23, %v3422_v56  ;;  %v3905_v42 = vrot.slane %v6482_v7, 6  ;;  %4787 = vmatmul.msk.bf16.vlgmr.msra.gmra.mxu1 %vm1692_vm10, %v3523_v59  ;;  %v3902_v60 = vsel %vm1643_vm4, %v6480_v15, %v3901_v31  ;;  %v3907_v12 = vrot.slane %v6509_v22, 5 }
 0x7ce   : > { %v3426_v43 = vsel %vm1658_vm9, %v3425_v33, %v3424_v26  ;;  %v3909_v5 = vrot.slane %v6462_v4, 4  ;;  %v3789_v63 = vsel %vm1640_vm3, %v6505_v9, %v3788_v29  ;;  %v4014_v8 = vsel %vm1692_vm10, %v4009_v47, 0 }
 0x7cf   : > { %v3427_v55 = vpack.c.b16 %v3426_v43, %v3426_v43  ;;  %v3904_v58 = vsel %vm1646_vm5, %v3903_v21, %v3902_v60  ;;  %v3791_v7 = vsel %vm1643_vm4, %v3790_v35, %v3789_v63  ;;  %4023 = vmatpush.bf16.xpose.msra.mxu1 %v4014_v8  ;;  %v3911_v22 = vrot.slane %v6503_v17, 3 }
 0x7d0   : > { %v3906_v15 = vsel %vm1649_vm6, %v3905_v42, %v3904_v58  ;;  %v3793_v4 = vsel %vm1646_vm5, %v3792_v38, %v3791_v7  ;;  %v3655_v29 = vsel %vm1643_vm4, %v3654_v61, %v3653_v19  ;;  %v3796_v30 = vrot.slane %v6521_v36, 4 }
 0x7d1   : > { %4785 = vmatmul.msk.bf16.vlgmr.msra.gmra.mxu2 %vm1692_vm10, %v3427_v55  ;;  %v3908_v13 = vsel %vm1652_vm7, %v3907_v12, %v3906_v15  ;;  %v3795_v35 = vsel %vm1649_vm6, %v3794_v3, %v3793_v4  ;;  %v7253_v17 = vrot.slane %v6495_v10, 5  ;;  %v7254_v38 = vpack.c.bf16 %v6486_v32, %v6486_v32 }
 0x7d2   : > { %v3910_v61 = vsel %vm1655_vm8, %v3909_v5, %v3908_v13  ;;  %v3981_v19 = vrot.slane %v6505_v9, 2  ;;  %v3797_v11 = vsel %vm1652_vm7, %v3796_v30, %v3795_v35  ;;  %v7255_v3 = vrot.slane %v6497_v14, 4 }
 0x7d3   : > { %v3657_v45 = vsel %vm1646_vm5, %v7253_v17, %v3655_v29  ;;  %v3651_v53 = vunpack.c.l.b16 %v7254_v38  ;;  %v3912_v57 = vsel %vm1658_vm9, %v3911_v22, %v3910_v61  ;;  %v3798_v1 = vrot.slane %v6517_v28, 3 }
 0x7d4   : > { %v3659_v18 = vsel %vm1649_vm6, %v7255_v3, %v3657_v45  ;;  %v3913_v51 = vpack.c.b16 %v3912_v57, %v3912_v57  ;;  %v3660_v24 = vrot.slane %v6521_v36, 3  ;;  %v3980_v32 = vrot.slane %v6493_v49, 3 }
 0x7d5   : > { %v3885_v52 = vrot.slane %v6505_v9, 1  ;;  %v3799_v25 = vsel %vm1655_vm8, %v3798_v1, %v3797_v11  ;;  %v3662_v16 = vrot.slane %v6517_v28, 2  ;;  %v3800_v41 = vrot.slane %v3651_v53, 2 }
 0x7d6   : > { %v3918_v33 = vsel %vm1692_vm10, %v3913_v51, 0  ;;  %v3661_v56 = vsel %vm1652_vm7, %v3660_v24, %v3659_v18  ;;  %v3982_v59 = vsel %vm1640_vm3, %v3981_v19, %v3980_v32  ;;  %v3884_v6 = vrot.slane %v6493_v49, 2 }
 0x7d7   : > { %3927 = vmatpush.bf16.xpose.msra.mxu2 %v3918_v33  ;;  %v3983_v23 = vrot.slane %v6488_v2, 1  ;;  %v3801_v26 = vsel %vm1658_vm9, %v3800_v41, %v3799_v25  ;;  %v3663_v9 = vsel %vm1655_vm8, %v3662_v16, %v3661_v56  ;;  %v3664_v47 = vrot.slane %v3651_v53, 1 }
 0x7d8   : > { %v3886_v21 = vsel %vm1640_vm3, %v3885_v52, %v3884_v6  ;;  %v3802_v31 = vpack.c.b16 %v3801_v26, %v3801_v26  ;;  %v3888_v12 = vrot.slane %v6495_v10, 7  ;;  %v3986_v5 = vrot.slane %v6497_v14, 7 }
 0x7d9   : > { %v3984_v43 = vsel %vm1643_vm4, %v3983_v23, %v3982_v59  ;;  %v3665_v42 = vsel %vm1658_vm9, %v3664_v47, %v3663_v9  ;;  %v3887_v60 = vsel %vm1643_vm4, %v6488_v2, %v3886_v21  ;;  %v3890_v58 = vrot.slane %v6497_v14, 6 }
 0x7da   : > { %v3985_v49 = vsel %vm1646_vm5, %v6495_v10, %v3984_v43  ;;  %v3666_v63 = vpack.c.b16 %v3665_v42, %v3665_v42  ;;  %v3889_v55 = vsel %vm1646_vm5, %v3888_v12, %v3887_v60  ;;  %v3988_v2 = vrot.slane %v6521_v36, 6 }
 0x7db   : > { %v3987_v8 = vsel %vm1649_vm6, %v3986_v5, %v3985_v49  ;;  %v3891_v15 = vsel %vm1649_vm6, %v3890_v58, %v3889_v55  ;;  %v3990_v10 = vrot.slane %v6517_v28, 5  ;;  %v3892_v22 = vrot.slane %v6521_v36, 5 }
 0x7dc   : > { %v3989_v7 = vsel %vm1652_vm7, %v3988_v2, %v3987_v8  ;;  %v3894_v13 = vrot.slane %v6517_v28, 4  ;;  %v3992_v35 = vrot.slane %v3651_v53, 4  ;;  %v3896_v17 = vrot.slane %v3651_v53, 3 }
 0x7dd   : > { %4791 = vmatmul.msk.bf16.vlgmr.msrb.gmra.mxu1 %vm1692_vm10, %v3802_v31  ;;  %v3991_v4 = vsel %vm1655_vm8, %v3990_v10, %v3989_v7  ;;  %v3893_v29 = vsel %vm1652_vm7, %v3892_v22, %v3891_v15  ;;  %v4987_v9 = vpack.i.bf16 %v6228_v62, %v6232_v37  ;;  %v4992_v47 = vpack.i.bf16 %v6234_v50, %v6201_v48 }
 0x7de   : > { %v3993_v14 = vsel %vm1658_vm9, %v3992_v35, %v3991_v4  ;;  %v3895_v30 = vsel %vm1655_vm8, %v3894_v13, %v3893_v29 }
 0x7df   : > { %v3994_v45 = vpack.c.b16 %v3993_v14, %v3993_v14  ;;  %v3897_v38 = vsel %vm1658_vm9, %v3896_v17, %v3895_v30 }
 0x7e0   : > { %v3898_v61 = vpack.c.b16 %v3897_v38, %v3897_v38 }
 0x7e1   : > { %4789 = vmatmul.msk.bf16.vlgmr.msrb.gmra.mxu2 %vm1692_vm10, %v3666_v63 }
 0x7ed   : > { %4795 = vmatmul.msk.bf16.vlgmr.msra.gmra.mxu1 %vm1692_vm10, %v3994_v45  ;;  %v7256_v45 = vpack.i.bf16 %v6371_v39, %v6367_v34 }
 0x7f1   : > { %4793 = vmatmul.msk.bf16.vlgmr.msra.gmra.mxu2 %vm1692_vm10, %v3898_v61 }
 0x83a   : > { %v3362_v36 = vpop.f32.mrf.mxu1 }
 0x83b   : > { %v3366_v19 = vmul.f32 0.35355338, %v3362_v36 }
 0x83d   : > { %v3367_v57 = vsel %vm1692_vm10, %v3366_v19, -inf }
 0x83e   : > { %3368 = vmax.xlane.f32.xlu0 %v3367_v57 }
 0x842   : > { %v3364_v28 = vpop.f32.mrf.mxu1  ;;  %v3242_v11 = vpop.f32.mrf.mxu2 }
 0x843   : > { %v3246_v3 = vmul.f32 0.35355338, %v3242_v11 }
 0x845   : > { %v3247_v18 = vsel %vm1692_vm10, %v3246_v3, -inf }
 0x846   : > { %3248 = vmax.xlane.f32.xlu2 %v3247_v18 }
 0x84a   : > { %v3554_v53 = vpop.f32.mrf.mxu1  ;;  %v3244_v1 = vpop.f32.mrf.mxu2 }
 0x84b   : > { %v6730_v51 = vmul.f32 0.35355338, %v3554_v53 }
 0x84d   : > { %v3559_v24 = vsel %vm1692_vm10, %v6730_v51, -inf }
 0x84e   : > { %3560 = vmax.xlane.f32.xlu1 %v3559_v24 }
 0x852   : > { %v3556_v32 = vpop.f32.mrf.mxu1 }
 0x854   : > { %v3458_v52 = vpop.f32.mrf.mxu2 }
 0x855   : > { %v3462_v33 = vmul.f32 0.35355338, %v3458_v52 }
 0x857   : > { %v3463_v25 = vsel %vm1692_vm10, %v3462_v33, -inf }
 0x858   : > { %3464 = vmax.xlane.f32.xlu0 %v3463_v25 }
 0x85a   : > { %v3833_v56 = vpop.f32.mrf.mxu1 }
 0x85b   : > { %v3837_v41 = vmul.f32 0.35355338, %v3833_v56 }
 0x85c   : > { %v3460_v16 = vpop.f32.mrf.mxu2 }
 0x85d   : > { %v3838_v59 = vsel %vm1692_vm10, %v3837_v41, -inf }
 0x85e   : > { %3839 = vmax.xlane.f32.xlu2 %v3838_v59 }
 0x862   : > { %v3835_v6 = vpop.f32.mrf.mxu1 }
 0x864   : > { %v3713_v23 = vpop.f32.mrf.mxu2 }
 0x865   : > { %v3717_v26 = vmul.f32 0.35355338, %v3713_v23 }
 0x867   : > { %v3718_v21 = vsel %vm1692_vm10, %v3717_v26, -inf  ;;  %4988 = vrot.lane.b32.xlu1 %v4987_v9, %s5201_s28 }
 0x868   : > { %3719 = vmax.xlane.f32.xlu2 %v3718_v21 }
 0x86a   : > { %v4025_v43 = vpop.f32.mrf.mxu1 }
 0x86b   : > { %v6742_v31 = vmul.f32 0.35355338, %v4025_v43 }
 0x86c   : > { %4993 = vrot.lane.b32.xlu0 %v4992_v47, %s5201_s28  ;;  %v3715_v42 = vpop.f32.mrf.mxu2 }
 0x86d   : > { %v4030_v60 = vsel %vm1692_vm10, %v6742_v31, -inf }
 0x870   : > { %4031 = vmax.xlane.f32.xlu2 %v4030_v60 }
 0x872   : > { %v4027_v49 = vpop.f32.mrf.mxu1 }
 0x874   : > { %v3929_v62 = vpop.f32.mrf.mxu2 }
 0x875   : > { %v6747_v12 = vmul.f32 0.35355338, %v3929_v62 }
 0x877   : > { %v3934_v5 = vsel %vm1692_vm10, %v6747_v12, -inf }
 0x87c   : > { %v3931_v37 = vpop.f32.mrf.mxu2 }
 0x896   : > { %3935 = vmax.xlane.f32.xlu0 %v3934_v5 }
 0x8b1   : > { %v3369_v48 = vpop.xlane.xlu0 %3368 }
 0x8b2   : > { %v3370_v50 = vsub.f32 %v3366_v19, %v3369_v48 }
 0x8b4   : > { %v3371_v63 = vmul.f32 1.442695, %v3370_v50 }
 0x8b6   : > { %5075 = vpow2.f32 %v3371_v63 }
 0x8b9   : > { %v3249_v8 = vpop.xlane.xlu2 %3248 }
 0x8ba   : > { %v3250_v55 = vsub.f32 %v3246_v3, %v3249_v8  ;;  %v5002_v3 = vpack.i.bf16 %v6357_v40, %v6333_v0 }
 0x8bc   : > { %v6751_v58 = vpop.eup %5075  ;;  %v3251_v2 = vmul.f32 1.442695, %v3250_v55 }
 0x8bd   : > { %v3373_v7 = vsel %vm1692_vm10, %v6751_v58, 0.0 }
 0x8be   : > { %3374 = vadd.xlane.f32.xlu2 %v3373_v7  ;;  %5077 = vpow2.f32 %v3251_v2 }
 0x8c1   : > { %v6759_v13 = vpop.xlane.xlu1 %3560 }
 0x8c2   : > { %v3562_v7 = vsub.f32 %v6730_v51, %v6759_v13 }
 0x8c4   : > { %v6755_v15 = vpop.eup %5077 }
 0x8c5   : > { %v3253_v10 = vsel %vm1692_vm10, %v6755_v15, 0.0 }
 0x8c6   : > { %3254 = vadd.xlane.f32.xlu1 %v3253_v10 }
 0x8cb   : > { %v3465_v22 = vpop.xlane.xlu0 %3464 }
 0x8cc   : > { %v3466_v4 = vsub.f32 %v3462_v33, %v3465_v22 }
 0x8ce   : > { %v3467_v29 = vmul.f32 1.442695, %v3466_v4 }
 0x8d0   : > { %5079 = vpow2.f32 %v3467_v29 }
 0x8d1   : > { %v3840_v35 = vpop.xlane.xlu2 %3839 }
 0x8d2   : > { %v3841_v14 = vsub.f32 %v3837_v41, %v3840_v35 }
 0x8d4   : > { %v3842_v30 = vmul.f32 1.442695, %v3841_v14 }
 0x8d6   : > { %v6761_v17 = vpop.eup %5079  ;;  %5081 = vpow2.f32 %v3842_v30  ;;  %4998 = vrot.lane.b32.xlu2 %v7256_v45, %s5201_s28 }
 0x8d7   : > { %v3469_v38 = vsel %vm1692_vm10, %v6761_v17, 0.0 }
 0x8d8   : > { %3470 = vadd.xlane.f32.xlu0 %v3469_v38 }
 0x8d9   : > { %v4989_v61 = vpop.permute.xlu1 %4988 }
 0x8da   : > { %v4991_v36 = vunpack.i.h.bf16 %v4989_v61  ;;  %v4990_v19 = vunpack.i.l.bf16 %v4989_v61 }
 0x8db   : > { %v3720_v57 = vpop.xlane.xlu2 %3719 }
 0x8dc   : > { %v3721_v28 = vsub.f32 %v3717_v26, %v3720_v57  ;;  %v6769_v11 = vpop.eup %5081  ;;  %v3049_v18 = vrot.slane %v4991_v36, 4  ;;  %v3037_v53 = vrot.slane %v4990_v19, 4 }
 0x8dd   : > { %v3844_v34 = vsel %vm1692_vm10, %v6769_v11, 0.0 }
 0x8de   : > { %v3722_v1 = vmul.f32 1.442695, %v3721_v28  ;;  %v4994_v24 = vpop.permute.xlu0 %4993  ;;  %3845 = vadd.xlane.f32.xlu1 %v3844_v34  ;;  %5003 = vrot.lane.b32.xlu2 %v5002_v3, %s5201_s28 }
 0x8df   : > { %v4996_v39 = vunpack.i.h.bf16 %v4994_v24  ;;  %v4995_v32 = vunpack.i.l.bf16 %v4994_v24 }
 0x8e0   : > { %5083 = vpow2.f32 %v3722_v1 }
 0x8e1   : > { %v3050_v52 = vsel %vm1223_vm2, %v3049_v18, %v4996_v39  ;;  %v3051_v33 = vrot.slane %v4996_v39, 4  ;;  %v3038_v25 = vsel %vm1223_vm2, %v3037_v53, %v4995_v32  ;;  %v3039_v56 = vrot.slane %v4995_v32, 4 }
 0x8e2   : > { %v3056_v0 = vperm.slane %v3050_v52, %v5511_v20  ;;  %v3044_v40 = vperm.slane %v3038_v25, %v5511_v20  ;;  %v3563_v53 = vmul.f32 1.442695, %v3562_v7 }
 0x8e3   : > { %v3052_v16 = vsel %vm1223_vm2, %v4991_v36, %v3051_v33  ;;  %v3040_v41 = vsel %vm1223_vm2, %v4990_v19, %v3039_v56  ;;  %v4032_v59 = vpop.xlane.xlu2 %4031 }
 0x8e4   : > { %v3060_v6 = vperm.slane %v3052_v16, %v5511_v20  ;;  %v3061_v23 = vrot.slane %v3056_v0, 4  ;;  %v3048_v26 = vperm.slane %v3040_v41, %v5511_v20  ;;  %v3063_v9 = vrot.slane %v3044_v40, 4 }
 0x8e5   : > { %v4033_v21 = vsub.f32 %v6742_v31, %v4032_v59 }
 0x8e6   : > { %v6785_v47 = vpop.eup %5083  ;;  %v3073_v43 = vrot.slane %v3060_v6, 4  ;;  %v3062_v42 = vsel %vm1223_vm2, %v3061_v23, %v3044_v40  ;;  %v3064_v60 = vsel %vm1223_vm2, %v3056_v0, %v3063_v9  ;;  %v3075_v49 = vrot.slane %v3048_v26, 4 }
 0x8e7   : > { %v3068_v62 = vperm.slane %v3062_v42, %v5516_v27  ;;  %v3072_v37 = vperm.slane %v3064_v60, %v5516_v27  ;;  %v4034_v5 = vmul.f32 1.442695, %v4033_v21  ;;  %v3724_v48 = vsel %vm1692_vm10, %v6785_v47, 0.0 }
 0x8e8   : > { %v3074_v50 = vsel %vm1223_vm2, %v3073_v43, %v3048_v26  ;;  %v3076_v31 = vsel %vm1223_vm2, %v3060_v6, %v3075_v49  ;;  %3725 = vadd.xlane.f32.xlu0 %v3724_v48 }
 0x8e9   : > { %v3080_v63 = vperm.slane %v3074_v50, %v5516_v27  ;;  %v3084_v8 = vperm.slane %v3076_v31, %v5516_v27  ;;  %v3085_v55 = vrot.slane %v3068_v62, 4  ;;  %v3087_v2 = vrot.slane %v3072_v37, 4 }
 0x8ea   : > { %v3259_v10 = vpack.c.bf16 %v3068_v62, %v3068_v62  ;;  %v3261_v22 = vpack.c.bf16 %v3072_v37, %v3072_v37  ;;  %5085 = vpow2.f32 %v4034_v5 }
 0x8eb   : > { %v3086_v4 = vsel %vm1223_vm2, 0.0, %v3085_v55  ;;  %v3088_v29 = vsel %vm1223_vm2, 0.0, %v3087_v2  ;;  %v3089_v35 = vrot.slane %v3080_v63, 4  ;;  %v3091_v14 = vrot.slane %v3084_v8, 4 }
 0x8ec   : > { %v3260_v30 = vpack.c.bf16 %v3086_v4, %v3086_v4  ;;  %v3262_v45 = vpack.c.bf16 %v3088_v29, %v3088_v29  ;;  %v3263_v38 = vpack.c.bf16 %v3080_v63, %v3080_v63  ;;  %v3265_v61 = vpack.c.bf16 %v3084_v8, %v3084_v8 }
 0x8ed   : > { %v3090_v36 = vsel %vm1223_vm2, 0.0, %v3089_v35  ;;  %v3092_v19 = vsel %vm1223_vm2, 0.0, %v3091_v14  ;;  %v3275_v57 = vunpack.c.l.b16 %v3259_v10  ;;  %v3277_v28 = vunpack.c.l.b16 %v3261_v22 }
 0x8ee   : > { %v3264_v51 = vpack.c.bf16 %v3090_v36, %v3090_v36  ;;  %v3276_v13 = vunpack.c.l.b16 %v3260_v30  ;;  %v6803_v3 = vunpack.c.l.b16 %v3262_v45  ;;  %v6805_v18 = vunpack.c.l.b16 %v3263_v38 }
 0x8ef   : > { %v6807_v1 = vunpack.c.l.b16 %v3265_v61  ;;  %v3379_v24 = vrot.slane %v3275_v57, 1  ;;  %v3266_v32 = vpack.c.bf16 %v3092_v19, %v3092_v19  ;;  %v3381_v52 = vrot.slane %v3277_v28, 7 }
 0x8f0   : > { %v6809_v34 = vpop.eup %5085  ;;  %v6811_v39 = vunpack.c.l.b16 %v3264_v51  ;;  %v3383_v33 = vrot.slane %v6803_v3, 6  ;;  %v3475_v25 = vrot.slane %v3275_v57, 2  ;;  %v3385_v40 = vrot.slane %v6805_v18, 5 }
 0x8f1   : > { %v4036_v56 = vsel %vm1692_vm10, %v6809_v34, 0.0  ;;  %v3380_v0 = vsel %vm1640_vm3, %v3276_v13, %v3379_v24  ;;  %v3282_v16 = vunpack.c.l.b16 %v3266_v32  ;;  %v3283_v6 = vrot.slane %v3276_v13, 7 }
 0x8f2   : > { %4037 = vadd.xlane.f32.xlu1 %v4036_v56  ;;  %v3382_v41 = vsel %vm1643_vm4, %v3381_v52, %v3380_v0  ;;  %v3387_v59 = vrot.slane %v6811_v39, 4  ;;  %v3571_v23 = vrot.slane %v3275_v57, 3  ;;  %v3389_v9 = vrot.slane %v6807_v1, 3 }
 0x8f3   : > { %v3384_v26 = vsel %vm1646_vm5, %v3383_v33, %v3382_v41  ;;  %v3285_v21 = vrot.slane %v3277_v28, 6  ;;  %v3284_v42 = vsel %vm1640_vm3, %v3283_v6, %v3275_v57  ;;  %v3287_v60 = vrot.slane %v6803_v3, 5 }
 0x8f4   : > { %v3386_v43 = vsel %vm1649_vm6, %v3385_v40, %v3384_v26  ;;  %v3289_v49 = vrot.slane %v6805_v18, 4  ;;  %v3391_v37 = vrot.slane %v3282_v16, 2  ;;  %v3291_v48 = vrot.slane %v6811_v39, 3 }
 0x8f5   : > { %v3388_v62 = vsel %vm1652_vm7, %v3387_v59, %v3386_v43  ;;  %v3286_v5 = vsel %vm1643_vm4, %v3285_v21, %v3284_v42  ;;  %v3293_v63 = vrot.slane %v6807_v1, 2  ;;  %v3572_v8 = vrot.slane %v3276_v13, 2 }
 0x8f6   : > { %v3390_v50 = vsel %vm1655_vm8, %v3389_v9, %v3388_v62  ;;  %v3288_v31 = vsel %vm1646_vm5, %v3287_v60, %v3286_v5  ;;  %v3295_v7 = vrot.slane %v3282_v16, 1  ;;  %v3574_v10 = vrot.slane %v3277_v28, 1 }
 0x8f7   : > { %v3392_v55 = vsel %vm1658_vm9, %v3391_v37, %v3390_v50  ;;  %v3290_v2 = vsel %vm1649_vm6, %v3289_v49, %v3288_v31  ;;  %v3573_v29 = vsel %vm1640_vm3, %v3572_v8, %v3571_v23  ;;  %v3577_v35 = vrot.slane %v6805_v18, 7 }
 0x8f8   : > { %v3393_v22 = vpack.c.b16 %v3392_v55, %v3392_v55  ;;  %v3292_v4 = vsel %vm1652_vm7, %v3291_v48, %v3290_v2  ;;  %v3575_v30 = vsel %vm1643_vm4, %v3574_v10, %v3573_v29  ;;  %v3579_v45 = vrot.slane %v6811_v39, 6 }
 0x8f9   : > { %v3294_v14 = vsel %vm1655_vm8, %v3293_v63, %v3292_v4  ;;  %v3476_v38 = vrot.slane %v3276_v13, 1  ;;  %v3576_v19 = vsel %vm1646_vm5, %v6803_v3, %v3575_v30  ;;  %v3581_v57 = vrot.slane %v6807_v1, 5 }
 0x8fa   : > { %v3398_v61 = vsel %vm7257_vm12, %v3393_v22, 0  ;;  %v3296_v36 = vsel %vm1658_vm9, %v3295_v7, %v3294_v14  ;;  %v3578_v24 = vsel %vm1649_vm6, %v3577_v35, %v3576_v19  ;;  %v3479_v52 = vrot.slane %v6803_v3, 7 }
 0x8fb   : > { %3407 = vmatpush.bf16.msrb.mxu3 %v3398_v61  ;;  %v3297_v51 = vpack.c.b16 %v3296_v36, %v3296_v36  ;;  %v3477_v32 = vsel %vm1640_vm3, %v3476_v38, %v3475_v25  ;;  %v3580_v33 = vsel %vm1652_vm7, %v3579_v45, %v3578_v24  ;;  %v3583_v13 = vrot.slane %v3282_v16, 4 }
 0x8fc   : > { %v3478_v56 = vsel %vm1643_vm4, %v3277_v28, %v3477_v32  ;;  %v3481_v0 = vrot.slane %v6805_v18, 6  ;;  %v3582_v41 = vsel %vm1655_vm8, %v3581_v57, %v3580_v33  ;;  %v3483_v6 = vrot.slane %v6811_v39, 5 }
 0x8fd   : > { %v3302_v40 = vsel %vm7258_vm13, %v3297_v51, 0  ;;  %v3480_v59 = vsel %vm1646_vm5, %v3479_v52, %v3478_v56  ;;  %5087 = vpow2.f32 %v3563_v53  ;;  %v3584_v25 = vsel %vm1658_vm9, %v3583_v13, %v3582_v41 }
 0x8fe   : > { %3311 = vmatpush.bf16.msrb.mxu0 %v3302_v40  ;;  %v3482_v3 = vsel %vm1649_vm6, %v3481_v0, %v3480_v59  ;;  %v3485_v23 = vrot.slane %v6807_v1, 4  ;;  %v3585_v26 = vpack.c.b16 %v3584_v25, %v3584_v25  ;;  %v3487_v18 = vrot.slane %v3282_v16, 3 }
 0x8ff   : > { %v3484_v28 = vsel %vm1652_vm7, %v3483_v6, %v3482_v3 }
 0x900   : > { %v3486_v9 = vsel %vm1655_vm8, %v3485_v23, %v3484_v28  ;;  %v3590_v21 = vsel %vm7259_vm14, %v3585_v26, 0 }
 0x901   : > { %v3488_v43 = vsel %vm1658_vm9, %v3487_v18, %v3486_v9  ;;  %3599 = vmatpush.bf16.msra.mxu3 %v3590_v21 }
 0x902   : > { %v3489_v39 = vpack.c.b16 %v3488_v43, %v3488_v43 }
 0x903   : > { %v6862_v53 = vpop.eup %5087 }
 0x904   : > { %v3494_v42 = vsel %vm7260_vm0, %v3489_v39, 0  ;;  %v3565_v1 = vsel %vm1692_vm10, %v6862_v53, 0.0 }
 0x905   : > { %3503 = vmatpush.bf16.msra.mxu0 %v3494_v42 }
 0x907   : > { %3566 = vadd.xlane.f32.xlu2 %v3565_v1 }
 0x909   : > { %v3936_v60 = vpop.xlane.xlu0 %3935 }
 0x90a   : > { %v3937_v16 = vsub.f32 %v6747_v12, %v3936_v60 }
 0x90c   : > { %v3938_v49 = vmul.f32 1.442695, %v3937_v16 }
 0x90e   : > { %5089 = vpow2.f32 %v3938_v49 }
 0x914   : > { %v6868_v62 = vpop.eup %5089 }
 0x915   : > { %v3940_v37 = vsel %vm1692_vm10, %v6868_v62, 0.0 }
 0x916   : > { %3941 = vadd.xlane.f32.xlu0 %v3940_v37 }
 0x931   : > { %v3375_v5 = vpop.xlane.xlu2 %3374 }
 0x932   : > { %5091 = vrcp.f32 %v3375_v5 }
 0x938   : > { %v5092_v48 = vpop.eup %5091 }
 0x939   : > { %v3377_v50 = vmul.f32 %v5092_v48, %v6751_v58  ;;  %v4999_v31 = vpop.permute.xlu2 %4998  ;;  %v3255_v63 = vpop.xlane.xlu1 %3254 }
 0x93a   : > { %5093 = vrcp.f32 %v3255_v63  ;;  %v5000_v12 = vunpack.i.l.bf16 %v4999_v31  ;;  %v5001_v55 = vunpack.i.h.bf16 %v4999_v31 }
 0x93b   : > { %v3378_v8 = vpack.c.bf16 %v3377_v50, %v3377_v50  ;;  %4125 = vst.msk [vmem:[%s5484_s25 + $0x8] sm:$0xff] %vm1692_vm10, %v3377_v50 }
 0x93c   : > { %v3093_v22 = vrot.slane %v5000_v12, 4  ;;  %v3105_v35 = vrot.slane %v5001_v55, 4 }
 0x93d   : > { %4784 = vmatmul.msk.bf16.vlgmr.msrb.gmra.mxu3 %vm1692_vm10, %v3378_v8 }
 0x940   : > { %v5094_v2 = vpop.eup %5093 }
 0x941   : > { %v5004_v7 = vpop.permute.xlu2 %5003  ;;  %v3257_v10 = vmul.f32 %v5094_v2, %v6755_v15 }
 0x942   : > { %v5006_v4 = vunpack.i.h.bf16 %v5004_v7  ;;  %v5005_v29 = vunpack.i.l.bf16 %v5004_v7 }
 0x943   : > { %v3258_v58 = vpack.c.bf16 %v3257_v10, %v3257_v10  ;;  %4124 = vst.msk [vmem:[%s5484_s25] sm:$0xff] %vm1692_vm10, %v3257_v10 }
 0x944   : > { %v3107_v14 = vrot.slane %v5006_v4, 4  ;;  %v3094_v30 = vsel %vm1223_vm2, %v3093_v22, %v5005_v29  ;;  %v3095_v45 = vrot.slane %v5005_v29, 4  ;;  %v3106_v61 = vsel %vm1223_vm2, %v3105_v35, %v5006_v4 }
 0x945   : > { %v3100_v38 = vperm.slane %v3094_v30, %v5511_v20  ;;  %v3112_v15 = vperm.slane %v3106_v61, %v5511_v20  ;;  %4782 = vmatmul.msk.bf16.vlgmr.msrb.gmra.mxu0 %vm1692_vm10, %v3258_v58 }
 0x946   : > { %v3096_v36 = vsel %vm1223_vm2, %v5000_v12, %v3095_v45  ;;  %v3108_v19 = vsel %vm1223_vm2, %v5001_v55, %v3107_v14 }
 0x947   : > { %v3104_v57 = vperm.slane %v3096_v36, %v5511_v20  ;;  %v3116_v51 = vperm.slane %v3108_v19, %v5511_v20  ;;  %v3119_v24 = vrot.slane %v3100_v38, 4  ;;  %v3117_v32 = vrot.slane %v3112_v15, 4 }
 0x949   : > { %v3120_v52 = vsel %vm1223_vm2, %v3112_v15, %v3119_v24  ;;  %v3129_v33 = vrot.slane %v3116_v51, 4  ;;  %v3131_v13 = vrot.slane %v3104_v57, 4  ;;  %v3118_v56 = vsel %vm1223_vm2, %v3117_v32, %v3100_v38 }
 0x94a   : > { %v3128_v0 = vperm.slane %v3120_v52, %v5516_v27  ;;  %v3124_v41 = vperm.slane %v3118_v56, %v5516_v27 }
 0x94b   : > { %v3471_v40 = vpop.xlane.xlu0 %3470  ;;  %v3130_v59 = vsel %vm1223_vm2, %v3129_v33, %v3104_v57  ;;  %v3132_v6 = vsel %vm1223_vm2, %v3116_v51, %v3131_v13 }
 0x94c   : > { %5095 = vrcp.f32 %v3471_v40  ;;  %v3136_v20 = vperm.slane %v3130_v59, %v5516_v27  ;;  %v3140_v25 = vperm.slane %v3132_v6, %v5516_v27  ;;  %v3143_v3 = vrot.slane %v3128_v0, 4 }
 0x94d   : > { %v3732_v23 = vpack.c.bf16 %v3128_v0, %v3128_v0  ;;  %v3141_v26 = vrot.slane %v3124_v41, 4  ;;  %v3730_v28 = vpack.c.bf16 %v3124_v41, %v3124_v41 }
 0x94e   : > { %v3144_v18 = vsel %vm1223_vm2, 0.0, %v3143_v3  ;;  %v3145_v9 = vrot.slane %v3136_v20, 4  ;;  %v3147_v21 = vrot.slane %v3140_v25, 4  ;;  %v3734_v43 = vpack.c.bf16 %v3136_v20, %v3136_v20 }
 0x94f   : > { %v3142_v39 = vsel %vm1223_vm2, 0.0, %v3141_v26  ;;  %v3733_v42 = vpack.c.bf16 %v3144_v18, %v3144_v18  ;;  %v3736_v1 = vpack.c.bf16 %v3140_v25, %v3140_v25  ;;  %v6898_v60 = vunpack.c.l.b16 %v3730_v28 }
 0x950   : > { %v3146_v16 = vsel %vm1223_vm2, 0.0, %v3145_v9  ;;  %v3148_v49 = vsel %vm1223_vm2, 0.0, %v3147_v21  ;;  %v3731_v27 = vpack.c.bf16 %v3142_v39, %v3142_v39  ;;  %v6902_v37 = vunpack.c.l.b16 %v3732_v23  ;;  %vm7261_vm2 = vmmov %vm7260_vm0 }
 0x951   : > { %v3735_v48 = vpack.c.bf16 %v3146_v16, %v3146_v16  ;;  %v6904_v50 = vunpack.c.l.b16 %v3733_v42  ;;  %v6906_v31 = vunpack.c.l.b16 %v3734_v43  ;;  %v3846_v63 = vpop.xlane.xlu1 %3845  ;;  %v6910_v12 = vunpack.c.l.b16 %v3736_v1 }
 0x952   : > { %v5096_v5 = vpop.eup %5095  ;;  %v6908_v8 = vunpack.c.l.b16 %v3731_v27  ;;  %v3850_v55 = vrot.slane %v6898_v60, 1  ;;  %5097 = vrcp.f32 %v3846_v63  ;;  %v3737_v10 = vpack.c.bf16 %v3148_v49, %v3148_v49 }
 0x953   : > { %v6913_v2 = vunpack.c.l.b16 %v3735_v48  ;;  %v3473_v7 = vmul.f32 %v5096_v5, %v6761_v17  ;;  %v3946_v22 = vrot.slane %v6898_v60, 2  ;;  %v3852_v29 = vrot.slane %v6902_v37, 7 }
 0x954   : > { %v3851_v4 = vsel %vm1640_vm3, %v6908_v8, %v3850_v55  ;;  %v3854_v35 = vrot.slane %v6904_v50, 6  ;;  %v6923_v14 = vunpack.c.l.b16 %v3737_v10  ;;  %v3856_v30 = vrot.slane %v6906_v31, 5 }
 0x955   : > { %v3474_v58 = vpack.c.bf16 %v3473_v7, %v3473_v7  ;;  %4126 = vst.msk [vmem:[%s5484_s25 + $0x10] sm:$0xff] %vm1692_vm10, %v3473_v7  ;;  %v3858_v17 = vrot.slane %v6913_v2, 4  ;;  %v3853_v45 = vsel %vm1643_vm4, %v3852_v29, %v3851_v4  ;;  %v3860_v38 = vrot.slane %v6910_v12, 3 }
 0x956   : > { %v3754_v61 = vrot.slane %v6908_v8, 7  ;;  %v3756_v36 = vrot.slane %v6902_v37, 6  ;;  %v3855_v19 = vsel %vm1646_vm5, %v3854_v35, %v3853_v45  ;;  %v3862_v15 = vrot.slane %v6923_v14, 2 }
 0x957   : > { %4786 = vmatmul.msk.bf16.vlgmr.msra.gmra.mxu0 %vm1692_vm10, %v3474_v58  ;;  %v3758_v57 = vrot.slane %v6904_v50, 5  ;;  %v3760_v51 = vrot.slane %v6906_v31, 4  ;;  %v3857_v24 = vsel %vm1649_vm6, %v3856_v30, %v3855_v19  ;;  %v3762_v52 = vrot.slane %v6913_v2, 3 }
 0x958   : > { %v3755_v32 = vsel %vm1640_vm3, %v3754_v61, %v6898_v60  ;;  %v3764_v33 = vrot.slane %v6910_v12, 2  ;;  %v5098_v13 = vpop.eup %5097  ;;  %v3859_v56 = vsel %vm1652_vm7, %v3858_v17, %v3857_v24  ;;  %v3766_v40 = vrot.slane %v6923_v14, 1 }
 0x959   : > { %v3757_v0 = vsel %vm1643_vm4, %v3756_v36, %v3755_v32  ;;  %v3947_v41 = vrot.slane %v6908_v8, 1  ;;  %v6946_v59 = vmul.f32 %v5098_v13, %v6769_v11  ;;  %v3861_v20 = vsel %vm1655_vm8, %v3860_v38, %v3859_v56 }
 0x95a   : > { %v3759_v25 = vsel %vm1646_vm5, %v3758_v57, %v3757_v0  ;;  %v3950_v3 = vrot.slane %v6904_v50, 7  ;;  %v3863_v23 = vsel %vm1658_vm9, %v3862_v15, %v3861_v20  ;;  %v3952_v21 = vrot.slane %v6906_v31, 6 }
 0x95b   : > { %v3726_v6 = vpop.xlane.xlu0 %3725  ;;  %v3761_v26 = vsel %vm1649_vm6, %v3760_v51, %v3759_v25  ;;  %v3948_v28 = vsel %vm1640_vm3, %v3947_v41, %v3946_v22  ;;  %4129 = vst.msk [vmem:[%s5484_s25 + $0x28] sm:$0xff] %vm1692_vm10, %v6946_v59  ;;  %v3864_v18 = vpack.c.b16 %v3863_v23, %v3863_v23  ;;  %v3954_v42 = vrot.slane %v6913_v2, 5 }
 0x95c   : > { %5099 = vrcp.f32 %v3726_v6  ;;  %v3763_v11 = vsel %vm1652_vm7, %v3762_v52, %v3761_v26  ;;  %v3949_v9 = vsel %vm1643_vm4, %v6902_v37, %v3948_v28  ;;  %v3956_v27 = vrot.slane %v6910_v12, 4 }
 0x95d   : > { %v3765_v43 = vsel %vm1655_vm8, %v3764_v33, %v3763_v11  ;;  %v3951_v39 = vsel %vm1646_vm5, %v3950_v3, %v3949_v9  ;;  %v3869_v1 = vsel %vm7261_vm2, %v3864_v18, 0  ;;  %v3958_v63 = vrot.slane %v6923_v14, 3 }
 0x95e   : > { %v3767_v16 = vsel %vm1658_vm9, %v3766_v40, %v3765_v43  ;;  %v3953_v49 = vsel %vm1649_vm6, %v3952_v21, %v3951_v39  ;;  %3878 = vmatpush.bf16.msrb.mxu3 %v3869_v1  ;;  %v4043_v17 = vrot.slane %v6908_v8, 2  ;;  %v4042_v38 = vrot.slane %v6898_v60, 3 }
 0x95f   : > { %v3768_v5 = vpack.c.b16 %v3767_v16, %v3767_v16  ;;  %v3955_v48 = vsel %vm1652_vm7, %v3954_v42, %v3953_v49  ;;  %v4045_v36 = vrot.slane %v6902_v37, 1  ;;  %v4048_v57 = vrot.slane %v6906_v31, 7  ;;  %v4856_v49 = vld [vmem:[%s5443_s8 + $0x8] sm:$0xff] }
 0x960   : > { %v3957_v55 = vsel %vm1655_vm8, %v3956_v27, %v3955_v48  ;;  %v4050_v60 = vrot.slane %v6913_v2, 6  ;;  %v4052_v24 = vrot.slane %v6910_v12, 5  ;;  %v4054_v32 = vrot.slane %v6923_v14, 4  ;;  %4116 = vmatpush.bf16.msrb.mxu2 %v4856_v49  ;;  %v4855_v27 = vld [vmem:[%s5443_s8] sm:$0xff] }
 0x961   : > { %v3773_v10 = vsel %vm7262_vm11, %v3768_v5, 0  ;;  %v3959_v22 = vsel %vm1658_vm9, %v3958_v63, %v3957_v55 }
 0x962   : > { %v5100_v7 = vpop.eup %5099  ;;  %3782 = vmatpush.bf16.msrb.mxu0 %v3773_v10  ;;  %v3960_v29 = vpack.c.b16 %v3959_v22, %v3959_v22 }
 0x963   : > { %v3728_v4 = vmul.f32 %v5100_v7, %v6785_v47  ;;  %v4044_v47 = vsel %vm1640_vm3, %v4043_v17, %v4042_v38  ;;  %vm7264_vm3 = vmmov %vm7260_vm0  ;;  %vm4267_vm0 = vcmask 523264  }
 0x964   : > { %v3965_v58 = vsel %vm7263_vm15, %v3960_v29, 0  ;;  %v4046_v19 = vsel %vm1643_vm4, %v4045_v36, %v4044_v47  ;;  %4117 = vmatpush.bf16.msrb.mxu2 %v4855_v27  ;;  %vm7265_vm4 = vcmask 130048   ;;  %v5030_v47 = vld [vmem:[%s7270_s5] ss:$0 sm:$0xff] }
 0x965   : > { %v3729_v35 = vpack.c.bf16 %v3728_v4, %v3728_v4  ;;  %4128 = vst.msk [vmem:[%s5484_s25 + $0x20] sm:$0xff] %vm1692_vm10, %v3728_v4  ;;  %v4038_v30 = vpop.xlane.xlu1 %4037  ;;  %v4047_v15 = vsel %vm1646_vm5, %v6904_v50, %v4046_v19  ;;  %vm7266_vm5 = vmmov %vm7265_vm4 }
 0x966   : > { %3974 = vmatpush.bf16.msra.mxu0 %v3965_v58  ;;  %5101 = vrcp.f32 %v4038_v30  ;;  %v4049_v8 = vsel %vm1649_vm6, %v4048_v57, %v4047_v15  ;;  %vm7267_vm6 = vcmask 195584  }
 0x967   : > { %4790 = vmatmul.msk.bf16.vlgmr.msrb.gmra.mxu0 %vm1692_vm10, %v3729_v35 }
 0x96c   : > { %v5102_v45 = vpop.eup %5101 }
 0x96d   : > { %v4040_v61 = vmul.f32 %v5102_v45, %v6809_v34  ;;  %v4051_v34 = vsel %vm1652_vm7, %v4050_v60, %v4049_v8  ;;  %vm7268_vm7 = vmmov %vm7267_vm6 }
 0x96e   : > { %v4053_v37 = vsel %vm1655_vm8, %v4052_v24, %v4051_v34 }
 0x96f   : > { %4131 = vst.msk [vmem:[%s5484_s25 + $0x38] sm:$0xff] %vm1692_vm10, %v4040_v61  ;;  %v4055_v52 = vsel %vm1658_vm9, %v4054_v32, %v4053_v37  ;;  %v4041_v40 = vpack.c.bf16 %v4040_v61, %v4040_v61 }
 0x970   : > { %v4056_v33 = vpack.c.b16 %v4055_v52, %v4055_v52 }
 0x972   : > { %v4061_v2 = vsel %vm7264_vm3, %v4056_v33, 0 }
 0x97a   : > { %v3567_v51 = vpop.xlane.xlu2 %3566 }
 0x97b   : > { %5103 = vrcp.f32 %v3567_v51 }
 0x981   : > { %v5104_v50 = vpop.eup %5103 }
 0x982   : > { %v3569_v31 = vmul.f32 %v5104_v50, %v6862_v53  ;;  %v3849_v53 = vpack.c.bf16 %v6946_v59, %v6946_v59 }
 0x984   : > { %v3570_v13 = vpack.c.bf16 %v3569_v31, %v3569_v31  ;;  %4127 = vst.msk [vmem:[%s5484_s25 + $0x18] sm:$0xff] %vm1692_vm10, %v3569_v31 }
 0x986   : > { %4788 = vmatmul.msk.bf16.vlgmr.msra.gmra.mxu3 %vm1692_vm10, %v3570_v13 }
 0x987   : > { %4070 = vmatpush.bf16.msra.mxu3 %v4061_v2 }
 0x989   : > { %v3942_v12 = vpop.xlane.xlu0 %3941 }
 0x98a   : > { %5105 = vrcp.f32 %v3942_v12 }
 0x990   : > { %v5106_v56 = vpop.eup %5105 }
 0x991   : > { %v3944_v0 = vmul.f32 %v5106_v56, %v6868_v62 }
 0x993   : > { %v3945_v14 = vpack.c.bf16 %v3944_v0, %v3944_v0  ;;  %4130 = vst.msk [vmem:[%s5484_s25 + $0x30] sm:$0xff] %vm1692_vm10, %v3944_v0  ;;  %v4858_v0 = vld [vmem:[%s5460_s7 + $0x8] sm:$0xff] }
 0x994   : > { %4220 = vmatpush.bf16.msrb.mxu0 %v4858_v0 }
 0x995   : > { %4794 = vmatmul.msk.bf16.vlgmr.msra.gmra.mxu0 %vm1692_vm10, %v3945_v14  ;;  %v4857_v14 = vld [vmem:[%s5460_s7] sm:$0xff] }
 0x996   : > { %4792 = vmatmul.msk.bf16.vlgmr.msrb.gmra.mxu3 %vm1692_vm10, %v3849_v53 }
 0x998   : > { %4221 = vmatpush.bf16.msrb.mxu0 %v4857_v14 }
 0x9a6   : > { %4796 = vmatmul.msk.bf16.vlgmr.msra.gmra.mxu3 %vm1692_vm10, %v4041_v40 }
 0x9c0   : > { %v3409_v41 = vpop.f32.mrf.mxu3 }
 0x9c2   : > { %v3313_v6 = vpop.f32.mrf.mxu0 }
 0x9c8   : > { %v3411_v20 = vpop.f32.mrf.mxu3 }
 0x9ca   : > { %v3315_v25 = vpop.f32.mrf.mxu0 }
 0x9d4   : > { %v3505_v3 = vpop.f32.mrf.mxu0 }
 0x9dc   : > { %v3507_v23 = vpop.f32.mrf.mxu0 }
 0x9e4   : > { %v3784_v62 = vpop.f32.mrf.mxu0 }
 0x9ec   : > { %v3786_v26 = vpop.f32.mrf.mxu0 }
 0xa09   : > { %v3601_v28 = vpop.f32.mrf.mxu3 }
 0xa11   : > { %v3603_v59 = vpop.f32.mrf.mxu3 }
 0xa12   : > { %v3976_v18 = vpop.f32.mrf.mxu0 }
 0xa13   : > { %v5012_v11 = vpack.i.bf16 %v3976_v18, %v3505_v3 }
 0xa15   : > { %5013 = vrot.lane.b32.xlu0 %v5012_v11, %s5207_s17 }
 0xa19   : > { %v3880_v21 = vpop.f32.mrf.mxu3 }
 0xa1a   : > { %v3978_v9 = vpop.f32.mrf.mxu0  ;;  %v5007_v43 = vpack.i.bf16 %v3880_v21, %v3409_v41 }
 0xa1c   : > { %5008 = vrot.lane.b32.xlu1 %v5007_v43, %s5205_s23 }
 0xa21   : > { %v3882_v39 = vpop.f32.mrf.mxu3 }
 0xa29   : > { %v4072_v42 = vpop.f32.mrf.mxu3 }
 0xa2a   : > { %v5017_v1 = vpack.i.bf16 %v4072_v42, %v3601_v28 }
 0xa2c   : > { %5018 = vrot.lane.b32.xlu2 %v5017_v1, %s5206_s16  ;;  %s7271_s16 = sld [smem:[#allocation29_spill]]  ;;  %v5032_v1 = vld [vmem:[%s7274_s27] ss:$0 sm:$0xff] }
 0xa31   : > { %v4074_v16 = vpop.f32.mrf.mxu3 }
 0xa32   : > { %s7272_s17 = scalar_lea.vmem %s7271_s16, %s5395_s0 }
 0xa33   : > { %v5031_v21 = vld [vmem:[%s7272_s17] ss:$0 sm:$0xff] }
 0xa86   : > { %v5019_v48 = vpop.permute.xlu2 %5018 }
 0xa87   : > { %v5014_v5 = vpop.permute.xlu0 %5013  ;;  %v5021_v4 = vunpack.i.h.bf16 %v5019_v48  ;;  %v5020_v29 = vunpack.i.l.bf16 %v5019_v48 }
 0xa88   : > { %v5016_v10 = vunpack.i.h.bf16 %v5014_v5  ;;  %v5015_v22 = vunpack.i.l.bf16 %v5014_v5 }
 0xa8e   : > { %v5009_v63 = vpop.permute.xlu1 %5008 }
 0xa8f   : > { %v5011_v55 = vunpack.i.h.bf16 %v5009_v63  ;;  %v5010_v7 = vunpack.i.l.bf16 %v5009_v63 }
 0xa91   : > { %v3617_v35 = vsel %vm1692_vm10, %v3313_v6, %v5010_v7  ;;  %v4088_v58 = vsel %vm1692_vm10, %v3784_v62, %v5011_v55  ;;  %v4862_v55 = vld [vmem:[%s5470_s14 + $0x18] sm:$0xff]  ;;  %v4861_v7 = vld [vmem:[%s5470_s14 + $0x10] sm:$0xff] }
 0xa92   : > { %v3618_v30 = vsel %vm7265_vm4, %v3617_v35, %v5015_v22  ;;  %v4089_v17 = vsel %vm7266_vm5, %v4088_v58, %v5016_v10  ;;  %4275 = vmatpush.bf16.msrb.mxu1 %v4862_v55  ;;  %v4860_v10 = vld [vmem:[%s5470_s14 + $0x8] sm:$0xff]  ;;  %v4859_v22 = vld [vmem:[%s5470_s14] sm:$0xff] }
 0xa93   : > { %v3619_v45 = vsel %vm7267_vm6, %v3618_v30, %v5020_v29  ;;  %v4090_v38 = vsel %vm7268_vm7, %v4089_v17, %v5021_v4  ;;  %v5033_v29 = vld [vmem:[%s1108_s11] ss:$0 sm:$0xff] }
 0xa94   : > { %v4091_v61 = vpack.c.bf16 %v4090_v38, %v3619_v45 }
 0xa96   : > { %4805 = vmatmul.msk.bf16.vlgmr.msrb.gmra.mxu2 %vm1179_vm1, %v4091_v61  ;;  %4276 = vmatpush.bf16.msrb.mxu1 %v4861_v7  ;;  %v5034_v61 = vld [vmem:[%s1116_s22] ss:$0 sm:$0xff] }
 0xa9a   : > { %4277 = vmatpush.bf16.msrb.mxu1 %v4860_v10 }
 0xa9e   : > { %4278 = vmatpush.bf16.msrb.mxu1 %v4859_v22 }
 0xb19   : > { %v4119_v36 = vpop.f32.mrf.mxu2 }
 0xb1a   : > { %v4120_v19 = vadd.f32 %v5030_v47, %v4119_v36 }
 0xb1c   : > { %v4132_v15 = vadd.f32 %v4120_v19, %v6221_v44 }
 0xb1e   : > { %v4136_v57 = vsel %vm1179_vm1, %v4132_v15, 0.0 }
 0xb1f   : > { %4137 = vadd.xlane.f32.xlu0 %v4136_v57 }
 0xb21   : > { %v4121_v8 = vpop.f32.mrf.mxu2 }
 0xb22   : > { %v4122_v60 = vadd.f32 %v5030_v47, %v4121_v8 }
 0xb24   : > { %v4133_v34 = vadd.f32 %v4122_v60, %v6223_v46 }
 0xb26   : > { %v4139_v51 = vsel %vm1179_vm1, %v4133_v34, 0.0 }
 0xb27   : > { %4140 = vadd.xlane.f32.xlu1 %v4139_v51 }
 0xb92   : > { %v4138_v24 = vpop.xlane.xlu0 %4137 }
 0xb93   : > { %v4142_v37 = vmul.f32 %v4138_v24, %v6185_v54 }
 0xb95   : > { %v4144_v32 = vsub.f32 %v4132_v15, %v4142_v37 }
 0xb97   : > { %v4146_v52 = vmul.f32 %v4144_v32, %v4144_v32 }
 0xb99   : > { %v4148_v50 = vsel %vm1179_vm1, %v4146_v52, 0.0 }
 0xb9a   : > { %v4141_v44 = vpop.xlane.xlu1 %4140  ;;  %4149 = vadd.xlane.f32.xlu2 %v4148_v50 }
 0xb9b   : > { %v4143_v31 = vmul.f32 %v4141_v44, %v6185_v54 }
 0xb9d   : > { %v4145_v33 = vsub.f32 %v4133_v34, %v4143_v31 }
 0xb9f   : > { %v4147_v13 = vmul.f32 %v4145_v33, %v4145_v33 }
 0xba1   : > { %v4151_v46 = vsel %vm1179_vm1, %v4147_v13, 0.0 }
 0xba2   : > { %4152 = vadd.xlane.f32.xlu0 %v4151_v46 }
 0xc0d   : > { %v4150_v2 = vpop.xlane.xlu2 %4149 }
 0xc0e   : > { %v4154_v12 = vmul.f32 %v4150_v2, %v6185_v54 }
 0xc10   : > { %v4156_v56 = vadd.f32 1e-05, %v4154_v12 }
 0xc12   : > { %5107 = vrsqrt.f32 %v4156_v56  ;;  %vm4164_vm9 = vweird.f32 %v4156_v56 }
 0xc15   : > { %v4153_v53 = vpop.xlane.xlu0 %4152 }
 0xc16   : > { %v4155_v40 = vmul.f32 %v4153_v53, %v6185_v54 }
 0xc18   : > { %v5108_v41 = vpop.eup %5107  ;;  %v4157_v6 = vadd.f32 1e-05, %v4155_v40 }
 0xc19   : > { %v4159_v20 = vmul.f32 %v5108_v41, %v4156_v56  ;;  %vm4165_vm8 = vweird.f32 %v5108_v41 }
 0xc1a   : > { %5109 = vrsqrt.f32 %v4157_v6  ;;  %vm4166_vm10 = vmor %vm4164_vm9, %vm4165_vm8  ;;  %vm4174_vm13 = vweird.f32 %v4157_v6 }
 0xc1b   : > { %v4160_v25 = vmul.f32 %v5108_v41, %v4159_v20 }
 0xc1d   : > { %v4161_v3 = vmul.f32 0.5, %v4160_v25 }
 0xc1f   : > { %v4162_v23 = vsub.f32 1.5, %v4161_v3 }
 0xc20   : > { %v5110_v62 = vpop.eup %5109 }
 0xc21   : > { %v4163_v26 = vmul.f32 %v5108_v41, %v4162_v23  ;;  %v4169_v28 = vmul.f32 %v5110_v62, %v4157_v6  ;;  %vm4175_vm12 = vweird.f32 %v5110_v62 }
 0xc22   : > { %vm4176_vm14 = vmor %vm4174_vm13, %vm4175_vm12 }
 0xc23   : > { %v4170_v18 = vmul.f32 %v5110_v62, %v4169_v28  ;;  %v4167_v59 = vsel %vm4166_vm10, %v5108_v41, %v4163_v26  ;;  %v5036_v28 = vld [vmem:[%s1122_s15] ss:$0 sm:$0xff] }
 0xc24   : > { %v4178_v43 = vmul.f32 %v4167_v59, %v4144_v32 }
 0xc25   : > { %v4171_v11 = vmul.f32 0.5, %v4170_v18 }
 0xc26   : > { %v4183_v16 = vmul.f32 %v5031_v21, %v4178_v43 }
 0xc27   : > { %v4172_v9 = vsub.f32 1.5, %v4171_v11 }
 0xc28   : > { %v4188_v5 = vadd.f32 %v5032_v1, %v4183_v16 }
 0xc29   : > { %v4173_v39 = vmul.f32 %v5110_v62, %v4172_v9 }
 0xc2b   : > { %v4177_v42 = vsel %vm4176_vm14, %v5110_v62, %v4173_v39  ;;  %v5035_v62 = vld [vmem:[%s1119_s9] ss:$0 sm:$0xff]  ;;  %s7279_s9 = sld [smem:[#allocation9_spill]] }
 0xc2c   : > { %v4179_v49 = vmul.f32 %v4177_v42, %v4145_v33 }
 0xc2e   : > { %v4184_v27 = vmul.f32 %v5031_v21, %v4179_v49 }
 0xc30   : > { %v4189_v48 = vadd.f32 %v5032_v1, %v4184_v27 }
 0xc31   : > { %p4832_p13 = scmp.ne.s32.totalorder %s7279_s9, 1 }
 0xc32   : > { %v4190_v63 = vpack.c.bf16 %v4189_v48, %v4188_v5  ;;  %s7280_s5 = sld [smem:[#allocation37_spill]] (!%p4832_p13) }
 0xc34   : > { %4814 = vmatmul.msk.bf16.vlgmr.msrb.gmra.mxu0 %vm1179_vm1, %v4190_v63 }
 0xc38   : > { %s7281_s7 = smov (!%p4832_p13), %s7280_s5 }
 0xcb1   : > { %v4223_v4 = vpop.f32.mrf.mxu0 }
 0xcb2   : > { %v4224_v35 = vadd.f32 %v5033_v29, %v4223_v4 }
 0xcb4   : > { %v4228_v17 = vmax.f32 %v4224_v35, 0.0 }
 0xcb9   : > { %v4225_v58 = vpop.f32.mrf.mxu0 }
 0xcba   : > { %v4226_v30 = vadd.f32 %v5033_v29, %v4225_v58 }
 0xcbc   : > { %v4229_v45 = vmax.f32 %v4226_v30, 0.0 }
 0xcbe   : > { %v4230_v38 = vpack.c.bf16 %v4229_v45, %v4228_v17 }
 0xcc0   : > { %4831 = vmatmul.msk.bf16.vlgmr.msrb.gmra.mxu1 %vm4267_vm0, %v4230_v38 }
 0xd3d   : > { %v4280_v47 = vpop.f32.mrf.mxu1 }
 0xd3e   : > { %v4281_v36 = vadd.f32 %v5034_v61, %v4280_v47 }
 0xd40   : > { %v4285_v19 = vadd.f32 %v4281_v36, %v4188_v5 }
 0xd42   : > { %v4289_v15 = vsel %vm1179_vm1, %v4285_v19, 0.0 }
 0xd43   : > { %4290 = vadd.xlane.f32.xlu1 %v4289_v15 }
 0xd45   : > { %v4282_v57 = vpop.f32.mrf.mxu1 }
 0xd46   : > { %v4283_v8 = vadd.f32 %v5034_v61, %v4282_v57 }
 0xd48   : > { %v4286_v60 = vadd.f32 %v4283_v8, %v4189_v48 }
 0xd4a   : > { %v4292_v34 = vsel %vm1179_vm1, %v4286_v60, 0.0 }
 0xd4b   : > { %4293 = vadd.xlane.f32.xlu0 %v4292_v34 }
 0xdb6   : > { %v4291_v51 = vpop.xlane.xlu1 %4290 }
 0xdb7   : > { %v4295_v24 = vmul.f32 %v4291_v51, %v6185_v54 }
 0xdb9   : > { %v4297_v37 = vsub.f32 %v4285_v19, %v4295_v24 }
 0xdbb   : > { %v4299_v32 = vmul.f32 %v4297_v37, %v4297_v37 }
 0xdbd   : > { %v4301_v52 = vsel %vm1179_vm1, %v4299_v32, 0.0 }
 0xdbe   : > { %v4294_v50 = vpop.xlane.xlu0 %4293  ;;  %4302 = vadd.xlane.f32.xlu1 %v4301_v52 }
 0xdbf   : > { %v4296_v44 = vmul.f32 %v4294_v50, %v6185_v54 }
 0xdc1   : > { %v4298_v31 = vsub.f32 %v4286_v60, %v4296_v44 }
 0xdc3   : > { %v4300_v33 = vmul.f32 %v4298_v31, %v4298_v31 }
 0xdc5   : > { %v4304_v13 = vsel %vm1179_vm1, %v4300_v33, 0.0 }
 0xdc6   : > { %4305 = vadd.xlane.f32.xlu2 %v4304_v13 }
 0xe31   : > { %v4303_v46 = vpop.xlane.xlu1 %4302 }
 0xe32   : > { %v4307_v2 = vmul.f32 %v4303_v46, %v6185_v54 }
 0xe34   : > { %v4309_v12 = vadd.f32 1e-05, %v4307_v2 }
 0xe36   : > { %5111 = vrsqrt.f32 %v4309_v12  ;;  %vm4317_vm11 = vweird.f32 %v4309_v12 }
 0xe39   : > { %v4306_v56 = vpop.xlane.xlu2 %4305 }
 0xe3a   : > { %v4308_v0 = vmul.f32 %v4306_v56, %v6185_v54 }
 0xe3c   : > { %v5112_v14 = vpop.eup %5111  ;;  %v4310_v53 = vadd.f32 1e-05, %v4308_v0 }
 0xe3d   : > { %v4312_v40 = vmul.f32 %v5112_v14, %v4309_v12  ;;  %vm4318_vm2 = vweird.f32 %v5112_v14 }
 0xe3e   : > { %5113 = vrsqrt.f32 %v4310_v53  ;;  %vm4319_vm15 = vmor %vm4317_vm11, %vm4318_vm2  ;;  %vm4327_vm4 = vweird.f32 %v4310_v53 }
 0xe3f   : > { %v4313_v41 = vmul.f32 %v5112_v14, %v4312_v40 }
 0xe41   : > { %v4314_v6 = vmul.f32 0.5, %v4313_v41 }
 0xe43   : > { %v4315_v20 = vsub.f32 1.5, %v4314_v6 }
 0xe44   : > { %v5114_v25 = vpop.eup %5113 }
 0xe45   : > { %v4316_v3 = vmul.f32 %v5112_v14, %v4315_v20  ;;  %v4322_v23 = vmul.f32 %v5114_v25, %v4310_v53  ;;  %vm4328_vm3 = vweird.f32 %v5114_v25 }
 0xe46   : > { %vm4329_vm5 = vmor %vm4327_vm4, %vm4328_vm3 }
 0xe47   : > { %v4320_v54 = vsel %vm4319_vm15, %v5112_v14, %v4316_v3  ;;  %v4323_v26 = vmul.f32 %v5114_v25, %v4322_v23 }
 0xe48   : > { %v4331_v18 = vmul.f32 %v4320_v54, %v4297_v37 }
 0xe49   : > { %v4324_v59 = vmul.f32 0.5, %v4323_v26 }
 0xe4a   : > { %v4336_v11 = vmul.f32 %v5035_v62, %v4331_v18 }
 0xe4b   : > { %v4325_v9 = vsub.f32 1.5, %v4324_v59 }
 0xe4c   : > { %v4341_v21 = vadd.f32 %v5036_v28, %v4336_v11 }
 0xe4d   : > { %v4326_v43 = vmul.f32 %v5114_v25, %v4325_v9 }
 0xe4e   : > { %4343 = vst.msk [vmem:[#allocation2] sm:$0xff] %vm1179_vm1, %v4341_v21 }
 0xe4f   : > { %v4330_v39 = vsel %vm4329_vm5, %v5114_v25, %v4326_v43 }
 0xe50   : > { %v4332_v42 = vmul.f32 %v4330_v39, %v4298_v31 }
 0xe52   : > { %v4337_v1 = vmul.f32 %v5035_v62, %v4332_v42  ;;  %4348 = sbr.rel (%p4832_p13) target bundleno = 3673 (0xe59), region = 120 }
 0xe54   : > { %v4342_v16 = vadd.f32 %v5036_v28, %v4337_v1 }
 0xe56   : > { %4344 = vst.msk [vmem:[#allocation2 + $0x8] sm:$0xff] %vm1179_vm1, %v4342_v16 }
 0xe57   : > { %4349 = vst.msk [vmem:[%s7280_s5] sm:$0xff] %vm1179_vm1, %v4341_v21 }
 0xe58   : > { %4350 = vst.msk [vmem:[%s7281_s7 + $0x8] sm:$0xff] %vm1179_vm1, %v4342_v16 }
 0xe59 PF: > { %s7282_s17 = sld [smem:[#allocation9_spill]]  ;;  %s4376_s29 = sshll.u32 %s5484_s25, 4  ;;  %s4377_s29 = int_to_ptr.vmem [resolvable:$true] %s4376_s29 }
 0xe5a   : > { %s7283_s30 = sld [smem:[#allocation7_spill]] }
 0xe5b   : > { %s7285_s26 = sld [smem:[#allocation38_spill]] }
 0xe5f   : > { %s4863_s4 = sshll.u32 %s7282_s17, 6 }
 0xe60   : > { %s7287_s11 = sand.u32 1, %s7283_s30  }
 0xe61   : > { %s7286_s19 = smov %s7285_s26  ;;  %s4375_s21 = scalar_lea.hbm %s7285_s26, %s4863_s4 }
 0xe62   : > { %s4378_s24 = sshll.u32 %s4375_s21, 4  ;;  %s4357_s14 = scalar_lea.sflag [#allocation4], %s7287_s11  ;;  %s4379_s24 = int_to_ptr.hbm [resolvable:$true] %s4378_s24 }
 0xe63   : > { %s5131_s22 = sshra.s32 %s4379_s24, 4  ;;  %s5137_s9 = scalar_lea.hbm %s7286_s19, 128  ;;  %s5132_s22 = int_to_ptr.hbm [resolvable:$true] %s5131_s22 }
 0xe64   : > { %s5133_s8 = scalar_lea.hbm %s5132_s22, 64  ;;  %p5138_p3 = scmp.lt.s32.totalorder %s5132_s22, %s7286_s19 }
 0xe65   : > { %p5134_p0 = scmp.ne.s32.totalorder %s5132_s22, %s5133_s8  ;;  %p5139_p5 = scmp.lt.s32.totalorder %s5137_s9, %s5133_s8 }
 0xe67   : > { %p5135_p1 = pnand %p5134_p0, %p5375_p4  ;;  %p5140_p6 = por %p5139_p5, %p5138_p3 }
 0xe69   : > { %p5136_p2 = pneg %p5135_p1 }
 0xe6b   : > { %p5141_p7 = pnand %p5140_p6, %p5136_p2 }
 0xe6d   : > { %5144 = shalt.err (!%p5141_p7)
}
 0xe6e   : > { %s5209_s25 = smov 128  }
 0xe6f   : > { %4864 = dma.vmem_to_hbm [thread:$0]  (%p5375_p4), %s4377_s29, 1024, %s4379_s24, %s4357_s14, %s5209_s25, %s5209_s25, %s5205_s23  }
 0xe70 PF: > { %s7288_s5 = sld [smem:[#allocation11_spill]] }
 0xe71   : > { %s7289_s28 = sld [smem:[#allocation6_spill]] }
 0xe76   : > { %p4870_p9 = scmp.ge.s32.totalorder %s7288_s5, 2 }
 0xe77   : > { %s4401_s17 = sand.u32 1, %s7289_s28  }
 0xe78   : > { %p4867_p10 = pnand %p4870_p9, %p5382_p8  ;;  %s4402_s30 = scalar_lea.sflag [#allocation4], %s4401_s17 }
 0xe7a   : > { %p4868_p11 = pneg %p4867_p10 }
 0xe7c   : > { %5170 = dma.done.wait (%p4868_p11), %s4402_s30, 1024  }
 0xe7d   : > { %5172 = vsyncadd (%p4868_p11), %s4402_s30, 4294966272  ;;  %s38_s2 = sadd.s32 1, %s7288_s5   ;;  %s7291_s5 = sld [smem:[#allocation7_spill]] }
 0xe7e   : > { %p35_p12 = scmp.ge.s32.totalorder %s38_s2, 4   ;;  %s7292_s26 = sld [smem:[#allocation8_spill]] }
 0xe7f   : > { %s7293_s27 = sld [smem:[#allocation15_spill]] }
 0xe80   : > { %s7294_s28 = sld [smem:[#allocation10_spill]]  ;;  %37 = sbr.rel (!%p35_p12) target bundleno = 28 (0x1c), region = 233 }
 0xe81   : > { %s7295_s6 = sld [smem:[#allocation12_spill]] }
 0xe85   :  { %4408 = vsyncpa [#allocation4], 1 }
 0xe86   :  { %4410 = vsyncpa [#allocation4 + $0x1], 1 }

</bundles_post_ra>
